<compile_context>
chip_gen: v7x
topology: tpu7x:2x2x1
jax: 0.10.0
libtpu: 0.0.40
codegen_flags: <defaults>
</compile_context>

<pallas_src>
import functools

import jax
import jax.numpy as jnp
from jax import lax
from jax.experimental import pallas as pl
from jax.experimental.pallas import tpu as pltpu


NEG_SLOPE = 0.1
LANE = 128


def _conv_bn_lrelu_kernel(x_ref, w_ref, scale_ref, bias_ref, out_ref, xp_ref, *,
                          ksize, stride, dilation, padding, out_h, out_w):
    """One (batch tile, C_out tile) grid step.

    x_ref:     (Bt, H, W, Cin)         bf16  unpadded NHWC input images
    w_ref:     (k*k*Cin, Ct)           bf16  taps folded into the contraction dim
    scale_ref: (1, Ct)                 f32   folded BN scale
    bias_ref:  (1, Ct)                 f32   folded conv-bias + BN bias
    out_ref:   (Bt, out_h, out_w, Ct)  bf16
    xp_ref:    (Bt, Hp, Wp, Cin)       bf16  VMEM scratch for in-kernel zero padding
    """
    bt, h, w, cin = x_ref.shape
    ct = out_ref.shape[-1]
    kk = ksize * ksize

    if padding > 0:
        # Zero-pad in VMEM; the padded image never touches HBM.
        xp_ref[...] = jnp.zeros_like(xp_ref)
        xp_ref[:, padding:padding + h, padding:padding + w, :] = x_ref[...]
        src = xp_ref
    else:
        src = x_ref

    # Build the (M, k*k*Cin) patch operand: k*k shifted windows concatenated along
    # the channel axis (tap-major, Cin-minor — matches the wrapper weight layout).
    wins = []
    for t in range(kk):
        i, j = divmod(t, ksize)
        hi, wj = i * dilation, j * dilation
        if stride == 1:
            win = src[:, hi:hi + out_h, wj:wj + out_w, :]
        else:
            # TODO(synk): stride > 1 uses doubly-strided ref reads; untested on Mosaic.
            win = src[:, pl.ds(hi, out_h, stride=stride),
                      pl.ds(wj, out_w, stride=stride), :]
        wins.append(win)
    patch = jnp.concatenate(wins, axis=-1)                       # (Bt, Ho, Wo, kk*Cin)
    patch = patch.reshape(bt * out_h * out_w, kk * cin)          # (M, K)

    # Single MXU matmul per grid step; accumulation stays inside the MXU (f32).
    acc = jnp.dot(patch, w_ref[...], preferred_element_type=jnp.float32)   # (M, Ct)

    y = acc * scale_ref[...] + bias_ref[...]          # conv bias + BN folded in (f32)
    y = jnp.maximum(y, NEG_SLOPE * y)                 # LeakyReLU(0.1): mul + max
    out_ref[...] = y.reshape(bt, out_h, out_w, ct).astype(out_ref.dtype)


def _pick_cout_tile(cout):
    """Adaptive lane padding: pad to 128-multiples only when the overhead is < 2x."""
    cout_p = ((cout + LANE - 1) // LANE) * LANE
    if cout % LANE == 0:
        return cout, LANE
    if cout_p <= 2 * cout:
        return cout_p, LANE
    return cout, cout            # tiny Cout: full-dim block, no 16x writeback inflation


@functools.partial(jax.jit, static_argnames=("ksize", "stride", "padding", "dilation"))
def conv_bn_leakyrelu2(x, weight, conv_bias, gamma, beta, run_mean, run_var,
                       *, ksize, stride=1, padding=0, dilation=1, eps=1e-5):
    """Forward pass of Conv_BN_LeakyReLU2. x is NCHW, weight is (Cout, Cin, k, k)."""
    N, Cin, H, W = x.shape
    Cout = weight.shape[0]
    Ho = (H + 2 * padding - dilation * (ksize - 1) - 1) // stride + 1
    Wo = (W + 2 * padding - dilation * (ksize - 1) - 1) // stride + 1
    Hp, Wp = H + 2 * padding, W + 2 * padding
    kk = ksize * ksize
    kkcin = kk * Cin

    cout_p, ct = _pick_cout_tile(Cout)

    # NCHW -> NHWC + bf16 cast: one fused XLA pass. Padding happens in-kernel (VMEM),
    # so the padded image never round-trips through HBM.
    x_nhwc = jnp.transpose(x, (0, 2, 3, 1)).astype(jnp.bfloat16)

    # (Cout, Cin, kh, kw) -> (kh, kw, Cin, Cout) -> (k*k*Cin, Cout_p), bf16.
    w = jnp.transpose(weight, (2, 3, 1, 0)).reshape(kkcin, Cout)
    w = jnp.pad(w, ((0, 0), (0, cout_p - Cout))).astype(jnp.bfloat16)

    # Fold conv bias + eval-mode BatchNorm into per-channel scale/bias (kept f32).
    scale = gamma / jnp.sqrt(run_var + eps)
    bias = (conv_bias - run_mean) * scale + beta
    scale_p = jnp.pad(scale, (0, cout_p - Cout)).reshape(1, cout_p).astype(jnp.float32)
    bias_p = jnp.pad(bias, (0, cout_p - Cout)).reshape(1, cout_p).astype(jnp.float32)

    # --- VMEM budgeting: batch-tile size and an explicit vmem limit ----------------
    in_img = H * W * Cin * 2                              # bf16 input block / image
    out_img = Ho * Wo * ct * 2                            # bf16 output block / image
    pad_img = Hp * Wp * Cin * 2                           # padded scratch / image
    mid_img = Ho * Wo * (kkcin * 2 + ct * 8)              # patch (bf16) + f32 acc/epilogue
    per_img = 2 * in_img + 2 * out_img + pad_img + mid_img    # double-buffered I/O
    budget = 6 << 20
    b_tile = 1
    for d in range(1, N + 1):
        if N % d == 0 and d * per_img <= budget:
            b_tile = d
    # TODO(synk): if a single image exceeds the budget (large feature maps, esp. v7x's
    # 64 MiB VMEM), H-halo tiling (output-row blocks with (k-1)*dilation overlap) is
    # required instead of whole-image blocks.

    w_bytes = 2 * kkcin * ct * 2 + 2 * 2 * ct * 4         # weight + scale/bias (dbl-buf)
    vmem_needed = b_tile * per_img + w_bytes
    vmem_limit = int(min(max(2 * vmem_needed, 16 << 20), 48 << 20))

    kernel = functools.partial(_conv_bn_lrelu_kernel, ksize=ksize, stride=stride,
                               dilation=dilation, padding=padding, out_h=Ho, out_w=Wo)

    out = pl.pallas_call(
        kernel,
        out_shape=jax.ShapeDtypeStruct((N, Ho, Wo, cout_p), jnp.bfloat16),
        grid=(N // b_tile, cout_p // ct),
        in_specs=[
            pl.BlockSpec((b_tile, H, W, Cin), lambda n, co: (n, 0, 0, 0)),
            pl.BlockSpec((kkcin, ct), lambda n, co: (0, co)),
            pl.BlockSpec((1, ct), lambda n, co: (0, co)),
            pl.BlockSpec((1, ct), lambda n, co: (0, co)),
        ],
        out_specs=pl.BlockSpec((b_tile, Ho, Wo, ct), lambda n, co: (n, 0, 0, co)),
        scratch_shapes=[pltpu.VMEM((b_tile, Hp, Wp, Cin), jnp.bfloat16)],
        compiler_params=pltpu.CompilerParams(
            dimension_semantics=("parallel", "parallel"),
            vmem_limit_bytes=vmem_limit),
    )(x_nhwc, w, scale_p, bias_p)

    y = out[..., :Cout] if cout_p != Cout else out
    # NHWC -> NCHW + f32 cast at the API boundary (single fused pass).
    return jnp.transpose(y, (0, 3, 1, 2)).astype(jnp.float32)


def _reference(x, weight, conv_bias, gamma, beta, run_mean, run_var,
               *, ksize, stride, padding, dilation, eps=1e-5):
    z = lax.conv_general_dilated(
        x, weight,
        window_strides=(stride, stride),
        padding=[(padding, padding), (padding, padding)],
        rhs_dilation=(dilation, dilation),
        dimension_numbers=("NCHW", "OIHW", "NCHW"),
    ) + conv_bias[None, :, None, None]
    z = (z - run_mean[None, :, None, None]) / jnp.sqrt(run_var[None, :, None, None] + eps)
    z = z * gamma[None, :, None, None] + beta[None, :, None, None]
    return jnp.where(z >= 0, z, NEG_SLOPE * z)


if __name__ == "__main__":
    # Module config: Conv_BN_LeakyReLU2(in_channels=4, out_channels=8, ksize=3, padding=1)
    N, Cin, H, W = 2, 4, 16, 16
    Cout, ksize, padding, stride, dilation = 8, 3, 1, 1, 1

    key = jax.random.PRNGKey(0)
    kx, kw, kb, kg, kbe, km, kv = jax.random.split(key, 7)

    x = jax.random.normal(kx, (N, Cin, H, W), jnp.float32)
    weight = jax.random.normal(kw, (Cout, Cin, ksize, ksize), jnp.float32) * 0.1
    conv_bias = jax.random.normal(kb, (Cout,), jnp.float32) * 0.1
    gamma = 1.0 + 0.1 * jax.random.normal(kg, (Cout,), jnp.float32)
    beta = 0.1 * jax.random.normal(kbe, (Cout,), jnp.float32)
    run_mean = 0.1 * jax.random.normal(km, (Cout,), jnp.float32)
    run_var = jnp.abs(1.0 + 0.1 * jax.random.normal(kv, (Cout,), jnp.float32))

    y = conv_bn_leakyrelu2(x, weight, conv_bias, gamma, beta, run_mean, run_var,
                           ksize=ksize, stride=stride, padding=padding, dilation=dilation)
    y = jax.block_until_ready(y)

    y_ref = _reference(x, weight, conv_bias, gamma, beta, run_mean, run_var,
                       ksize=ksize, stride=stride, padding=padding, dilation=dilation)
    assert y.shape == (N, Cout, H, W), y.shape
    # Tolerance loosened vs. the f32 reference: bf16 operands on the MXU (f32 accumulation)
    # and a bf16 kernel output.
    assert jnp.allclose(y, y_ref, atol=5e-2, rtol=5e-2), float(jnp.max(jnp.abs(y - y_ref)))

    print("KERNEL_OK")
</pallas_src>

<mosaic_0001>
module attributes {stable_mosaic.version = 11 : i64} {
  func.func @_conv_bn_lrelu_kernel(%arg0: i32, %arg1: i32, %arg2: memref<2x16x16x4xbf16, #tpu.memory_space<vmem>>, %arg3: memref<36x8xbf16, #tpu.memory_space<vmem>>, %arg4: memref<1x8xf32, #tpu.memory_space<vmem>>, %arg5: memref<1x8xf32, #tpu.memory_space<vmem>>, %arg6: memref<2x16x16x8xbf16, #tpu.memory_space<vmem>>, %arg7: memref<2x18x18x4xbf16, #tpu.memory_space<vmem>>) attributes {dimension_semantics = [#tpu.dimension_semantics<parallel>, #tpu.dimension_semantics<parallel>], iteration_bounds = array<i64: 1, 1>, scalar_prefetch = 0 : i64, scratch_operands = 1 : i64, tpu.core_type = #tpu.core_type<tc>, window_params = [{transform_indices = @transform_0, window_bounds = array<i64: 2, 16, 16, 4>}, {transform_indices = @transform_1, window_bounds = array<i64: 36, 8>}, {transform_indices = @transform_2, window_bounds = array<i64: 1, 8>}, {transform_indices = @transform_3, window_bounds = array<i64: 1, 8>}, {transform_indices = @transform_4, window_bounds = array<i64: 2, 16, 16, 8>}]} {
    %cst = arith.constant 0.000000e+00 : bf16
    %0 = vector.broadcast %cst : bf16 to vector<2x18x18x4xbf16>
    %c0 = arith.constant 0 : index
    %c0_0 = arith.constant 0 : index
    %c0_1 = arith.constant 0 : index
    %c0_2 = arith.constant 0 : index
    %1 = vector.load %arg7[%c0, %c0_0, %c0_1, %c0_2] : memref<2x18x18x4xbf16, #tpu.memory_space<vmem>>, vector<2x18x18x4xbf16>
    tpu.vector_store %arg7[%c0, %c0_0, %c0_1, %c0_2], %0 {strides = array<i32>} : memref<2x18x18x4xbf16, #tpu.memory_space<vmem>>, vector<2x18x18x4xbf16>,
    %c0_3 = arith.constant 0 : index
    %c0_4 = arith.constant 0 : index
    %c0_5 = arith.constant 0 : index
    %c0_6 = arith.constant 0 : index
    %2 = vector.load %arg2[%c0_3, %c0_4, %c0_5, %c0_6] : memref<2x16x16x4xbf16, #tpu.memory_space<vmem>>, vector<2x16x16x4xbf16>
    %c0_7 = arith.constant 0 : index
    %c1 = arith.constant 1 : index
    %c1_8 = arith.constant 1 : index
    %c0_9 = arith.constant 0 : index
    %3 = vector.load %arg7[%c0_7, %c1, %c1_8, %c0_9] : memref<2x18x18x4xbf16, #tpu.memory_space<vmem>>, vector<2x16x16x4xbf16>
    tpu.vector_store %arg7[%c0_7, %c1, %c1_8, %c0_9], %2 {strides = array<i32>} : memref<2x18x18x4xbf16, #tpu.memory_space<vmem>>, vector<2x16x16x4xbf16>,
    %c0_10 = arith.constant 0 : index
    %c0_11 = arith.constant 0 : index
    %c0_12 = arith.constant 0 : index
    %c0_13 = arith.constant 0 : index
    %4 = vector.load %arg7[%c0_10, %c0_11, %c0_12, %c0_13] : memref<2x18x18x4xbf16, #tpu.memory_space<vmem>>, vector<2x16x16x4xbf16>
    %c0_14 = arith.constant 0 : index
    %c0_15 = arith.constant 0 : index
    %c1_16 = arith.constant 1 : index
    %c0_17 = arith.constant 0 : index
    %5 = vector.load %arg7[%c0_14, %c0_15, %c1_16, %c0_17] : memref<2x18x18x4xbf16, #tpu.memory_space<vmem>>, vector<2x16x16x4xbf16>
    %c0_18 = arith.constant 0 : index
    %c0_19 = arith.constant 0 : index
    %c2 = arith.constant 2 : index
    %c0_20 = arith.constant 0 : index
    %6 = vector.load %arg7[%c0_18, %c0_19, %c2, %c0_20] : memref<2x18x18x4xbf16, #tpu.memory_space<vmem>>, vector<2x16x16x4xbf16>
    %c0_21 = arith.constant 0 : index
    %c1_22 = arith.constant 1 : index
    %c0_23 = arith.constant 0 : index
    %c0_24 = arith.constant 0 : index
    %7 = vector.load %arg7[%c0_21, %c1_22, %c0_23, %c0_24] : memref<2x18x18x4xbf16, #tpu.memory_space<vmem>>, vector<2x16x16x4xbf16>
    %c0_25 = arith.constant 0 : index
    %c1_26 = arith.constant 1 : index
    %c1_27 = arith.constant 1 : index
    %c0_28 = arith.constant 0 : index
    %8 = vector.load %arg7[%c0_25, %c1_26, %c1_27, %c0_28] : memref<2x18x18x4xbf16, #tpu.memory_space<vmem>>, vector<2x16x16x4xbf16>
    %c0_29 = arith.constant 0 : index
    %c1_30 = arith.constant 1 : index
    %c2_31 = arith.constant 2 : index
    %c0_32 = arith.constant 0 : index
    %9 = vector.load %arg7[%c0_29, %c1_30, %c2_31, %c0_32] : memref<2x18x18x4xbf16, #tpu.memory_space<vmem>>, vector<2x16x16x4xbf16>
    %c0_33 = arith.constant 0 : index
    %c2_34 = arith.constant 2 : index
    %c0_35 = arith.constant 0 : index
    %c0_36 = arith.constant 0 : index
    %10 = vector.load %arg7[%c0_33, %c2_34, %c0_35, %c0_36] : memref<2x18x18x4xbf16, #tpu.memory_space<vmem>>, vector<2x16x16x4xbf16>
    %c0_37 = arith.constant 0 : index
    %c2_38 = arith.constant 2 : index
    %c1_39 = arith.constant 1 : index
    %c0_40 = arith.constant 0 : index
    %11 = vector.load %arg7[%c0_37, %c2_38, %c1_39, %c0_40] : memref<2x18x18x4xbf16, #tpu.memory_space<vmem>>, vector<2x16x16x4xbf16>
    %c0_41 = arith.constant 0 : index
    %c2_42 = arith.constant 2 : index
    %c2_43 = arith.constant 2 : index
    %c0_44 = arith.constant 0 : index
    %12 = vector.load %arg7[%c0_41, %c2_42, %c2_43, %c0_44] : memref<2x18x18x4xbf16, #tpu.memory_space<vmem>>, vector<2x16x16x4xbf16>
    %13 = tpu.concatenate %4, %5, %6, %7, %8, %9, %10, %11, %12 in 3 : vector<2x16x16x4xbf16>, vector<2x16x16x4xbf16>, vector<2x16x16x4xbf16>, vector<2x16x16x4xbf16>, vector<2x16x16x4xbf16>, vector<2x16x16x4xbf16>, vector<2x16x16x4xbf16>, vector<2x16x16x4xbf16>, vector<2x16x16x4xbf16> -> vector<2x16x16x36xbf16>
    %14 = vector.shape_cast %13 : vector<2x16x16x36xbf16> to vector<512x36xbf16>
    %c0_45 = arith.constant 0 : index
    %c0_46 = arith.constant 0 : index
    %15 = vector.load %arg3[%c0_45, %c0_46] : memref<36x8xbf16, #tpu.memory_space<vmem>>, vector<36x8xbf16>
    %cst_47 = arith.constant dense<0.000000e+00> : vector<512x8xf32>
    %16 = tpu.matmul %14, %15, %cst_47 {dimension_numbers = #tpu.dot_dimension_numbers<[1], [0], [0], [1], [0, 0, 1, 1], [], []>} : vector<512x36xbf16>, vector<36x8xbf16>, vector<512x8xf32> -> vector<512x8xf32>
    %c0_48 = arith.constant 0 : index
    %c0_49 = arith.constant 0 : index
    %17 = vector.load %arg4[%c0_48, %c0_49] : memref<1x8xf32, #tpu.memory_space<vmem>>, vector<1x8xf32>
    %18 = vector.broadcast %17 : vector<1x8xf32> to vector<512x8xf32>
    %19 = arith.mulf %16, %18 : vector<512x8xf32>
    %c0_50 = arith.constant 0 : index
    %c0_51 = arith.constant 0 : index
    %20 = vector.load %arg5[%c0_50, %c0_51] : memref<1x8xf32, #tpu.memory_space<vmem>>, vector<1x8xf32>
    %21 = vector.broadcast %20 : vector<1x8xf32> to vector<512x8xf32>
    %22 = arith.addf %19, %21 : vector<512x8xf32>
    %cst_52 = arith.constant 1.000000e-01 : f32
    %23 = vector.broadcast %cst_52 : f32 to vector<512x8xf32>
    %24 = arith.mulf %23, %22 : vector<512x8xf32>
    %25 = arith.maximumf %22, %24 : vector<512x8xf32>
    %26 = vector.shape_cast %25 : vector<512x8xf32> to vector<2x16x16x8xf32>
    %27 = arith.truncf %26 : vector<2x16x16x8xf32> to vector<2x16x16x8xbf16>
    %c0_53 = arith.constant 0 : index
    %c0_54 = arith.constant 0 : index
    %c0_55 = arith.constant 0 : index
    %c0_56 = arith.constant 0 : index
    %28 = vector.load %arg6[%c0_53, %c0_54, %c0_55, %c0_56] : memref<2x16x16x8xbf16, #tpu.memory_space<vmem>>, vector<2x16x16x8xbf16>
    tpu.vector_store %arg6[%c0_53, %c0_54, %c0_55, %c0_56], %27 {strides = array<i32>} : memref<2x16x16x8xbf16, #tpu.memory_space<vmem>>, vector<2x16x16x8xbf16>,
    return
  }
  func.func @transform_0(%arg0: i32, %arg1: i32) -> (i32, i32, i32, i32) {
    %c0_i32 = arith.constant 0 : i32
    %c0_i32_0 = arith.constant 0 : i32
    %c0_i32_1 = arith.constant 0 : i32
    %c0_i32_2 = arith.constant 0 : i32
    return %arg0, %c0_i32, %c0_i32_0, %c0_i32_1 : i32, i32, i32, i32
  }
  func.func @transform_1(%arg0: i32, %arg1: i32) -> (i32, i32) {
    %c0_i32 = arith.constant 0 : i32
    %c0_i32_0 = arith.constant 0 : i32
    return %c0_i32, %arg1 : i32, i32
  }
  func.func @transform_2(%arg0: i32, %arg1: i32) -> (i32, i32) {
    %c0_i32 = arith.constant 0 : i32
    %c0_i32_0 = arith.constant 0 : i32
    return %c0_i32, %arg1 : i32, i32
  }
  func.func @transform_3(%arg0: i32, %arg1: i32) -> (i32, i32) {
    %c0_i32 = arith.constant 0 : i32
    %c0_i32_0 = arith.constant 0 : i32
    return %c0_i32, %arg1 : i32, i32
  }
  func.func @transform_4(%arg0: i32, %arg1: i32) -> (i32, i32, i32, i32) {
    %c0_i32 = arith.constant 0 : i32
    %c0_i32_0 = arith.constant 0 : i32
    %c0_i32_1 = arith.constant 0 : i32
    return %arg0, %c0_i32, %c0_i32_0, %arg1 : i32, i32, i32, i32
  }
}

</mosaic_0001>

<bundles_post_ra>
// kernel: conv_bn_leakyrelu2.1
= control target key start
LH: loop header
LB: loop body
LE: loop exit
PB: predicated region body
PF: predicated region fallthrough
CT: control target
= control target key end

     0   :  { %vm18_vm0 = vcmask 27648   ;;  %vm21_vm1 = vcmask 24576   ;;  %v6839_v0 = vmov 0   ;;  %vm192_vm2 = vsmask.f32 256  ;;  %s6840_s9 = smov 4   ;;  %s10103_s0 = inlined_call_operand.vmem [shape: bf16[2,16,16,4], index: 0, kind: input, shape index: {}]   ;;  %s10104_s1 = inlined_call_operand.vmem [shape: bf16[36,8], index: 1, kind: input, shape index: {}]   ;;  %s10105_s2 = inlined_call_operand.vmem [shape: f32[1,8], index: 2, kind: input, shape index: {}]   ;;  %s10106_s3 = inlined_call_operand.vmem [shape: f32[1,8], index: 3, kind: input, shape index: {}]   ;;  %s10107_s4 = inlined_call_operand.vmem [shape: bf16[2,16,16,8], index: 4, kind: output, shape index: {}]  }
   0x1   :  { %19 = vst.msk [vmem:[#allocation2] sm:$0xf] %vm18_vm0, %v6839_v0  ;;  %20 = vst.msk [vmem:[#allocation2 + $0x4] sm:$0xf] %vm18_vm0, %v6839_v0  ;;  %v130_v1 = vld [vmem:[%s10103_s0 + $0x8] sm:$0xf] }
   0x2   :  { %22 = vst.msk [vmem:[#allocation2 + $0x8] sm:$0x1] %vm21_vm1, %v6839_v0  ;;  %25 = vst.msk [vmem:[#allocation2 + $0x14] sm:$0x1] %vm21_vm1, %v6839_v0  ;;  %v131_v2 = vld [vmem:[%s10103_s0 + $0xc] sm:$0xf] }
   0x3   :  { %23 = vst.msk [vmem:[#allocation2 + $0xc] sm:$0xf] %vm18_vm0, %v6839_v0  ;;  %24 = vst.msk [vmem:[#allocation2 + $0x10] sm:$0xf] %vm18_vm0, %v6839_v0  ;;  %vm193_vm3 = vsmask.f32 4368 }
   0x4   :  { %26 = vst.msk [vmem:[#allocation2 + $0x18] sm:$0xf] %vm18_vm0, %v6839_v0  ;;  %27 = vst.msk [vmem:[#allocation2 + $0x1c] sm:$0xf] %vm18_vm0, %v6839_v0  ;;  %v213_v3 = vshrl.u32 %v130_v1, 16  ;;  %v216_v4 = vshll.u32 %v130_v1, 16 }
   0x5   :  { %28 = vst.msk [vmem:[#allocation2 + $0x20] sm:$0x1] %vm21_vm1, %v6839_v0  ;;  %31 = vst.msk [vmem:[#allocation2 + $0x2c] sm:$0x1] %vm21_vm1, %v6839_v0  ;;  %v221_v5 = vshrl.u32 %v131_v2, 16  ;;  %v224_v6 = vshll.u32 %v131_v2, 16 }
   0x6   :  { %29 = vst.msk [vmem:[#allocation2 + $0x24] sm:$0xf] %vm18_vm0, %v6839_v0  ;;  %30 = vst.msk [vmem:[#allocation2 + $0x28] sm:$0xf] %vm18_vm0, %v6839_v0  ;;  %vm837_vm4 = vsmask.f32 7938 }
   0x7   :  { %32 = vst.msk [vmem:[#allocation2 + $0x30] sm:$0xf] %vm18_vm0, %v6839_v0  ;;  %33 = vst.msk [vmem:[#allocation2 + $0x34] sm:$0xf] %vm18_vm0, %v6839_v0  ;;  %v128_v7 = vld [vmem:[%s10103_s0] sm:$0xf] }
   0x8   :  { %34 = vst.msk [vmem:[#allocation2 + $0x38] sm:$0x1] %vm21_vm1, %v6839_v0  ;;  %37 = vst.msk [vmem:[#allocation2 + $0x44] sm:$0x1] %vm21_vm1, %v6839_v0  ;;  %v215_v8 = vrot.slane %v213_v3, 7  ;;  %v223_v9 = vrot.slane %v221_v5, 7 }
   0x9   :  { %35 = vst.msk [vmem:[#allocation2 + $0x3c] sm:$0xf] %vm18_vm0, %v6839_v0  ;;  %36 = vst.msk [vmem:[#allocation2 + $0x40] sm:$0xf] %vm18_vm0, %v6839_v0  ;;  %v129_v10 = vld [vmem:[%s10103_s0 + $0x4] sm:$0xf] }
   0xa   :  { %38 = vst.msk [vmem:[#allocation2 + $0x48] sm:$0xf] %vm18_vm0, %v6839_v0  ;;  %39 = vst.msk [vmem:[#allocation2 + $0x4c] sm:$0xf] %vm18_vm0, %v6839_v0  ;;  %v196_v11 = vshrl.u32 %v128_v7, 16  ;;  %v199_v13 = vshll.u32 %v128_v7, 16  ;;  %v218_v17 = vor.u32 %v216_v4, %v215_v8  ;;  %v226_v19 = vor.u32 %v224_v6, %v223_v9 }
   0xb   :  { %40 = vst.msk [vmem:[#allocation2 + $0x50] sm:$0x1] %vm21_vm1, %v6839_v0  ;;  %43 = vst.msk [vmem:[#allocation2 + $0x5c] sm:$0x1] %vm21_vm1, %v6839_v0  ;;  %v204_v14 = vshrl.u32 %v129_v10, 16  ;;  %v207_v15 = vshll.u32 %v129_v10, 16 }
   0xc   :  { %41 = vst.msk [vmem:[#allocation2 + $0x54] sm:$0xf] %vm18_vm0, %v6839_v0  ;;  %42 = vst.msk [vmem:[#allocation2 + $0x58] sm:$0xf] %vm18_vm0, %v6839_v0  ;;  %v132_v16 = vld [vmem:[%s10103_s0 + $0x10] sm:$0xf] }
   0xd   :  { %44 = vst.msk [vmem:[#allocation2 + $0x60] sm:$0xf] %vm18_vm0, %v6839_v0  ;;  %45 = vst.msk [vmem:[#allocation2 + $0x64] sm:$0xf] %vm18_vm0, %v6839_v0  ;;  %vm1706_vm6 = vsmask.f32 7424 }
   0xe   :  { %46 = vst.msk [vmem:[#allocation2 + $0x68] sm:$0x1] %vm21_vm1, %v6839_v0  ;;  %49 = vst.msk [vmem:[#allocation2 + $0x74] sm:$0x1] %vm21_vm1, %v6839_v0  ;;  %v219_v18 = vrot.slane %v215_v8, 4  ;;  %v228_v20 = vrot.slane %v223_v9, 4 }
   0xf   :  { %47 = vst.msk [vmem:[#allocation2 + $0x6c] sm:$0xf] %vm18_vm0, %v6839_v0  ;;  %48 = vst.msk [vmem:[#allocation2 + $0x70] sm:$0xf] %vm18_vm0, %v6839_v0  ;;  %v198_v23 = vrot.slane %v196_v11, 7  ;;  %v206_v24 = vrot.slane %v204_v14, 7 }
  0x10   :  { %50 = vst.msk [vmem:[#allocation2 + $0x78] sm:$0xf] %vm18_vm0, %v6839_v0  ;;  %51 = vst.msk [vmem:[#allocation2 + $0x7c] sm:$0xf] %vm18_vm0, %v6839_v0  ;;  %v230_v25 = vshrl.u32 %v132_v16, 16  ;;  %v233_v26 = vshll.u32 %v132_v16, 16 }
  0x11   :  { %52 = vst.msk [vmem:[#allocation2 + $0x80] sm:$0x1] %vm21_vm1, %v6839_v0  ;;  %55 = vst.msk [vmem:[#allocation2 + $0x8c] sm:$0x1] %vm21_vm1, %v6839_v0  ;;  %v1065_v27 = vld [vmem:[#allocation2] sm:$0xf]  ;;  %v201_v34 = vor.u32 %v199_v13, %v198_v23  ;;  %v209_v36 = vor.u32 %v207_v15, %v206_v24 }
  0x12   :  { %53 = vst.msk [vmem:[#allocation2 + $0x84] sm:$0xf] %vm18_vm0, %v6839_v0  ;;  %54 = vst.msk [vmem:[#allocation2 + $0x88] sm:$0xf] %vm18_vm0, %v6839_v0  ;;  %v1066_v28 = vld [vmem:[#allocation2 + $0x4] sm:$0xf] }
  0x13   :  { %56 = vst.msk [vmem:[#allocation2 + $0x90] sm:$0xf] %vm18_vm0, %v6839_v0  ;;  %57 = vst.msk [vmem:[#allocation2 + $0x94] sm:$0xf] %vm18_vm0, %v6839_v0  ;;  %v133_v30 = vld [vmem:[%s10103_s0 + $0x14] sm:$0xf]  ;;  %v7126_v31 = vcombine.low %v1065_v27, %v1066_v28 }
  0x14   :  { %58 = vst.msk [vmem:[#allocation2 + $0x98] sm:$0x1] %vm21_vm1, %v6839_v0  ;;  %61 = vst.msk [vmem:[#allocation2 + $0xa4] sm:$0x1] %vm21_vm1, %v6839_v0  ;;  %v848_v33 = vld [vmem:[#allocation2 + $0x18] sm:$0xf] }
  0x15   :  { %59 = vst.msk [vmem:[#allocation2 + $0x9c] sm:$0xf] %vm18_vm0, %v6839_v0  ;;  %60 = vst.msk [vmem:[#allocation2 + $0xa0] sm:$0xf] %vm18_vm0, %v6839_v0  ;;  %v202_v35 = vrot.slane %v198_v23, 4  ;;  %v211_v40 = vrot.slane %v206_v24, 4 }
  0x16   :  { %62 = vst.msk [vmem:[#allocation2 + $0xa8] sm:$0xf] %vm18_vm0, %v6839_v0  ;;  %63 = vst.msk [vmem:[#allocation2 + $0xac] sm:$0xf] %vm18_vm0, %v6839_v0  ;;  %v134_v37 = vld [vmem:[%s10103_s0 + $0x18] sm:$0xf] }
  0x17   :  { %64 = vst.msk [vmem:[#allocation2 + $0xb0] sm:$0x1] %vm21_vm1, %v6839_v0  ;;  %67 = vst.msk [vmem:[#allocation2 + $0xbc] sm:$0x1] %vm21_vm1, %v6839_v0  ;;  %v852_v39 = vld [vmem:[#allocation2 + $0x20] sm:$0x1] }
  0x18   :  { %65 = vst.msk [vmem:[#allocation2 + $0xb4] sm:$0xf] %vm18_vm0, %v6839_v0  ;;  %66 = vst.msk [vmem:[#allocation2 + $0xb8] sm:$0xf] %vm18_vm0, %v6839_v0  ;;  %v839_v41 = vld [vmem:[#allocation2 + $0xc] sm:$0xf] }
  0x19   :  { %68 = vst.msk [vmem:[#allocation2 + $0xc0] sm:$0xf] %vm18_vm0, %v6839_v0  ;;  %69 = vst.msk [vmem:[#allocation2 + $0xc4] sm:$0xf] %vm18_vm0, %v6839_v0  ;;  %v232_v42 = vrot.slane %v230_v25, 7  ;;  %v1708_v43 = vshrl.u32 %v7126_v31, 16 }
  0x1a   :  { %70 = vst.msk [vmem:[#allocation2 + $0xc8] sm:$0x1] %vm21_vm1, %v6839_v0  ;;  %73 = vst.msk [vmem:[#allocation2 + $0xd4] sm:$0x1] %vm21_vm1, %v6839_v0  ;;  %v1710_v44 = vshll.u32 %v7126_v31, 16  ;;  %v238_v57 = vshrl.u32 %v133_v30, 16 }
  0x1b   :  { %71 = vst.msk [vmem:[#allocation2 + $0xcc] sm:$0xf] %vm18_vm0, %v6839_v0  ;;  %72 = vst.msk [vmem:[#allocation2 + $0xd0] sm:$0xf] %vm18_vm0, %v6839_v0  ;;  %v845_v47 = vld [vmem:[#allocation2 + $0x14] sm:$0x1]  ;;  %v235_v51 = vor.u32 %v233_v26, %v232_v42 }
  0x1c   :  { %74 = vst.msk [vmem:[#allocation2 + $0xd8] sm:$0xf] %vm18_vm0, %v6839_v0  ;;  %75 = vst.msk [vmem:[#allocation2 + $0xdc] sm:$0xf] %vm18_vm0, %v6839_v0  ;;  %v855_v52 = vld [vmem:[#allocation2 + $0x24] sm:$0xf] }
  0x1d   :  { %76 = vst.msk [vmem:[#allocation2 + $0xe0] sm:$0x1] %vm21_vm1, %v6839_v0  ;;  %79 = vst.msk [vmem:[#allocation2 + $0xec] sm:$0x1] %vm21_vm1, %v6839_v0  ;;  %v135_v53 = vld [vmem:[%s10103_s0 + $0x1c] sm:$0xf] }
  0x1e   :  { %77 = vst.msk [vmem:[#allocation2 + $0xe4] sm:$0xf] %vm18_vm0, %v6839_v0  ;;  %78 = vst.msk [vmem:[#allocation2 + $0xe8] sm:$0xf] %vm18_vm0, %v6839_v0  ;;  %v1712_v54 = vrot.slane %v1710_v44, 1  ;;  %v236_v56 = vrot.slane %v232_v42, 4 }
  0x1f   :  { %80 = vst.msk [vmem:[#allocation2 + $0xf0] sm:$0xf] %vm18_vm0, %v6839_v0  ;;  %81 = vst.msk [vmem:[#allocation2 + $0xf4] sm:$0xf] %vm18_vm0, %v6839_v0  ;;  %v136_v58 = vld [vmem:[%s10103_s0 + $0x20] sm:$0xf] }
  0x20   :  { %82 = vst.msk [vmem:[#allocation2 + $0xf8] sm:$0x1] %vm21_vm1, %v6839_v0  ;;  %85 = vst.msk [vmem:[#allocation2 + $0x104] sm:$0x1] %vm21_vm1, %v6839_v0  ;;  %v241_v59 = vshll.u32 %v133_v30, 16  ;;  %v247_v61 = vshrl.u32 %v134_v37, 16 }
  0x21   :  { %83 = vst.msk [vmem:[#allocation2 + $0xfc] sm:$0xf] %vm18_vm0, %v6839_v0  ;;  %84 = vst.msk [vmem:[#allocation2 + $0x100] sm:$0xf] %vm18_vm0, %v6839_v0  ;;  %v250_v62 = vshll.u32 %v134_v37, 16  ;;  %v240_v1 = vrot.slane %v238_v57, 7 }
  0x22   :  { %86 = vst.msk [vmem:[#allocation2 + $0x108] sm:$0xf] %vm18_vm0, %v6839_v0  ;;  %87 = vst.msk [vmem:[#allocation2 + $0x10c] sm:$0xf] %vm18_vm0, %v6839_v0  ;;  %v137_v63 = vld [vmem:[%s10103_s0 + $0x24] sm:$0xf] }
  0x23   :  { %88 = vst.msk [vmem:[#allocation2 + $0x110] sm:$0x1] %vm21_vm1, %v6839_v0  ;;  %91 = vst.msk [vmem:[#allocation2 + $0x11c] sm:$0x1] %vm21_vm1, %v6839_v0  ;;  %v859_v2 = vld [vmem:[#allocation2 + $0x2c] sm:$0x1]  ;;  %v243_v11 = vor.u32 %v241_v59, %v240_v1 }
  0x24   :  { %89 = vst.msk [vmem:[#allocation2 + $0x114] sm:$0xf] %vm18_vm0, %v6839_v0  ;;  %90 = vst.msk [vmem:[#allocation2 + $0x118] sm:$0xf] %vm18_vm0, %v6839_v0  ;;  %v255_v3 = vshrl.u32 %v135_v53, 16  ;;  %v258_v4 = vshll.u32 %v135_v53, 16 }
  0x25   :  { %92 = vst.msk [vmem:[#allocation2 + $0x120] sm:$0xf] %vm18_vm0, %v6839_v0  ;;  %93 = vst.msk [vmem:[#allocation2 + $0x124] sm:$0xf] %vm18_vm0, %v6839_v0  ;;  %v249_v6 = vrot.slane %v247_v61, 7  ;;  %v264_v7 = vshrl.u32 %v136_v58, 16 }
  0x26   :  { %94 = vst.msk [vmem:[#allocation2 + $0x128] sm:$0x1] %vm21_vm1, %v6839_v0  ;;  %97 = vst.msk [vmem:[#allocation2 + $0x134] sm:$0x1] %vm21_vm1, %v6839_v0  ;;  %v267_v8 = vshll.u32 %v136_v58, 16  ;;  %v272_v9 = vshrl.u32 %v137_v63, 16 }
  0x27   :  { %95 = vst.msk [vmem:[#allocation2 + $0x12c] sm:$0xf] %vm18_vm0, %v6839_v0  ;;  %96 = vst.msk [vmem:[#allocation2 + $0x130] sm:$0xf] %vm18_vm0, %v6839_v0  ;;  %v245_v13 = vrot.slane %v240_v1, 4  ;;  %v257_v14 = vrot.slane %v255_v3, 7 }
  0x28   :  { %98 = vst.msk [vmem:[#allocation2 + $0x138] sm:$0xf] %vm18_vm0, %v6839_v0  ;;  %99 = vst.msk [vmem:[#allocation2 + $0x13c] sm:$0xf] %vm18_vm0, %v6839_v0  ;;  %v862_v15 = vld [vmem:[#allocation2 + $0x30] sm:$0xf] }
  0x29   :  { %100 = vst.msk [vmem:[#allocation2 + $0x140] sm:$0x1] %vm21_vm1, %v6839_v0  ;;  %103 = vst.msk [vmem:[#allocation2 + $0x14c] sm:$0x1] %vm21_vm1, %v6839_v0  ;;  %v260_v27 = vor.u32 %v258_v4, %v257_v14  ;;  %v866_v28 = vld [vmem:[#allocation2 + $0x38] sm:$0x1] }
  0x2a   :  { %101 = vst.msk [vmem:[#allocation2 + $0x144] sm:$0xf] %vm18_vm0, %v6839_v0  ;;  %102 = vst.msk [vmem:[#allocation2 + $0x148] sm:$0xf] %vm18_vm0, %v6839_v0  ;;  %v138_v44 = vld [vmem:[%s10103_s0 + $0x28] sm:$0xf] }
  0x2b   :  { %104 = vst.msk [vmem:[#allocation2 + $0x150] sm:$0xf] %vm18_vm0, %v6839_v0  ;;  %105 = vst.msk [vmem:[#allocation2 + $0x154] sm:$0xf] %vm18_vm0, %v6839_v0  ;;  %v281_v59 = vshrl.u32 %v138_v44, 16  ;;  %vm2251_vm9 = vcmask 1046528  }
  0x2c   :  { %106 = vst.msk [vmem:[#allocation2 + $0x158] sm:$0x1] %vm21_vm1, %v6839_v0  ;;  %109 = vst.msk [vmem:[#allocation2 + $0x164] sm:$0x1] %vm21_vm1, %v6839_v0  ;;  %v140_v1 = vld [vmem:[%s10103_s0 + $0x30] sm:$0xf] }
  0x2d   :  { %107 = vst.msk [vmem:[#allocation2 + $0x15c] sm:$0xf] %vm18_vm0, %v6839_v0  ;;  %108 = vst.msk [vmem:[#allocation2 + $0x160] sm:$0xf] %vm18_vm0, %v6839_v0  ;;  %s6841_s10 = smov 8   ;;  %s6842_s14 = smov 12  }
  0x2e   :  { %110 = vst.msk [vmem:[#allocation2 + $0x168] sm:$0xf] %vm18_vm0, %v6839_v0  ;;  %111 = vst.msk [vmem:[#allocation2 + $0x16c] sm:$0xf] %vm18_vm0, %v6839_v0  ;;  %s6843_s15 = smov 16   ;;  %s6844_s16 = smov 20  }
  0x2f   :  { %112 = vst.msk [vmem:[#allocation2 + $0x170] sm:$0x1] %vm21_vm1, %v6839_v0  ;;  %115 = vst.msk [vmem:[#allocation2 + $0x17c] sm:$0x1] %vm21_vm1, %v6839_v0  ;;  %s6845_s19 = smov 24   ;;  %s6846_s24 = smov 28  }
  0x30   :  { %113 = vst.msk [vmem:[#allocation2 + $0x174] sm:$0xf] %vm18_vm0, %v6839_v0  ;;  %114 = vst.msk [vmem:[#allocation2 + $0x178] sm:$0xf] %vm18_vm0, %v6839_v0  ;;  %vm5065_vm10 = vcmask 1041408   ;;  %vm4460_vm11 = vcmask 31744  }
  0x31   :  { %116 = vst.msk [vmem:[#allocation2 + $0x180] sm:$0xf] %vm18_vm0, %v6839_v0  ;;  %117 = vst.msk [vmem:[#allocation2 + $0x184] sm:$0xf] %vm18_vm0, %v6839_v0  ;;  %vm4525_vm12 = vcmask 64512   ;;  %vm4590_vm13 = vcmask 97280  }
  0x32   :  { %118 = vst.msk [vmem:[#allocation2 + $0x188] sm:$0x1] %vm21_vm1, %v6839_v0  ;;  %121 = vst.msk [vmem:[#allocation2 + $0x194] sm:$0x1] %vm21_vm1, %v6839_v0  ;;  %vm4655_vm14 = vcmask 130048   ;;  %vm4720_vm15 = vcmask 162816  }
  0x33   :  { %119 = vst.msk [vmem:[#allocation2 + $0x18c] sm:$0xf] %vm18_vm0, %v6839_v0  ;;  %120 = vst.msk [vmem:[#allocation2 + $0x190] sm:$0xf] %vm18_vm0, %v6839_v0 }
  0x34   :  { %122 = vst.msk [vmem:[#allocation2 + $0x198] sm:$0xf] %vm18_vm0, %v6839_v0  ;;  %123 = vst.msk [vmem:[#allocation2 + $0x19c] sm:$0xf] %vm18_vm0, %v6839_v0 }
  0x35   :  { %124 = vst.msk [vmem:[#allocation2 + $0x1a0] sm:$0x1] %vm21_vm1, %v6839_v0  ;;  %127 = vst.msk [vmem:[#allocation2 + $0x1ac] sm:$0x1] %vm21_vm1, %v6839_v0 }
  0x36   :  { %125 = vst.msk [vmem:[#allocation2 + $0x1a4] sm:$0xf] %vm18_vm0, %v6839_v0  ;;  %126 = vst.msk [vmem:[#allocation2 + $0x1a8] sm:$0xf] %vm18_vm0, %v6839_v0  ;;  %v1713_v0 = vor.u32 %v1712_v54, %v1708_v43  ;;  %v275_v43 = vshll.u32 %v137_v63, 16  ;;  %v284_v63 = vshll.u32 %v138_v44, 16 }
  0x37   :  { %vm7102_vm5 = vmor %vm192_vm2, %vm193_vm3  ;;  %v6529_v32 = vld [vmem:[#allocation2 + $0x8] ss:$0 sps:$4 sm:$0x11]   ;;  %v139_v54 = vld [vmem:[%s10103_s0 + $0x2c] sm:$0xf]  ;;  %vm4915_vm3 = vcmask 261120  }
  0x38   :  { %vm7111_vm7 = vmand %vm21_vm1, %vm192_vm2  ;;  %v227_v29 = vsel %vm7102_vm5, %v219_v18, %v226_v19  ;;  %v1715_v45 = vshll.u32 %v6529_v32, 16  ;;  %v210_v48 = vsel %vm7102_vm5, %v202_v35, %v209_v36  ;;  %v253_v18 = vrot.slane %v249_v6, 4 }
  0x39   :  { %vm7117_vm8 = vmand %vm18_vm0, %vm837_vm4  ;;  %851 = vst.msk [vmem:[#allocation2 + $0x1c] sm:$0xf] %vm18_vm0, %v227_v29  ;;  %v853_v46 = vsel %vm7111_vm7, %v228_v20, %v852_v39  ;;  %v846_v50 = vsel %vm7111_vm7, %v211_v40, %v845_v47  ;;  %v266_v19 = vrot.slane %v264_v7, 7  ;;  %v274_v20 = vrot.slane %v272_v9, 7 }
  0x3a   :  { %v849_v38 = vsel %vm7117_vm8, %v218_v17, %v848_v33  ;;  %854 = vst [vmem:[#allocation2 + $0x20] sm:$0x1] %v853_v46  ;;  %v840_v49 = vsel %vm7117_vm8, %v201_v34, %v839_v41  ;;  %v1717_v55 = vrot.slane %v1715_v45, 1  ;;  %842 = vst.msk [vmem:[#allocation2 + $0x10] sm:$0xf] %vm18_vm0, %v210_v48  ;;  %v856_v60 = vsel %vm7117_vm8, %v235_v51, %v855_v52 }
  0x3b   :  { %850 = vst [vmem:[#allocation2 + $0x18] sm:$0xf] %v849_v38  ;;  %841 = vst [vmem:[#allocation2 + $0xc] sm:$0xf] %v840_v49  ;;  %v252_v17 = vor.u32 %v250_v62, %v249_v6  ;;  %v244_v25 = vsel %vm7102_vm5, %v236_v56, %v243_v11  ;;  %v860_v26 = vsel %vm7111_vm7, %v245_v13, %v859_v2  ;;  %v869_v34 = vld [vmem:[#allocation2 + $0x3c] sm:$0xf] }
  0x3c   :  { %847 = vst [vmem:[#allocation2 + $0x14] sm:$0x1] %v846_v50  ;;  %857 = vst [vmem:[#allocation2 + $0x24] sm:$0xf] %v856_v60  ;;  %v1718_v10 = vsel %vm1706_vm6, %v1713_v0, %v1717_v55  ;;  %v269_v33 = vor.u32 %v267_v8, %v266_v19  ;;  %v261_v40 = vsel %vm7102_vm5, %v253_v18, %v260_v27  ;;  %v262_v41 = vrot.slane %v257_v14, 4 }
  0x3d   :  { %2091 = vrot.lane.b32.xlu0 %v1718_v10, %s6840_s9  ;;  %858 = vst.msk [vmem:[#allocation2 + $0x28] sm:$0xf] %vm18_vm0, %v244_v25  ;;  %861 = vst [vmem:[#allocation2 + $0x2c] sm:$0x1] %v860_v26  ;;  %v863_v32 = vsel %vm7117_vm8, %v252_v17, %v862_v15  ;;  %v270_v42 = vrot.slane %v266_v19, 4  ;;  %v277_v52 = vor.u32 %v275_v43, %v274_v20  ;;  %v279_v53 = vrot.slane %v274_v20, 4 }
  0x3e   :  { %864 = vst [vmem:[#allocation2 + $0x30] sm:$0xf] %v863_v32  ;;  %865 = vst.msk [vmem:[#allocation2 + $0x34] sm:$0xf] %vm18_vm0, %v261_v40  ;;  %v873_v49 = vld [vmem:[#allocation2 + $0x44] sm:$0x1]  ;;  %v867_v51 = vsel %vm7111_vm7, %v262_v41, %v866_v28  ;;  %v870_v58 = vsel %vm7117_vm8, %v269_v33, %v869_v34 }
  0x3f   :  { %868 = vst [vmem:[#allocation2 + $0x38] sm:$0x1] %v867_v51  ;;  %v278_v61 = vsel %vm7102_vm5, %v270_v42, %v277_v52  ;;  %871 = vst [vmem:[#allocation2 + $0x3c] sm:$0xf] %v870_v58  ;;  %v874_v62 = vsel %vm7111_vm7, %v279_v53, %v873_v49  ;;  %v876_v0 = vld [vmem:[#allocation2 + $0x48] sm:$0xf] }
  0x40   :  { %v1070_v5 = vld [vmem:[#allocation2 + $0x1c] sm:$0xf]  ;;  %872 = vst.msk [vmem:[#allocation2 + $0x40] sm:$0xf] %vm18_vm0, %v278_v61  ;;  %875 = vst [vmem:[#allocation2 + $0x44] sm:$0x1] %v874_v62 }
  0x41   :  { %v6531_v24 = vld [vmem:[#allocation2 + $0x20] ss:$0 sps:$4 sm:$0x11]   ;;  %v1068_v30 = vld [vmem:[#allocation2 + $0x10] sm:$0xf]  ;;  %v289_v6 = vshrl.u32 %v139_v54, 16 }
  0x42   :  { %v1069_v16 = vld [vmem:[#allocation2 + $0x18] sm:$0xf]  ;;  %v1067_v29 = vld [vmem:[#allocation2 + $0xc] sm:$0xf]  ;;  %v1739_v37 = vshll.u32 %v6531_v24, 16  ;;  %v292_v10 = vshll.u32 %v139_v54, 16 }
  0x43   :  { %v7158_v23 = vcombine.low %v1069_v16, %v1070_v5  ;;  %v7169_v38 = vcombine.low %v1067_v29, %v1068_v30  ;;  %v6533_v39 = vld [vmem:[#allocation2 + $0x14] ss:$0 sps:$4 sm:$0x11]   ;;  %v1071_v57 = vld [vmem:[#allocation2 + $0x24] sm:$0xf]  ;;  %v283_v5 = vrot.slane %v281_v59, 7 }
  0x44   :  { %v1741_v46 = vrot.slane %v1739_v37, 1  ;;  %v1727_v50 = vshll.u32 %v6533_v39, 16  ;;  %v1072_v4 = vld [vmem:[#allocation2 + $0x28] sm:$0xf]  ;;  %v291_v15 = vrot.slane %v289_v6, 7  ;;  %v298_v24 = vshrl.u32 %v140_v1, 16 }
  0x45   :  { %10154 = vst [vmem:[#allocation3_spill] sm:$0xff] %v7158_v23  ;;  %v1732_v35 = vshrl.u32 %v7158_v23, 16  ;;  %v1734_v36 = vshll.u32 %v7158_v23, 16  ;;  %v1720_v47 = vshrl.u32 %v7169_v38, 16  ;;  %v1722_v48 = vshll.u32 %v7169_v38, 16 }
  0x46   :  { %v1729_v60 = vrot.slane %v1727_v50, 1  ;;  %v7196_v7 = vcombine.low %v1071_v57, %v1072_v4  ;;  %v6535_v8 = vld [vmem:[#allocation2 + $0x2c] ss:$0 sps:$4 sm:$0x11]   ;;  %v1073_v9 = vld [vmem:[#allocation2 + $0x30] sm:$0xf]  ;;  %v286_v13 = vor.u32 %v284_v63, %v283_v5  ;;  %v294_v26 = vor.u32 %v292_v10, %v291_v15 }
  0x47   :  { %v1736_v45 = vrot.slane %v1734_v36, 1  ;;  %v1724_v56 = vrot.slane %v1722_v48, 1  ;;  %v287_v14 = vrot.slane %v283_v5, 4  ;;  %v880_v16 = vld [vmem:[#allocation2 + $0x50] sm:$0x1]  ;;  %v1751_v19 = vshll.u32 %v6535_v8, 16 }
  0x48   :  { %10155 = vst [vmem:[#allocation4_spill] sm:$0xff] %v7196_v7  ;;  %v1744_v17 = vshrl.u32 %v7196_v7, 16  ;;  %v1746_v18 = vshll.u32 %v7196_v7, 16  ;;  %v1074_v20 = vld [vmem:[#allocation2 + $0x34] sm:$0xf]  ;;  %v296_v27 = vrot.slane %v291_v15, 4  ;;  %v877_v28 = vsel %vm7117_vm8, %v286_v13, %v876_v0 }
  0x49   :  { %v1737_v55 = vor.u32 %v1736_v45, %v1732_v35  ;;  %v1725_v3 = vor.u32 %v1724_v56, %v1720_v47  ;;  %v7202_v25 = vcombine.low %v1073_v9, %v1074_v20  ;;  %v141_v29 = vld [vmem:[%s10103_s0 + $0x34] sm:$0xf]  ;;  %v1753_v33 = vrot.slane %v1751_v19, 1  ;;  %878 = vst [vmem:[#allocation2 + $0x48] sm:$0xf] %v877_v28 }
  0x4a   :  { %v883_v30 = vld [vmem:[#allocation2 + $0x54] sm:$0xf]  ;;  %v1748_v32 = vrot.slane %v1746_v18, 1  ;;  %v300_v34 = vrot.slane %v298_v24, 7  ;;  %v301_v35 = vshll.u32 %v140_v1, 16  ;;  %v295_v40 = vsel %vm7102_vm5, %v287_v14, %v294_v26 }
  0x4b   :  { %v1742_v2 = vsel %vm1706_vm6, %v1737_v55, %v1741_v46  ;;  %v1730_v11 = vsel %vm1706_vm6, %v1725_v3, %v1729_v60  ;;  %10156 = vst [vmem:[#allocation5_spill] sm:$0xff] %v7202_v25  ;;  %v6537_v36 = vld [vmem:[#allocation2 + $0x38] ss:$0 sps:$4 sm:$0x11]   ;;  %v1756_v37 = vshrl.u32 %v7202_v25, 16  ;;  %v1758_v39 = vshll.u32 %v7202_v25, 16 }
  0x4c   :  { %2095 = vrot.lane.b32.xlu1 %v1742_v2, %s6840_s9  ;;  %2093 = vrot.lane.b32.xlu0 %v1730_v11, %s6840_s9  ;;  %v881_v41 = vsel %vm7111_vm7, %v296_v27, %v880_v16  ;;  %v142_v42 = vld [vmem:[%s10103_s0 + $0x38] sm:$0xf]  ;;  %v1749_v43 = vor.u32 %v1748_v32, %v1744_v17  ;;  %v1075_v44 = vld [vmem:[#allocation2 + $0x3c] sm:$0xf]  ;;  %v1076_v45 = vld [vmem:[#allocation2 + $0x40] sm:$0xf]  ;;  %v303_v46 = vor.u32 %v301_v35, %v300_v34 }
  0x4d   :  { %879 = vst.msk [vmem:[#allocation2 + $0x4c] sm:$0xf] %vm18_vm0, %v295_v40  ;;  %882 = vst [vmem:[#allocation2 + $0x50] sm:$0x1] %v881_v41  ;;  %v1760_v47 = vrot.slane %v1758_v39, 1  ;;  %v1763_v48 = vshll.u32 %v6537_v36, 16  ;;  %v7219_v49 = vcombine.low %v1075_v44, %v1076_v45 }
  0x4e   :  { %v6539_v50 = vld [vmem:[#allocation2 + $0x44] ss:$0 sps:$4 sm:$0x11]   ;;  %v304_v51 = vrot.slane %v300_v34, 4  ;;  %v1754_v52 = vsel %vm1706_vm6, %v1749_v43, %v1753_v33  ;;  %v306_v53 = vshrl.u32 %v141_v29, 16  ;;  %v309_v54 = vshll.u32 %v141_v29, 16 }
  0x4f   :  { %10157 = vst [vmem:[#allocation6_spill] sm:$0xff] %v7219_v49  ;;  %v884_v55 = vsel %vm7117_vm8, %v303_v46, %v883_v30  ;;  %v143_v56 = vld [vmem:[%s10103_s0 + $0x3c] sm:$0xf]  ;;  %v1761_v57 = vor.u32 %v1760_v47, %v1756_v37  ;;  %v1765_v58 = vrot.slane %v1763_v48, 1  ;;  %v1768_v59 = vshrl.u32 %v7219_v49, 16 }
  0x50   :  { %2097 = vrot.lane.b32.xlu1 %v1754_v52, %s6840_s9  ;;  %v1770_v60 = vshll.u32 %v7219_v49, 16  ;;  %885 = vst [vmem:[#allocation2 + $0x54] sm:$0xf] %v884_v55  ;;  %v887_v61 = vld [vmem:[#allocation2 + $0x5c] sm:$0x1]  ;;  %v1775_v62 = vshll.u32 %v6539_v50, 16 }
  0x51   :  { %v308_v63 = vrot.slane %v306_v53, 7  ;;  %v315_v0 = vshrl.u32 %v142_v42, 16  ;;  %v318_v1 = vshll.u32 %v142_v42, 16  ;;  %v144_v2 = vld [vmem:[%s10103_s0 + $0x40] sm:$0xf]  ;;  %v1766_v3 = vsel %vm1706_vm6, %v1761_v57, %v1765_v58 }
  0x52   :  { %v1772_v4 = vrot.slane %v1770_v60, 1  ;;  %v1077_v5 = vld [vmem:[#allocation2 + $0x48] sm:$0xf]  ;;  %v323_v6 = vshrl.u32 %v143_v56, 16  ;;  %v326_v8 = vshll.u32 %v143_v56, 16  ;;  %2099 = vrot.lane.b32.xlu0 %v1766_v3, %s6840_s9  ;;  %v1777_v9 = vrot.slane %v1775_v62, 1 }
  0x53   :  { %v311_v10 = vor.u32 %v309_v54, %v308_v63  ;;  %v313_v11 = vrot.slane %v308_v63, 4  ;;  %v317_v13 = vrot.slane %v315_v0, 7  ;;  %v890_v14 = vld [vmem:[#allocation2 + $0x60] sm:$0xf]  ;;  %v332_v18 = vshrl.u32 %v144_v2, 16 }
  0x54   :  { %v1773_v15 = vor.u32 %v1772_v4, %v1768_v59  ;;  %v1078_v16 = vld [vmem:[#allocation2 + $0x4c] sm:$0xf]  ;;  %v325_v17 = vrot.slane %v323_v6, 7  ;;  %v6541_v20 = vld [vmem:[#allocation2 + $0x50] ss:$0 sps:$4 sm:$0x11]  }
  0x55   :  { %v7235_v19 = vcombine.low %v1077_v5, %v1078_v16  ;;  %v312_v24 = vsel %vm7102_vm5, %v304_v51, %v311_v10  ;;  %v888_v26 = vsel %vm7111_vm7, %v313_v11, %v887_v61  ;;  %v320_v27 = vor.u32 %v318_v1, %v317_v13  ;;  %v894_v28 = vld [vmem:[#allocation2 + $0x68] sm:$0x1]  ;;  %v145_v34 = vld [vmem:[%s10103_s0 + $0x44] sm:$0xf]  ;;  %v897_v45 = vld [vmem:[#allocation2 + $0x6c] sm:$0xf] }
  0x56   :  { %v1778_v29 = vsel %vm1706_vm6, %v1773_v15, %v1777_v9  ;;  %886 = vst.msk [vmem:[#allocation2 + $0x58] sm:$0xf] %vm18_vm0, %v312_v24  ;;  %889 = vst [vmem:[#allocation2 + $0x5c] sm:$0x1] %v888_v26  ;;  %v321_v30 = vrot.slane %v317_v13, 4  ;;  %v328_v32 = vor.u32 %v326_v8, %v325_v17  ;;  %v330_v33 = vrot.slane %v325_v17, 4 }
  0x57   :  { %10158 = vst [vmem:[#allocation7_spill] sm:$0xff] %v7235_v19  ;;  %2101 = vrot.lane.b32.xlu1 %v1778_v29, %s6840_s9  ;;  %v1780_v35 = vshrl.u32 %v7235_v19, 16  ;;  %v1782_v36 = vshll.u32 %v7235_v19, 16  ;;  %v1787_v37 = vshll.u32 %v6541_v20, 16  ;;  %v891_v39 = vsel %vm7117_vm8, %v320_v27, %v890_v14  ;;  %v146_v40 = vld [vmem:[%s10103_s0 + $0x48] sm:$0xf] }
  0x58   :  { %v329_v41 = vsel %vm7102_vm5, %v321_v30, %v328_v32  ;;  %892 = vst [vmem:[#allocation2 + $0x60] sm:$0xf] %v891_v39  ;;  %v895_v42 = vsel %vm7111_vm7, %v330_v33, %v894_v28  ;;  %v334_v43 = vrot.slane %v332_v18, 7  ;;  %v335_v44 = vshll.u32 %v144_v2, 16  ;;  %v147_v46 = vld [vmem:[%s10103_s0 + $0x4c] sm:$0xf] }
  0x59   :  { %v1784_v47 = vrot.slane %v1782_v36, 1  ;;  %v1789_v48 = vrot.slane %v1787_v37, 1  ;;  %893 = vst.msk [vmem:[#allocation2 + $0x64] sm:$0xf] %vm18_vm0, %v329_v41  ;;  %896 = vst [vmem:[#allocation2 + $0x68] sm:$0x1] %v895_v42 }
  0x5a   :  { %v340_v50 = vshrl.u32 %v145_v34, 16  ;;  %v343_v51 = vshll.u32 %v145_v34, 16  ;;  %v148_v52 = vld [vmem:[%s10103_s0 + $0x50] sm:$0xf]  ;;  %v337_v53 = vor.u32 %v335_v44, %v334_v43  ;;  %v338_v54 = vrot.slane %v334_v43, 4 }
  0x5b   :  { %v901_v55 = vld [vmem:[#allocation2 + $0x74] sm:$0x1]  ;;  %v349_v56 = vshrl.u32 %v146_v40, 16  ;;  %v352_v57 = vshll.u32 %v146_v40, 16  ;;  %v1785_v58 = vor.u32 %v1784_v47, %v1780_v35  ;;  %v357_v61 = vshrl.u32 %v147_v46, 16 }
  0x5c   :  { %v1079_v59 = vld [vmem:[#allocation2 + $0x54] sm:$0xf]  ;;  %v342_v60 = vrot.slane %v340_v50, 7  ;;  %v360_v62 = vshll.u32 %v147_v46, 16  ;;  %v904_v63 = vld [vmem:[#allocation2 + $0x78] sm:$0xf]  ;;  %v898_v0 = vsel %vm7117_vm8, %v337_v53, %v897_v45 }
  0x5d   :  { %v351_v1 = vrot.slane %v349_v56, 7  ;;  %v908_v2 = vld [vmem:[#allocation2 + $0x80] sm:$0x1]  ;;  %v366_v3 = vshrl.u32 %v148_v52, 16  ;;  %v369_v4 = vshll.u32 %v148_v52, 16  ;;  %v1790_v5 = vsel %vm1706_vm6, %v1785_v58, %v1789_v48 }
  0x5e   :  { %v1080_v6 = vld [vmem:[#allocation2 + $0x58] sm:$0xf]  ;;  %v345_v8 = vor.u32 %v343_v51, %v342_v60  ;;  %v347_v9 = vrot.slane %v342_v60, 4  ;;  %899 = vst [vmem:[#allocation2 + $0x6c] sm:$0xf] %v898_v0  ;;  %v359_v10 = vrot.slane %v357_v61, 7  ;;  %2103 = vrot.lane.b32.xlu0 %v1790_v5, %s6840_s9 }
  0x5f   :  { %v149_v11 = vld [vmem:[%s10103_s0 + $0x54] sm:$0xf]  ;;  %v7272_v13 = vcombine.low %v1079_v59, %v1080_v6  ;;  %v6543_v14 = vld [vmem:[#allocation2 + $0x5c] ss:$0 sps:$4 sm:$0x11]   ;;  %v354_v15 = vor.u32 %v352_v57, %v351_v1  ;;  %v355_v16 = vrot.slane %v351_v1, 4 }
  0x60   :  { %v368_v17 = vrot.slane %v366_v3, 7  ;;  %v1081_v18 = vld [vmem:[#allocation2 + $0x60] sm:$0xf]  ;;  %v346_v20 = vsel %vm7102_vm5, %v338_v54, %v345_v8  ;;  %v902_v24 = vsel %vm7111_vm7, %v347_v9, %v901_v55  ;;  %v362_v26 = vor.u32 %v360_v62, %v359_v10  ;;  %v911_v28 = vld [vmem:[#allocation2 + $0x84] sm:$0xf] }
  0x61   :  { %10159 = vst [vmem:[#allocation8_spill] sm:$0xff] %v7272_v13  ;;  %v364_v27 = vrot.slane %v359_v10, 4  ;;  %v150_v29 = vld [vmem:[%s10103_s0 + $0x58] sm:$0xf]  ;;  %v1792_v30 = vshrl.u32 %v7272_v13, 16  ;;  %v1794_v32 = vshll.u32 %v7272_v13, 16  ;;  %v905_v35 = vsel %vm7117_vm8, %v354_v15, %v904_v63 }
  0x62   :  { %v1799_v33 = vshll.u32 %v6543_v14, 16  ;;  %v1082_v34 = vld [vmem:[#allocation2 + $0x64] sm:$0xf]  ;;  %900 = vst.msk [vmem:[#allocation2 + $0x70] sm:$0xf] %vm18_vm0, %v346_v20  ;;  %v363_v39 = vsel %vm7102_vm5, %v355_v16, %v362_v26  ;;  %v371_v41 = vor.u32 %v369_v4, %v368_v17  ;;  %v372_v44 = vrot.slane %v368_v17, 4 }
  0x63   :  { %903 = vst [vmem:[#allocation2 + $0x74] sm:$0x1] %v902_v24  ;;  %v7286_v36 = vcombine.low %v1081_v18, %v1082_v34  ;;  %v6545_v37 = vld [vmem:[#allocation2 + $0x68] ss:$0 sps:$4 sm:$0x11]   ;;  %v909_v40 = vsel %vm7111_vm7, %v364_v27, %v908_v2  ;;  %v1796_v42 = vrot.slane %v1794_v32, 1 }
  0x64   :  { %906 = vst [vmem:[#allocation2 + $0x78] sm:$0xf] %v905_v35  ;;  %v1801_v43 = vrot.slane %v1799_v33, 1  ;;  %907 = vst.msk [vmem:[#allocation2 + $0x7c] sm:$0xf] %vm18_vm0, %v363_v39  ;;  %v374_v45 = vshrl.u32 %v149_v11, 16  ;;  %v912_v54 = vsel %vm7117_vm8, %v371_v41, %v911_v28 }
  0x65   :  { %10160 = vst [vmem:[#allocation9_spill] sm:$0xff] %v7286_v36  ;;  %910 = vst [vmem:[#allocation2 + $0x80] sm:$0x1] %v909_v40  ;;  %v151_v46 = vld [vmem:[%s10103_s0 + $0x5c] sm:$0xf]  ;;  %v1804_v47 = vshrl.u32 %v7286_v36, 16  ;;  %v1797_v52 = vor.u32 %v1796_v42, %v1792_v30 }
  0x66   :  { %v1806_v48 = vshll.u32 %v7286_v36, 16  ;;  %v1811_v50 = vshll.u32 %v6545_v37, 16  ;;  %v377_v51 = vshll.u32 %v149_v11, 16  ;;  %v376_v53 = vrot.slane %v374_v45, 7  ;;  %v915_v55 = vld [vmem:[#allocation2 + $0x8c] sm:$0x1] }
  0x67   :  { %v383_v56 = vshrl.u32 %v150_v29, 16  ;;  %v1083_v59 = vld [vmem:[#allocation2 + $0x6c] sm:$0xf]  ;;  %913 = vst [vmem:[#allocation2 + $0x84] sm:$0xf] %v912_v54  ;;  %v386_v60 = vshll.u32 %v150_v29, 16  ;;  %v1802_v62 = vsel %vm1706_vm6, %v1797_v52, %v1801_v43 }
  0x68   :  { %v1808_v57 = vrot.slane %v1806_v48, 1  ;;  %v1813_v58 = vrot.slane %v1811_v50, 1  ;;  %v391_v61 = vshrl.u32 %v151_v46, 16  ;;  %v379_v63 = vor.u32 %v377_v51, %v376_v53  ;;  %v918_v2 = vld [vmem:[#allocation2 + $0x90] sm:$0xf]  ;;  %2105 = vrot.lane.b32.xlu1 %v1802_v62, %s6840_s9 }
  0x69   :  { %v381_v0 = vrot.slane %v376_v53, 4  ;;  %v385_v1 = vrot.slane %v383_v56, 7  ;;  %v922_v3 = vld [vmem:[#allocation2 + $0x98] sm:$0x1]  ;;  %v152_v4 = vld [vmem:[%s10103_s0 + $0x60] sm:$0xf] }
  0x6a   :  { %v1809_v5 = vor.u32 %v1808_v57, %v1804_v47  ;;  %v1084_v6 = vld [vmem:[#allocation2 + $0x70] sm:$0xf]  ;;  %v393_v8 = vrot.slane %v391_v61, 7  ;;  %v394_v9 = vshll.u32 %v151_v46, 16  ;;  %v380_v15 = vsel %vm7102_vm5, %v372_v44, %v379_v63  ;;  %v153_v18 = vld [vmem:[%s10103_s0 + $0x64] sm:$0xf] }
  0x6b   :  { %v7305_v10 = vcombine.low %v1083_v59, %v1084_v6  ;;  %v6547_v11 = vld [vmem:[#allocation2 + $0x74] ss:$0 sps:$4 sm:$0x11]   ;;  %v1085_v14 = vld [vmem:[#allocation2 + $0x78] sm:$0xf]  ;;  %v916_v16 = vsel %vm7111_vm7, %v381_v0, %v915_v55  ;;  %v388_v17 = vor.u32 %v386_v60, %v385_v1  ;;  %v389_v26 = vrot.slane %v385_v1, 4 }
  0x6c   :  { %v1814_v20 = vsel %vm1706_vm6, %v1809_v5, %v1813_v58  ;;  %v1086_v24 = vld [vmem:[#allocation2 + $0x7c] sm:$0xf]  ;;  %914 = vst.msk [vmem:[#allocation2 + $0x88] sm:$0xf] %vm18_vm0, %v380_v15  ;;  %917 = vst [vmem:[#allocation2 + $0x8c] sm:$0x1] %v916_v16  ;;  %v396_v27 = vor.u32 %v394_v9, %v393_v8 }
  0x6d   :  { %10161 = vst [vmem:[#allocation10_spill] sm:$0xff] %v7305_v10  ;;  %v398_v28 = vrot.slane %v393_v8, 4  ;;  %2107 = vrot.lane.b32.xlu0 %v1814_v20, %s6840_s9  ;;  %v1816_v29 = vshrl.u32 %v7305_v10, 16  ;;  %v1818_v30 = vshll.u32 %v7305_v10, 16  ;;  %v1823_v32 = vshll.u32 %v6547_v11, 16 }
  0x6e   :  { %v7319_v33 = vcombine.low %v1085_v14, %v1086_v24  ;;  %v6549_v34 = vld [vmem:[#allocation2 + $0x80] ss:$0 sps:$4 sm:$0x11]   ;;  %v397_v35 = vsel %vm7102_vm5, %v389_v26, %v396_v27  ;;  %v919_v37 = vsel %vm7117_vm8, %v388_v17, %v918_v2  ;;  %v400_v40 = vshrl.u32 %v152_v4, 16  ;;  %v154_v41 = vld [vmem:[%s10103_s0 + $0x68] sm:$0xf] }
  0x6f   :  { %v923_v39 = vsel %vm7111_vm7, %v398_v28, %v922_v3  ;;  %v1820_v42 = vrot.slane %v1818_v30, 1  ;;  %v1825_v43 = vrot.slane %v1823_v32, 1  ;;  %920 = vst [vmem:[#allocation2 + $0x90] sm:$0xf] %v919_v37  ;;  %921 = vst.msk [vmem:[#allocation2 + $0x94] sm:$0xf] %vm18_vm0, %v397_v35 }
  0x70   :  { %10162 = vst [vmem:[#allocation11_spill] sm:$0xff] %v7319_v33  ;;  %v1828_v44 = vshrl.u32 %v7319_v33, 16  ;;  %v1830_v45 = vshll.u32 %v7319_v33, 16  ;;  %924 = vst [vmem:[#allocation2 + $0x98] sm:$0x1] %v923_v39  ;;  %v1835_v46 = vshll.u32 %v6549_v34, 16 }
  0x71   :  { %v402_v47 = vrot.slane %v400_v40, 7  ;;  %v403_v48 = vshll.u32 %v152_v4, 16  ;;  %v408_v50 = vshrl.u32 %v153_v18, 16  ;;  %v925_v51 = vld [vmem:[#allocation2 + $0x9c] sm:$0xf]  ;;  %v1821_v52 = vor.u32 %v1820_v42, %v1816_v29 }
  0x72   :  { %v1832_v53 = vrot.slane %v1830_v45, 1  ;;  %v1087_v54 = vld [vmem:[#allocation2 + $0x84] sm:$0xf]  ;;  %v411_v55 = vshll.u32 %v153_v18, 16  ;;  %v417_v56 = vshrl.u32 %v154_v41, 16  ;;  %v1837_v57 = vrot.slane %v1835_v46, 1 }
  0x73   :  { %v405_v58 = vor.u32 %v403_v48, %v402_v47  ;;  %v406_v59 = vrot.slane %v402_v47, 4  ;;  %v410_v60 = vrot.slane %v408_v50, 7  ;;  %v929_v61 = vld [vmem:[#allocation2 + $0xa4] sm:$0x1]  ;;  %v155_v62 = vld [vmem:[%s10103_s0 + $0x6c] sm:$0xf]  ;;  %v1826_v63 = vsel %vm1706_vm6, %v1821_v52, %v1825_v43 }
  0x74   :  { %v1833_v0 = vor.u32 %v1832_v53, %v1828_v44  ;;  %v1088_v1 = vld [vmem:[#allocation2 + $0x88] sm:$0xf]  ;;  %v419_v2 = vrot.slane %v417_v56, 7  ;;  %v420_v3 = vshll.u32 %v154_v41, 16  ;;  %2109 = vrot.lane.b32.xlu1 %v1826_v63, %s6840_s9  ;;  %v425_v17 = vshrl.u32 %v155_v62, 16 }
  0x75   :  { %v7338_v4 = vcombine.low %v1087_v54, %v1088_v1  ;;  %v6551_v5 = vld [vmem:[#allocation2 + $0x8c] ss:$0 sps:$4 sm:$0x11]   ;;  %v413_v6 = vor.u32 %v411_v55, %v410_v60  ;;  %v415_v8 = vrot.slane %v410_v60, 4  ;;  %v926_v9 = vsel %vm7117_vm8, %v405_v58, %v925_v51  ;;  %v932_v11 = vld [vmem:[#allocation2 + $0xa8] sm:$0xf] }
  0x76   :  { %v1838_v14 = vsel %vm1706_vm6, %v1833_v0, %v1837_v57  ;;  %927 = vst [vmem:[#allocation2 + $0x9c] sm:$0xf] %v926_v9  ;;  %v422_v15 = vor.u32 %v420_v3, %v419_v2  ;;  %v423_v16 = vrot.slane %v419_v2, 4  ;;  %v156_v18 = vld [vmem:[%s10103_s0 + $0x70] sm:$0xf]  ;;  %v1847_v27 = vshll.u32 %v6551_v5, 16 }
  0x77   :  { %10163 = vst [vmem:[#allocation12_spill] sm:$0xff] %v7338_v4  ;;  %v157_v20 = vld [vmem:[%s10103_s0 + $0x74] sm:$0xf]  ;;  %2111 = vrot.lane.b32.xlu0 %v1838_v14, %s6840_s9  ;;  %v1840_v24 = vshrl.u32 %v7338_v4, 16  ;;  %v1842_v26 = vshll.u32 %v7338_v4, 16  ;;  %v414_v29 = vsel %vm7102_vm5, %v406_v59, %v413_v6  ;;  %v930_v34 = vsel %vm7111_vm7, %v415_v8, %v929_v61 }
  0x78   :  { %v1089_v28 = vld [vmem:[#allocation2 + $0x90] sm:$0xf]  ;;  %v1090_v32 = vld [vmem:[#allocation2 + $0x94] sm:$0xf]  ;;  %928 = vst.msk [vmem:[#allocation2 + $0xa0] sm:$0xf] %vm18_vm0, %v414_v29  ;;  %v933_v39 = vsel %vm7117_vm8, %v422_v15, %v932_v11 }
  0x79   :  { %v936_v30 = vld [vmem:[#allocation2 + $0xb0] sm:$0x1]  ;;  %v427_v35 = vrot.slane %v425_v17, 7  ;;  %v428_v37 = vshll.u32 %v155_v62, 16  ;;  %v1844_v40 = vrot.slane %v1842_v26, 1  ;;  %v1849_v41 = vrot.slane %v1847_v27, 1 }
  0x7a   :  { %v7359_v42 = vcombine.low %v1089_v28, %v1090_v32  ;;  %v6553_v43 = vld [vmem:[#allocation2 + $0x98] ss:$0 sps:$4 sm:$0x11]   ;;  %931 = vst [vmem:[#allocation2 + $0xa4] sm:$0x1] %v930_v34  ;;  %v434_v44 = vshrl.u32 %v156_v18, 16 }
  0x7b   :  { %934 = vst [vmem:[#allocation2 + $0xa8] sm:$0xf] %v933_v39  ;;  %v1097_v45 = vld [vmem:[#allocation2 + $0xd8] sm:$0xf]  ;;  %v430_v46 = vor.u32 %v428_v37, %v427_v35  ;;  %v432_v47 = vrot.slane %v427_v35, 4  ;;  %v437_v48 = vshll.u32 %v156_v18, 16  ;;  %v1845_v52 = vor.u32 %v1844_v40, %v1840_v24 }
  0x7c   :  { %10164 = vst [vmem:[#allocation13_spill] sm:$0xff] %v7359_v42  ;;  %v442_v50 = vshrl.u32 %v157_v20, 16  ;;  %v1098_v51 = vld [vmem:[#allocation2 + $0xdc] sm:$0xf]  ;;  %v1852_v53 = vshrl.u32 %v7359_v42, 16  ;;  %v1854_v54 = vshll.u32 %v7359_v42, 16 }
  0x7d   :  { %v1859_v55 = vshll.u32 %v6553_v43, 16  ;;  %v939_v56 = vld [vmem:[#allocation2 + $0xb4] sm:$0xf]  ;;  %v943_v57 = vld [vmem:[#allocation2 + $0xbc] sm:$0x1]  ;;  %v431_v58 = vsel %vm7102_vm5, %v423_v16, %v430_v46  ;;  %v937_v59 = vsel %vm7111_vm7, %v432_v47, %v936_v30  ;;  %v436_v60 = vrot.slane %v434_v44, 7 }
  0x7e   :  { %v444_v61 = vrot.slane %v442_v50, 7  ;;  %v6561_v62 = vld [vmem:[#allocation2 + $0xe0] ss:$0 sps:$4 sm:$0x11]   ;;  %v1850_v63 = vsel %vm1706_vm6, %v1845_v52, %v1849_v41  ;;  %v1856_v0 = vrot.slane %v1854_v54, 1  ;;  %v445_v3 = vshll.u32 %v157_v20, 16 }
  0x7f   :  { %v1861_v1 = vrot.slane %v1859_v55, 1  ;;  %v1091_v2 = vld [vmem:[#allocation2 + $0x9c] sm:$0xf]  ;;  %935 = vst.msk [vmem:[#allocation2 + $0xac] sm:$0xf] %vm18_vm0, %v431_v58  ;;  %2113 = vrot.lane.b32.xlu1 %v1850_v63, %s6840_s9  ;;  %v439_v5 = vor.u32 %v437_v48, %v436_v60  ;;  %v440_v6 = vrot.slane %v436_v60, 4  ;;  %v7370_v9 = vcombine.low %v1097_v45, %v1098_v51 }
  0x80   :  { %938 = vst [vmem:[#allocation2 + $0xb0] sm:$0x1] %v937_v59  ;;  %v449_v8 = vrot.slane %v444_v61, 4  ;;  %v160_v11 = vld [vmem:[%s10103_s0 + $0x80] sm:$0xf]  ;;  %v1857_v14 = vor.u32 %v1856_v0, %v1852_v53  ;;  %v447_v16 = vor.u32 %v445_v3, %v444_v61  ;;  %v1907_v17 = vshll.u32 %v6561_v62, 16 }
  0x81   :  { %v1092_v15 = vld [vmem:[#allocation2 + $0xa0] sm:$0xf]  ;;  %v161_v18 = vld [vmem:[%s10103_s0 + $0x84] sm:$0xf]  ;;  %v468_v20 = vshrl.u32 %v160_v11, 16  ;;  %v940_v27 = vsel %vm7117_vm8, %v439_v5, %v939_v56  ;;  %v1900_v29 = vshrl.u32 %v7370_v9, 16 }
  0x82   :  { %v7378_v24 = vcombine.low %v1091_v2, %v1092_v15  ;;  %v6555_v26 = vld [vmem:[#allocation2 + $0xa4] ss:$0 sps:$4 sm:$0x11]   ;;  %v944_v28 = vsel %vm7111_vm7, %v449_v8, %v943_v57  ;;  %v1862_v30 = vsel %vm1706_vm6, %v1857_v14, %v1861_v1  ;;  %v448_v32 = vsel %vm7102_vm5, %v440_v6, %v447_v16  ;;  %941 = vst [vmem:[#allocation2 + $0xb4] sm:$0xf] %v940_v27 }
  0x83   :  { %945 = vst [vmem:[#allocation2 + $0xbc] sm:$0x1] %v944_v28  ;;  %v1902_v34 = vshll.u32 %v7370_v9, 16  ;;  %v1909_v35 = vrot.slane %v1907_v17, 1  ;;  %2115 = vrot.lane.b32.xlu0 %v1862_v30, %s6840_s9  ;;  %v1871_v40 = vshll.u32 %v6555_v26, 16  ;;  %v470_v43 = vrot.slane %v468_v20, 7 }
  0x84   :  { %10165 = vst [vmem:[#allocation14_spill] sm:$0xff] %v7378_v24  ;;  %v1864_v37 = vshrl.u32 %v7378_v24, 16  ;;  %v1866_v39 = vshll.u32 %v7378_v24, 16  ;;  %v1093_v41 = vld [vmem:[#allocation2 + $0xa8] sm:$0xf]  ;;  %v471_v45 = vshll.u32 %v160_v11, 16 }
  0x85   :  { %942 = vst.msk [vmem:[#allocation2 + $0xb8] sm:$0xf] %vm18_vm0, %v448_v32  ;;  %v1904_v44 = vrot.slane %v1902_v34, 1  ;;  %v476_v46 = vshrl.u32 %v161_v18, 16  ;;  %v479_v47 = vshll.u32 %v161_v18, 16  ;;  %v1873_v52 = vrot.slane %v1871_v40, 1 }
  0x86   :  { %v953_v48 = vld [vmem:[#allocation2 + $0xe4] sm:$0xf]  ;;  %v162_v50 = vld [vmem:[%s10103_s0 + $0x88] sm:$0xf]  ;;  %v1868_v51 = vrot.slane %v1866_v39, 1  ;;  %v473_v57 = vor.u32 %v471_v45, %v470_v43  ;;  %v474_v58 = vrot.slane %v470_v43, 4 }
  0x87   :  { %v1094_v53 = vld [vmem:[#allocation2 + $0xac] sm:$0xf]  ;;  %v6557_v55 = vld [vmem:[#allocation2 + $0xb0] ss:$0 sps:$4 sm:$0x11]   ;;  %v1905_v56 = vor.u32 %v1904_v44, %v1900_v29  ;;  %v478_v61 = vrot.slane %v476_v46, 7 }
  0x88   :  { %v7396_v54 = vcombine.low %v1093_v41, %v1094_v53  ;;  %v957_v59 = vld [vmem:[#allocation2 + $0xec] sm:$0x1]  ;;  %v1869_v60 = vor.u32 %v1868_v51, %v1864_v37  ;;  %v485_v63 = vshrl.u32 %v162_v50, 16  ;;  %v488_v0 = vshll.u32 %v162_v50, 16  ;;  %v164_v6 = vld [vmem:[%s10103_s0 + $0x90] sm:$0xf] }
  0x89   :  { %v163_v62 = vld [vmem:[%s10103_s0 + $0x8c] sm:$0xf]  ;;  %v1883_v3 = vshll.u32 %v6557_v55, 16  ;;  %v7404_v5 = vsel %vm1706_vm6, %v1905_v56, %v1909_v35  ;;  %v1095_v11 = vld [vmem:[#allocation2 + $0xb4] sm:$0xf]  ;;  %v481_v14 = vor.u32 %v479_v47, %v478_v61  ;;  %v483_v15 = vrot.slane %v478_v61, 4 }
  0x8a   :  { %10166 = vst [vmem:[#allocation15_spill] sm:$0xff] %v7396_v54  ;;  %v1876_v1 = vshrl.u32 %v7396_v54, 16  ;;  %v1878_v2 = vshll.u32 %v7396_v54, 16  ;;  %v1874_v8 = vsel %vm1706_vm6, %v1869_v60, %v1873_v52  ;;  %v954_v16 = vsel %vm7117_vm8, %v473_v57, %v953_v48  ;;  %v6559_v29 = vld [vmem:[#allocation2 + $0xbc] ss:$0 sps:$4 sm:$0x11]  }
  0x8b   :  { %2117 = vrot.lane.b32.xlu1 %v1874_v8, %s6840_s9  ;;  %v1885_v18 = vrot.slane %v1883_v3, 1  ;;  %955 = vst [vmem:[#allocation2 + $0xe4] sm:$0xf] %v954_v16  ;;  %v487_v26 = vrot.slane %v485_v63, 7  ;;  %v493_v27 = vshrl.u32 %v163_v62, 16  ;;  %v482_v30 = vsel %vm7102_vm5, %v474_v58, %v481_v14 }
  0x8c   :  { %v1880_v17 = vrot.slane %v1878_v2, 1  ;;  %v1096_v20 = vld [vmem:[#allocation2 + $0xb8] sm:$0xf]  ;;  %v958_v32 = vsel %vm7111_vm7, %v483_v15, %v957_v59  ;;  %v496_v34 = vshll.u32 %v163_v62, 16  ;;  %v960_v35 = vld [vmem:[#allocation2 + $0xf0] sm:$0xf] }
  0x8d   :  { %v7413_v28 = vcombine.low %v1095_v11, %v1096_v20  ;;  %956 = vst.msk [vmem:[#allocation2 + $0xe8] sm:$0xf] %vm18_vm0, %v482_v30  ;;  %959 = vst [vmem:[#allocation2 + $0xec] sm:$0x1] %v958_v32  ;;  %v490_v39 = vor.u32 %v488_v0, %v487_v26  ;;  %v491_v40 = vrot.slane %v487_v26, 4  ;;  %v495_v41 = vrot.slane %v493_v27, 7 }
  0x8e   :  { %v1881_v37 = vor.u32 %v1880_v17, %v1876_v1  ;;  %v964_v43 = vld [vmem:[#allocation2 + $0xf8] sm:$0x1]  ;;  %v1895_v46 = vshll.u32 %v6559_v29, 16  ;;  %v165_v47 = vld [vmem:[%s10103_s0 + $0x94] sm:$0xf]  ;;  %v502_v48 = vshrl.u32 %v164_v6, 16 }
  0x8f   :  { %10167 = vst [vmem:[#allocation16_spill] sm:$0xff] %v7413_v28  ;;  %v1888_v44 = vshrl.u32 %v7413_v28, 16  ;;  %v1890_v45 = vshll.u32 %v7413_v28, 16  ;;  %v498_v51 = vor.u32 %v496_v34, %v495_v41  ;;  %v500_v52 = vrot.slane %v495_v41, 4  ;;  %v166_v55 = vld [vmem:[%s10103_s0 + $0x98] sm:$0xf] }
  0x90   :  { %v1886_v50 = vsel %vm1706_vm6, %v1881_v37, %v1885_v18  ;;  %v961_v53 = vsel %vm7117_vm8, %v490_v39, %v960_v35  ;;  %v1897_v57 = vrot.slane %v1895_v46, 1  ;;  %v504_v58 = vrot.slane %v502_v48, 7  ;;  %v167_v60 = vld [vmem:[%s10103_s0 + $0x9c] sm:$0xf]  ;;  %v168_v2 = vld [vmem:[%s10103_s0 + $0xa0] sm:$0xf] }
  0x91   :  { %2119 = vrot.lane.b32.xlu0 %v1886_v50, %s6840_s9  ;;  %v1892_v56 = vrot.slane %v1890_v45, 1  ;;  %962 = vst [vmem:[#allocation2 + $0xf0] sm:$0xf] %v961_v53  ;;  %v505_v59 = vshll.u32 %v164_v6, 16  ;;  %v499_v61 = vsel %vm7102_vm5, %v491_v40, %v498_v51  ;;  %v965_v62 = vsel %vm7111_vm7, %v500_v52, %v964_v43  ;;  %v967_v1 = vld [vmem:[#allocation2 + $0xfc] sm:$0xf] }
  0x92   :  { %v510_v63 = vshrl.u32 %v165_v47, 16  ;;  %v513_v0 = vshll.u32 %v165_v47, 16  ;;  %v1099_v8 = vld [vmem:[#allocation2 + $0xe4] sm:$0xf]  ;;  %963 = vst.msk [vmem:[#allocation2 + $0xf4] sm:$0xf] %vm18_vm0, %v499_v61 }
  0x93   :  { %v1893_v3 = vor.u32 %v1892_v56, %v1888_v44  ;;  %966 = vst [vmem:[#allocation2 + $0xf8] sm:$0x1] %v965_v62  ;;  %v507_v6 = vor.u32 %v505_v59, %v504_v58  ;;  %v508_v11 = vrot.slane %v504_v58, 4  ;;  %v519_v14 = vshrl.u32 %v166_v55, 16  ;;  %v971_v16 = vld [vmem:[#allocation2 + $0x104] sm:$0x1] }
  0x94   :  { %v512_v15 = vrot.slane %v510_v63, 7  ;;  %v522_v17 = vshll.u32 %v166_v55, 16  ;;  %v527_v18 = vshrl.u32 %v167_v60, 16  ;;  %v530_v20 = vshll.u32 %v167_v60, 16  ;;  %v974_v26 = vld [vmem:[#allocation2 + $0x108] sm:$0xf] }
  0x95   :  { %v1898_v27 = vsel %vm1706_vm6, %v1893_v3, %v1897_v57  ;;  %2123 = vrot.lane.b32.xlu0 %v7404_v5, %s6840_s9  ;;  %v1100_v29 = vld [vmem:[#allocation2 + $0xe8] sm:$0xf]  ;;  %v968_v30 = vsel %vm7117_vm8, %v507_v6, %v967_v1  ;;  %v521_v32 = vrot.slane %v519_v14, 7  ;;  %v536_v34 = vshrl.u32 %v168_v2, 16  ;;  %v978_v43 = vld [vmem:[#allocation2 + $0x110] sm:$0x1] }
  0x96   :  { %2121 = vrot.lane.b32.xlu1 %v1898_v27, %s6840_s9  ;;  %v7449_v35 = vcombine.low %v1099_v8, %v1100_v29  ;;  %v6563_v37 = vld [vmem:[#allocation2 + $0xec] ss:$0 sps:$4 sm:$0x11]   ;;  %v515_v39 = vor.u32 %v513_v0, %v512_v15  ;;  %v517_v40 = vrot.slane %v512_v15, 4  ;;  %969 = vst [vmem:[#allocation2 + $0xfc] sm:$0xf] %v968_v30 }
  0x97   :  { %v529_v41 = vrot.slane %v527_v18, 7  ;;  %v524_v44 = vor.u32 %v522_v17, %v521_v32  ;;  %v525_v45 = vrot.slane %v521_v32, 4  ;;  %v169_v5 = vld [vmem:[%s10103_s0 + $0xa4] sm:$0xf]  ;;  %v7454_v46 = vrot.slane %v536_v34, 7 }
  0x98   :  { %v539_v47 = vshll.u32 %v168_v2, 16  ;;  %v1912_v48 = vshrl.u32 %v7449_v35, 16  ;;  %v1914_v50 = vshll.u32 %v7449_v35, 16  ;;  %v1919_v51 = vshll.u32 %v6563_v37, 16  ;;  %v1101_v52 = vld [vmem:[#allocation2 + $0xf0] sm:$0xf] }
  0x99   :  { %v516_v53 = vsel %vm7102_vm5, %v508_v11, %v515_v39  ;;  %v972_v55 = vsel %vm7111_vm7, %v517_v40, %v971_v16  ;;  %v532_v56 = vor.u32 %v530_v20, %v529_v41  ;;  %v534_v57 = vrot.slane %v529_v41, 4  ;;  %v981_v59 = vld [vmem:[#allocation2 + $0x114] sm:$0xf]  ;;  %v170_v60 = vld [vmem:[%s10103_s0 + $0xa8] sm:$0xf] }
  0x9a   :  { %970 = vst.msk [vmem:[#allocation2 + $0x100] sm:$0xf] %vm18_vm0, %v516_v53  ;;  %v975_v58 = vsel %vm7117_vm8, %v524_v44, %v974_v26  ;;  %v1916_v61 = vrot.slane %v1914_v50, 1  ;;  %v1921_v62 = vrot.slane %v1919_v51, 1  ;;  %v1102_v63 = vld [vmem:[#allocation2 + $0xf4] sm:$0xf]  ;;  %v541_v0 = vor.u32 %v539_v47, %v7454_v46 }
  0x9b   :  { %973 = vst [vmem:[#allocation2 + $0x104] sm:$0x1] %v972_v55  ;;  %976 = vst [vmem:[#allocation2 + $0x108] sm:$0xf] %v975_v58  ;;  %v7469_v1 = vcombine.low %v1101_v52, %v1102_v63  ;;  %v533_v3 = vsel %vm7102_vm5, %v525_v45, %v532_v56  ;;  %v979_v8 = vsel %vm7111_vm7, %v534_v57, %v978_v43  ;;  %v542_v6 = vrot.slane %v7454_v46, 4 }
  0x9c   :  { %v6565_v2 = vld [vmem:[#allocation2 + $0xf8] ss:$0 sps:$4 sm:$0x11]   ;;  %v171_v11 = vld [vmem:[%s10103_s0 + $0xac] sm:$0xf]  ;;  %v1917_v14 = vor.u32 %v1916_v61, %v1912_v48  ;;  %v544_v15 = vshrl.u32 %v169_v5, 16  ;;  %v982_v17 = vsel %vm7117_vm8, %v541_v0, %v981_v59 }
  0x9d   :  { %10168 = vst [vmem:[#allocation17_spill] sm:$0xff] %v7469_v1  ;;  %977 = vst.msk [vmem:[#allocation2 + $0x10c] sm:$0xf] %vm18_vm0, %v533_v3  ;;  %v547_v16 = vshll.u32 %v169_v5, 16  ;;  %v1924_v18 = vshrl.u32 %v7469_v1, 16  ;;  %v1926_v20 = vshll.u32 %v7469_v1, 16 }
  0x9e   :  { %980 = vst [vmem:[#allocation2 + $0x110] sm:$0x1] %v979_v8  ;;  %v1931_v26 = vshll.u32 %v6565_v2, 16  ;;  %983 = vst [vmem:[#allocation2 + $0x114] sm:$0xf] %v982_v17  ;;  %v553_v29 = vshrl.u32 %v170_v60, 16  ;;  %v1922_v32 = vsel %vm1706_vm6, %v1917_v14, %v1921_v62 }
  0x9f   :  { %v985_v27 = vld [vmem:[#allocation2 + $0x11c] sm:$0x1]  ;;  %v172_v30 = vld [vmem:[%s10103_s0 + $0xb0] sm:$0xf]  ;;  %v546_v37 = vrot.slane %v544_v15, 7  ;;  %v556_v39 = vshll.u32 %v170_v60, 16  ;;  %2125 = vrot.lane.b32.xlu1 %v1922_v32, %s6840_s9 }
  0xa0   :  { %v1103_v34 = vld [vmem:[#allocation2 + $0xfc] sm:$0xf]  ;;  %v561_v40 = vshrl.u32 %v171_v11, 16  ;;  %v1928_v41 = vrot.slane %v1926_v20, 1  ;;  %v1933_v43 = vrot.slane %v1931_v26, 1  ;;  %v555_v44 = vrot.slane %v553_v29, 7 }
  0xa1   :  { %v564_v45 = vshll.u32 %v171_v11, 16  ;;  %v988_v5 = vld [vmem:[#allocation2 + $0x120] sm:$0xf]  ;;  %v992_v46 = vld [vmem:[#allocation2 + $0x128] sm:$0x1]  ;;  %v549_v48 = vor.u32 %v547_v16, %v546_v37  ;;  %v551_v50 = vrot.slane %v546_v37, 4 }
  0xa2   :  { %v1104_v47 = vld [vmem:[#allocation2 + $0x100] sm:$0xf]  ;;  %v563_v51 = vrot.slane %v561_v40, 7  ;;  %v570_v52 = vshrl.u32 %v172_v30, 16  ;;  %v1929_v53 = vor.u32 %v1928_v41, %v1924_v18  ;;  %v558_v57 = vor.u32 %v556_v39, %v555_v44  ;;  %v1105_v59 = vld [vmem:[#allocation2 + $0x108] sm:$0xf] }
  0xa3   :  { %v7489_v55 = vcombine.low %v1103_v34, %v1104_v47  ;;  %v6567_v56 = vld [vmem:[#allocation2 + $0x104] ss:$0 sps:$4 sm:$0x11]   ;;  %v559_v58 = vrot.slane %v555_v44, 4  ;;  %v550_v60 = vsel %vm7102_vm5, %v542_v6, %v549_v48  ;;  %v986_v61 = vsel %vm7111_vm7, %v551_v50, %v985_v27  ;;  %v173_v0 = vld [vmem:[%s10103_s0 + $0xb4] sm:$0xf] }
  0xa4   :  { %v566_v62 = vor.u32 %v564_v45, %v563_v51  ;;  %v568_v63 = vrot.slane %v563_v51, 4  ;;  %v1934_v2 = vsel %vm1706_vm6, %v1929_v53, %v1933_v43  ;;  %v1943_v11 = vshll.u32 %v6567_v56, 16  ;;  %v7501_v14 = vld [vmem:[#allocation2 + $0x10c] sm:$0xf]  ;;  %984 = vst.msk [vmem:[#allocation2 + $0x118] sm:$0xf] %vm18_vm0, %v550_v60 }
  0xa5   :  { %10169 = vst [vmem:[#allocation18_spill] sm:$0xff] %v7489_v55  ;;  %v1936_v3 = vshrl.u32 %v7489_v55, 16  ;;  %v1938_v8 = vshll.u32 %v7489_v55, 16  ;;  %987 = vst [vmem:[#allocation2 + $0x11c] sm:$0x1] %v986_v61  ;;  %2127 = vrot.lane.b32.xlu0 %v1934_v2, %s6840_s9  ;;  %v7506_v6 = vcombine.low %v1105_v59, %v7501_v14  ;;  %v989_v17 = vsel %vm7117_vm8, %v558_v57, %v988_v5 }
  0xa6   :  { %v7508_v15 = vld [vmem:[#allocation2 + $0x110] ss:$0 sps:$4 sm:$0x11]   ;;  %v567_v16 = vsel %vm7102_vm5, %v559_v58, %v566_v62  ;;  %v993_v18 = vsel %vm7111_vm7, %v568_v63, %v992_v46  ;;  %v995_v20 = vld [vmem:[#allocation2 + $0x12c] sm:$0xf]  ;;  %v1945_v27 = vrot.slane %v1943_v11, 1 }
  0xa7   :  { %10170 = vst [vmem:[#allocation19_spill] sm:$0xff] %v7506_v6  ;;  %v1940_v26 = vrot.slane %v1938_v8, 1  ;;  %990 = vst [vmem:[#allocation2 + $0x120] sm:$0xf] %v989_v17  ;;  %v572_v29 = vrot.slane %v570_v52, 7  ;;  %v573_v32 = vshll.u32 %v172_v30, 16 }
  0xa8   :  { %991 = vst.msk [vmem:[#allocation2 + $0x124] sm:$0xf] %vm18_vm0, %v567_v16  ;;  %994 = vst [vmem:[#allocation2 + $0x128] sm:$0x1] %v993_v18  ;;  %v174_v34 = vld [vmem:[%s10103_s0 + $0xb8] sm:$0xf] }
  0xa9   :  { %v1948_v37 = vshrl.u32 %v7506_v6, 16  ;;  %v1950_v39 = vshll.u32 %v7506_v6, 16  ;;  %v1955_v40 = vshll.u32 %v7508_v15, 16  ;;  %v578_v41 = vshrl.u32 %v173_v0, 16  ;;  %v175_v43 = vld [vmem:[%s10103_s0 + $0xbc] sm:$0xf] }
  0xaa   :  { %v1941_v44 = vor.u32 %v1940_v26, %v1936_v3  ;;  %v1107_v45 = vld [vmem:[#allocation2 + $0x114] sm:$0xf]  ;;  %v575_v5 = vor.u32 %v573_v32, %v572_v29  ;;  %v576_v46 = vrot.slane %v572_v29, 4  ;;  %v581_v30 = vshll.u32 %v173_v0, 16  ;;  %v7529_v52 = vld [vmem:[%s10103_s0 + $0xc0] sm:$0xf] }
  0xab   :  { %v1952_v47 = vrot.slane %v1950_v39, 1  ;;  %v1957_v48 = vrot.slane %v1955_v40, 1  ;;  %v580_v50 = vrot.slane %v578_v41, 7  ;;  %v587_v51 = vshrl.u32 %v174_v34, 16  ;;  %v999_v57 = vld [vmem:[#allocation2 + $0x134] sm:$0x1] }
  0xac   :  { %v1946_v53 = vsel %vm1706_vm6, %v1941_v44, %v1945_v27  ;;  %v996_v56 = vsel %vm7117_vm8, %v575_v5, %v995_v20  ;;  %v590_v58 = vshll.u32 %v174_v34, 16  ;;  %v595_v59 = vshrl.u32 %v175_v43, 16  ;;  %v1002_v60 = vld [vmem:[#allocation2 + $0x138] sm:$0xf]  ;;  %v1006_v17 = vld [vmem:[#allocation2 + $0x140] sm:$0x1] }
  0xad   :  { %2129 = vrot.lane.b32.xlu1 %v1946_v53, %s6840_s9  ;;  %v1953_v61 = vor.u32 %v1952_v47, %v1948_v37  ;;  %v7535_v62 = vld [vmem:[#allocation2 + $0x118] sm:$0xf]  ;;  %v583_v63 = vor.u32 %v581_v30, %v580_v50  ;;  %v585_v0 = vrot.slane %v580_v50, 4  ;;  %997 = vst [vmem:[#allocation2 + $0x12c] sm:$0xf] %v996_v56  ;;  %v589_v2 = vrot.slane %v587_v51, 7 }
  0xae   :  { %v7538_v3 = vcombine.low %v1107_v45, %v7535_v62  ;;  %v7540_v8 = vld [vmem:[#allocation2 + $0x11c] ss:$0 sps:$4 sm:$0x11]   ;;  %v597_v11 = vrot.slane %v595_v59, 7  ;;  %v598_v16 = vshll.u32 %v175_v43, 16  ;;  %v604_v18 = vshrl.u32 %v7529_v52, 16 }
  0xaf   :  { %v1958_v20 = vsel %vm1706_vm6, %v1953_v61, %v1957_v48  ;;  %v1109_v26 = vld [vmem:[#allocation2 + $0x120] sm:$0xf]  ;;  %v7544_v27 = vld [vmem:[#allocation2 + $0x124] sm:$0xf]  ;;  %v584_v29 = vsel %vm7102_vm5, %v576_v46, %v583_v63  ;;  %v1000_v32 = vsel %vm7111_vm7, %v585_v0, %v999_v57  ;;  %v592_v34 = vor.u32 %v590_v58, %v589_v2  ;;  %v178_v53 = vld [vmem:[%s10103_s0 + $0xc8] sm:$0xf] }
  0xb0   :  { %10171 = vst [vmem:[#allocation20_spill] sm:$0xff] %v7538_v3  ;;  %2131 = vrot.lane.b32.xlu0 %v1958_v20, %s6840_s9  ;;  %v1960_v37 = vshrl.u32 %v7538_v3, 16  ;;  %v1962_v39 = vshll.u32 %v7538_v3, 16  ;;  %v1967_v40 = vshll.u32 %v7540_v8, 16  ;;  %v7555_v41 = vcombine.low %v1109_v26, %v7544_v27  ;;  %998 = vst.msk [vmem:[#allocation2 + $0x130] sm:$0xf] %vm18_vm0, %v584_v29 }
  0xb1   :  { %v7557_v43 = vld [vmem:[#allocation2 + $0x128] ss:$0 sps:$4 sm:$0x11]   ;;  %1001 = vst [vmem:[#allocation2 + $0x134] sm:$0x1] %v1000_v32  ;;  %v593_v44 = vrot.slane %v589_v2, 4  ;;  %v600_v45 = vor.u32 %v598_v16, %v597_v11  ;;  %v1003_v46 = vsel %vm7117_vm8, %v592_v34, %v1002_v60 }
  0xb2   :  { %10172 = vst [vmem:[#allocation21_spill] sm:$0xff] %v7555_v41  ;;  %v602_v5 = vrot.slane %v597_v11, 4  ;;  %v177_v30 = vld [vmem:[%s10103_s0 + $0xc4] sm:$0xf]  ;;  %v1964_v47 = vrot.slane %v1962_v39, 1  ;;  %v1969_v48 = vrot.slane %v1967_v40, 1 }
  0xb3   :  { %v1972_v50 = vshrl.u32 %v7555_v41, 16  ;;  %v1974_v51 = vshll.u32 %v7555_v41, 16  ;;  %1004 = vst [vmem:[#allocation2 + $0x138] sm:$0xf] %v1003_v46  ;;  %v1979_v56 = vshll.u32 %v7557_v43, 16  ;;  %v601_v57 = vsel %vm7102_vm5, %v593_v44, %v600_v45 }
  0xb4   :  { %v1007_v58 = vsel %vm7111_vm7, %v602_v5, %v1006_v17  ;;  %v606_v59 = vrot.slane %v604_v18, 7  ;;  %v1965_v60 = vor.u32 %v1964_v47, %v1960_v37  ;;  %1005 = vst.msk [vmem:[#allocation2 + $0x13c] sm:$0xf] %vm18_vm0, %v601_v57  ;;  %v607_v63 = vshll.u32 %v7529_v52, 16  ;;  %v1009_v2 = vld [vmem:[#allocation2 + $0x144] sm:$0xf] }
  0xb5   :  { %v1976_v61 = vrot.slane %v1974_v51, 1  ;;  %1008 = vst [vmem:[#allocation2 + $0x140] sm:$0x1] %v1007_v58  ;;  %v612_v0 = vshrl.u32 %v177_v30, 16  ;;  %v1981_v11 = vrot.slane %v1979_v56, 1  ;;  %v615_v26 = vshll.u32 %v177_v30, 16 }
  0xb6   :  { %v1111_v16 = vld [vmem:[#allocation2 + $0x12c] sm:$0xf]  ;;  %v610_v20 = vrot.slane %v606_v59, 4  ;;  %v621_v29 = vshrl.u32 %v178_v53, 16  ;;  %v1970_v32 = vsel %vm1706_vm6, %v1965_v60, %v1969_v48  ;;  %v609_v39 = vor.u32 %v607_v63, %v606_v59  ;;  %v1016_v48 = vld [vmem:[#allocation2 + $0x150] sm:$0xf] }
  0xb7   :  { %v1977_v34 = vor.u32 %v1976_v61, %v1972_v50  ;;  %v614_v17 = vrot.slane %v612_v0, 7  ;;  %v1013_v18 = vld [vmem:[#allocation2 + $0x14c] sm:$0x1]  ;;  %2133 = vrot.lane.b32.xlu1 %v1970_v32, %s6840_s9  ;;  %v7582_v52 = vld [vmem:[#allocation2 + $0x130] sm:$0xf]  ;;  %v624_v44 = vshll.u32 %v178_v53, 16 }
  0xb8   :  { %v179_v37 = vld [vmem:[%s10103_s0 + $0xcc] sm:$0xf]  ;;  %v623_v40 = vrot.slane %v621_v29, 7  ;;  %v7586_v5 = vcombine.low %v1111_v16, %v7582_v52  ;;  %v7588_v46 = vld [vmem:[#allocation2 + $0x134] ss:$0 sps:$4 sm:$0x11]   ;;  %v1010_v51 = vsel %vm7117_vm8, %v609_v39, %v1009_v2 }
  0xb9   :  { %v1982_v45 = vsel %vm1706_vm6, %v1977_v34, %v1981_v11  ;;  %v617_v30 = vor.u32 %v615_v26, %v614_v17  ;;  %v619_v47 = vrot.slane %v614_v17, 4  ;;  %v629_v58 = vshrl.u32 %v179_v37, 16  ;;  %v180_v53 = vld [vmem:[%s10103_s0 + $0xd0] sm:$0xf]  ;;  %1011 = vst [vmem:[#allocation2 + $0x144] sm:$0xf] %v1010_v51 }
  0xba   :  { %10173 = vst [vmem:[#allocation22_spill] sm:$0xff] %v7586_v5  ;;  %2135 = vrot.lane.b32.xlu0 %v1982_v45, %s6840_s9  ;;  %v1113_v50 = vld [vmem:[#allocation2 + $0x138] sm:$0xf]  ;;  %v626_v56 = vor.u32 %v624_v44, %v623_v40  ;;  %v627_v57 = vrot.slane %v623_v40, 4  ;;  %v1984_v59 = vshrl.u32 %v7586_v5, 16  ;;  %v1986_v60 = vshll.u32 %v7586_v5, 16 }
  0xbb   :  { %v1991_v61 = vshll.u32 %v7588_v46, 16  ;;  %v618_v63 = vsel %vm7102_vm5, %v610_v20, %v617_v30  ;;  %v1020_v0 = vld [vmem:[#allocation2 + $0x158] sm:$0x1]  ;;  %v181_v2 = vld [vmem:[%s10103_s0 + $0xd4] sm:$0xf]  ;;  %v1014_v16 = vsel %vm7111_vm7, %v619_v47, %v1013_v18  ;;  %v631_v26 = vrot.slane %v629_v58, 7 }
  0xbc   :  { %v7604_v11 = vld [vmem:[#allocation2 + $0x13c] sm:$0xf]  ;;  %1012 = vst.msk [vmem:[#allocation2 + $0x148] sm:$0xf] %vm18_vm0, %v618_v63  ;;  %v632_v29 = vshll.u32 %v179_v37, 16  ;;  %v1017_v32 = vsel %vm7117_vm8, %v626_v56, %v1016_v48  ;;  %v1988_v34 = vrot.slane %v1986_v60, 1 }
  0xbd   :  { %v1993_v20 = vrot.slane %v1991_v61, 1  ;;  %v7612_v39 = vcombine.low %v1113_v50, %v7604_v11  ;;  %v7614_v17 = vld [vmem:[#allocation2 + $0x140] ss:$0 sps:$4 sm:$0x11]   ;;  %1015 = vst [vmem:[#allocation2 + $0x14c] sm:$0x1] %v1014_v16 }
  0xbe   :  { %1018 = vst [vmem:[#allocation2 + $0x150] sm:$0xf] %v1017_v32  ;;  %v638_v40 = vshrl.u32 %v180_v53, 16  ;;  %v634_v44 = vor.u32 %v632_v29, %v631_v26  ;;  %v636_v45 = vrot.slane %v631_v26, 4  ;;  %v641_v30 = vshll.u32 %v180_v53, 16 }
  0xbf   :  { %10174 = vst [vmem:[#allocation23_spill] sm:$0xff] %v7612_v39  ;;  %v646_v51 = vshrl.u32 %v181_v2, 16  ;;  %v1989_v18 = vor.u32 %v1988_v34, %v1984_v59  ;;  %v1996_v37 = vshrl.u32 %v7612_v39, 16  ;;  %v1998_v47 = vshll.u32 %v7612_v39, 16  ;;  %v182_v50 = vld [vmem:[%s10103_s0 + $0xd8] sm:$0xf] }
  0xc0   :  { %v2003_v48 = vshll.u32 %v7614_v17, 16  ;;  %v635_v56 = vsel %vm7102_vm5, %v627_v57, %v634_v44  ;;  %v1021_v58 = vsel %vm7111_vm7, %v636_v45, %v1020_v0  ;;  %v640_v60 = vrot.slane %v638_v40, 7  ;;  %v1023_v61 = vld [vmem:[#allocation2 + $0x15c] sm:$0xf]  ;;  %v1027_v32 = vld [vmem:[#allocation2 + $0x164] sm:$0x1] }
  0xc1   :  { %v648_v53 = vrot.slane %v646_v51, 7  ;;  %v183_v59 = vld [vmem:[%s10103_s0 + $0xdc] sm:$0xf]  ;;  %v1994_v63 = vsel %vm1706_vm6, %v1989_v18, %v1993_v20  ;;  %v2000_v16 = vrot.slane %v1998_v47, 1  ;;  %1019 = vst.msk [vmem:[#allocation2 + $0x154] sm:$0xf] %vm18_vm0, %v635_v56 }
  0xc2   :  { %v2005_v26 = vrot.slane %v2003_v48, 1  ;;  %1022 = vst [vmem:[#allocation2 + $0x158] sm:$0x1] %v1021_v58  ;;  %v649_v29 = vshll.u32 %v181_v2, 16  ;;  %2137 = vrot.lane.b32.xlu1 %v1994_v63, %s6840_s9  ;;  %v1115_v57 = vld [vmem:[#allocation2 + $0x144] sm:$0xf]  ;;  %v643_v0 = vor.u32 %v641_v30, %v640_v60 }
  0xc3   :  { %v644_v34 = vrot.slane %v640_v60, 4  ;;  %v653_v40 = vrot.slane %v648_v53, 4  ;;  %v655_v44 = vshrl.u32 %v182_v50, 16  ;;  %v2001_v45 = vor.u32 %v2000_v16, %v1996_v37  ;;  %v7632_v51 = vld [vmem:[#allocation2 + $0x148] sm:$0xf] }
  0xc4   :  { %v651_v28 = vor.u32 %v649_v29, %v648_v53  ;;  %v658_v54 = vshll.u32 %v182_v50, 16  ;;  %v663_v20 = vshrl.u32 %v183_v59, 16  ;;  %v184_v18 = vld [vmem:[%s10103_s0 + $0xe0] sm:$0xf]  ;;  %v7638_v2 = vcombine.low %v1115_v57, %v7632_v51  ;;  %v1030_v53 = vld [vmem:[#allocation2 + $0x168] sm:$0xf] }
  0xc5   :  { %v7640_v47 = vld [vmem:[#allocation2 + $0x14c] ss:$0 sps:$4 sm:$0x11]   ;;  %v1024_v30 = vsel %vm7117_vm8, %v643_v0, %v1023_v61  ;;  %v1028_v37 = vsel %vm7111_vm7, %v653_v40, %v1027_v32  ;;  %v657_v48 = vrot.slane %v655_v44, 7  ;;  %v2006_v56 = vsel %vm1706_vm6, %v2001_v45, %v2005_v26  ;;  %v1034_v63 = vld [vmem:[#allocation2 + $0x170] sm:$0x1] }
  0xc6   :  { %10175 = vst [vmem:[#allocation24_spill] sm:$0xff] %v7638_v2  ;;  %v652_v50 = vsel %vm7102_vm5, %v644_v34, %v651_v28  ;;  %1025 = vst [vmem:[#allocation2 + $0x15c] sm:$0xf] %v1024_v30  ;;  %v665_v58 = vrot.slane %v663_v20, 7  ;;  %v666_v60 = vshll.u32 %v183_v59, 16  ;;  %2139 = vrot.lane.b32.xlu0 %v2006_v56, %s6840_s9  ;;  %v2008_v16 = vshrl.u32 %v7638_v2, 16 }
  0xc7   :  { %1029 = vst [vmem:[#allocation2 + $0x164] sm:$0x1] %v1028_v37  ;;  %v2010_v61 = vshll.u32 %v7638_v2, 16  ;;  %v2015_v29 = vshll.u32 %v7640_v47, 16  ;;  %v1117_v32 = vld [vmem:[#allocation2 + $0x150] sm:$0xf]  ;;  %v660_v26 = vor.u32 %v658_v54, %v657_v48 }
  0xc8   :  { %1026 = vst.msk [vmem:[#allocation2 + $0x160] sm:$0xf] %vm18_vm0, %v652_v50  ;;  %v661_v57 = vrot.slane %v657_v48, 4  ;;  %v668_v28 = vor.u32 %v666_v60, %v665_v58  ;;  %v670_v0 = vrot.slane %v665_v58, 4  ;;  %v185_v59 = vld [vmem:[%s10103_s0 + $0xe4] sm:$0xf] }
  0xc9   :  { %v672_v34 = vshrl.u32 %v184_v18, 16  ;;  %v2012_v40 = vrot.slane %v2010_v61, 1  ;;  %v2017_v44 = vrot.slane %v2015_v29, 1  ;;  %v7657_v45 = vld [vmem:[#allocation2 + $0x154] sm:$0xf]  ;;  %v1031_v20 = vsel %vm7117_vm8, %v660_v26, %v1030_v53 }
  0xca   :  { %v7662_v30 = vcombine.low %v1117_v32, %v7657_v45  ;;  %v7664_v37 = vld [vmem:[#allocation2 + $0x158] ss:$0 sps:$4 sm:$0x11]   ;;  %v669_v54 = vsel %vm7102_vm5, %v661_v57, %v668_v28  ;;  %1032 = vst [vmem:[#allocation2 + $0x168] sm:$0xf] %v1031_v20  ;;  %v1035_v48 = vsel %vm7111_vm7, %v670_v0, %v1034_v63  ;;  %v675_v60 = vshll.u32 %v184_v18, 16 }
  0xcb   :  { %v674_v56 = vrot.slane %v672_v34, 7  ;;  %v186_v50 = vld [vmem:[%s10103_s0 + $0xe8] sm:$0xf]  ;;  %v2013_v58 = vor.u32 %v2012_v40, %v2008_v16  ;;  %1033 = vst.msk [vmem:[#allocation2 + $0x16c] sm:$0xf] %vm18_vm0, %v669_v54  ;;  %v680_v53 = vshrl.u32 %v185_v59, 16 }
  0xcc   :  { %10176 = vst [vmem:[#allocation25_spill] sm:$0xff] %v7662_v30  ;;  %1036 = vst [vmem:[#allocation2 + $0x170] sm:$0x1] %v1035_v48  ;;  %v683_v61 = vshll.u32 %v185_v59, 16  ;;  %v187_v29 = vld [vmem:[%s10103_s0 + $0xec] sm:$0xf] }
  0xcd   :  { %v2020_v32 = vshrl.u32 %v7662_v30, 16  ;;  %v2022_v63 = vshll.u32 %v7662_v30, 16  ;;  %v2027_v26 = vshll.u32 %v7664_v37, 16  ;;  %v678_v57 = vrot.slane %v674_v56, 4  ;;  %v1037_v28 = vld [vmem:[#allocation2 + $0x174] sm:$0xf] }
  0xce   :  { %v2018_v16 = vsel %vm1706_vm6, %v2013_v58, %v2017_v44  ;;  %v1119_v0 = vld [vmem:[#allocation2 + $0x15c] sm:$0xf]  ;;  %v677_v34 = vor.u32 %v675_v60, %v674_v56  ;;  %v682_v40 = vrot.slane %v680_v53, 7  ;;  %v689_v20 = vshrl.u32 %v186_v50, 16  ;;  %v1044_v58 = vld [vmem:[#allocation2 + $0x180] sm:$0xf] }
  0xcf   :  { %v1041_v18 = vld [vmem:[#allocation2 + $0x17c] sm:$0x1]  ;;  %2141 = vrot.lane.b32.xlu1 %v2018_v16, %s6840_s9  ;;  %v2024_v59 = vrot.slane %v2022_v63, 1  ;;  %v2029_v54 = vrot.slane %v2027_v26, 1  ;;  %v7682_v48 = vld [vmem:[#allocation2 + $0x160] sm:$0xf] }
  0xd0   :  { %v692_v24 = vshll.u32 %v186_v50, 16  ;;  %v697_v42 = vshrl.u32 %v187_v29, 16  ;;  %v7685_v30 = vcombine.low %v1119_v0, %v7682_v48  ;;  %v7687_v4 = vld [vmem:[#allocation2 + $0x164] ss:$0 sps:$4 sm:$0x11]   ;;  %v685_v33 = vor.u32 %v683_v61, %v682_v40 }
  0xd1   :  { %v687_v44 = vrot.slane %v682_v40, 4  ;;  %v1038_v56 = vsel %vm7117_vm8, %v677_v34, %v1037_v28  ;;  %v2025_v60 = vor.u32 %v2024_v59, %v2020_v32  ;;  %v691_v53 = vrot.slane %v689_v20, 7  ;;  %v188_v50 = vld [vmem:[%s10103_s0 + $0xf0] sm:$0xf]  ;;  %v1121_v40 = vld [vmem:[#allocation2 + $0x168] sm:$0xf] }
  0xd2   :  { %10177 = vst [vmem:[#allocation26_spill] sm:$0xff] %v7685_v30  ;;  %1039 = vst [vmem:[#allocation2 + $0x174] sm:$0xf] %v1038_v56  ;;  %v699_v63 = vrot.slane %v697_v42, 7  ;;  %v700_v26 = vshll.u32 %v187_v29, 16  ;;  %v2032_v16 = vshrl.u32 %v7685_v30, 16  ;;  %v686_v28 = vsel %vm7102_vm5, %v678_v57, %v685_v33 }
  0xd3   :  { %v2034_v0 = vshll.u32 %v7685_v30, 16  ;;  %v2039_v61 = vshll.u32 %v7687_v4, 16  ;;  %v1048_v34 = vld [vmem:[#allocation2 + $0x188] sm:$0x1]  ;;  %v189_v42 = vld [vmem:[%s10103_s0 + $0xf4] sm:$0xf]  ;;  %v2030_v29 = vsel %vm1706_vm6, %v2025_v60, %v2029_v54  ;;  %v1042_v20 = vsel %vm7111_vm7, %v687_v44, %v1041_v18 }
  0xd4   :  { %v7703_v32 = vld [vmem:[#allocation2 + $0x16c] sm:$0xf]  ;;  %1040 = vst.msk [vmem:[#allocation2 + $0x178] sm:$0xf] %vm18_vm0, %v686_v28  ;;  %v694_v59 = vor.u32 %v692_v24, %v691_v53  ;;  %v695_v56 = vrot.slane %v691_v53, 4  ;;  %2143 = vrot.lane.b32.xlu0 %v2030_v29, %s6840_s9  ;;  %v702_v54 = vor.u32 %v700_v26, %v699_v63  ;;  %v704_v60 = vrot.slane %v699_v63, 4 }
  0xd5   :  { %v2036_v30 = vrot.slane %v2034_v0, 1  ;;  %v2041_v33 = vrot.slane %v2039_v61, 1  ;;  %v7710_v57 = vcombine.low %v1121_v40, %v7703_v32  ;;  %v7712_v2 = vld [vmem:[#allocation2 + $0x170] ss:$0 sps:$4 sm:$0x11]   ;;  %v706_v39 = vshrl.u32 %v188_v50, 16 }
  0xd6   :  { %1043 = vst [vmem:[#allocation2 + $0x17c] sm:$0x1] %v1042_v20  ;;  %v1045_v28 = vsel %vm7117_vm8, %v694_v59, %v1044_v58  ;;  %v709_v10 = vshll.u32 %v188_v50, 16  ;;  %v2051_v53 = vshll.u32 %v7712_v2, 16  ;;  %v703_v0 = vsel %vm7102_vm5, %v695_v56, %v702_v54  ;;  %v1051_v40 = vld [vmem:[#allocation2 + $0x18c] sm:$0xf] }
  0xd7   :  { %10178 = vst [vmem:[#allocation27_spill] sm:$0xff] %v7710_v57  ;;  %v2037_v18 = vor.u32 %v2036_v30, %v2032_v16  ;;  %v2044_v24 = vshrl.u32 %v7710_v57, 16  ;;  %v2046_v44 = vshll.u32 %v7710_v57, 16  ;;  %1046 = vst [vmem:[#allocation2 + $0x180] sm:$0xf] %v1045_v28  ;;  %v1049_v26 = vsel %vm7111_vm7, %v704_v60, %v1048_v34 }
  0xd8   :  { %v708_v63 = vrot.slane %v706_v39, 7  ;;  %v714_v61 = vshrl.u32 %v189_v42, 16  ;;  %v2053_v30 = vrot.slane %v2051_v53, 1  ;;  %1047 = vst.msk [vmem:[#allocation2 + $0x184] sm:$0xf] %vm18_vm0, %v703_v0  ;;  %v717_v29 = vshll.u32 %v189_v42, 16 }
  0xd9   :  { %v2042_v58 = vsel %vm1706_vm6, %v2037_v18, %v2041_v33  ;;  %v2048_v50 = vrot.slane %v2046_v44, 1  ;;  %v1123_v16 = vld [vmem:[#allocation2 + $0x174] sm:$0xf]  ;;  %1050 = vst [vmem:[#allocation2 + $0x188] sm:$0x1] %v1049_v26  ;;  %vm4785_vm1 = vcmask 195584  }
  0xda   :  { %2145 = vrot.lane.b32.xlu1 %v2042_v58, %s6840_s9  ;;  %v711_v20 = vor.u32 %v709_v10, %v708_v63  ;;  %v712_v59 = vrot.slane %v708_v63, 4  ;;  %v716_v56 = vrot.slane %v714_v61, 7  ;;  %v1055_v39 = vld [vmem:[#allocation2 + $0x194] sm:$0x1]  ;;  %v1161_v61 = vld [vmem:[#allocation2] sm:$0xe] }
  0xdb   :  { %v2049_v54 = vor.u32 %v2048_v50, %v2044_v24  ;;  %v7726_v28 = vld [vmem:[#allocation2 + $0x178] sm:$0xf]  ;;  %v6794_v3 = vld [vmem:[#allocation2 + $0x28] sm:$0xf]  ;;  %v6801_v25 = vld [vmem:[#allocation2 + $0x70] sm:$0xf] }
  0xdc   :  { %v7729_v34 = vcombine.low %v1123_v16, %v7726_v28  ;;  %v719_v60 = vor.u32 %v717_v29, %v716_v56  ;;  %v721_v18 = vrot.slane %v716_v56, 4  ;;  %v1052_v44 = vsel %vm7117_vm8, %v711_v20, %v1051_v40  ;;  %v6787_v20 = vld [vmem:[#allocation2 + $0x4] sm:$0xf]  ;;  %v6800_v49 = vld [vmem:[#allocation2 + $0x2c] ss:$0 sps:$4 sm:$0x11]  }
  0xdd   :  { %v7731_v33 = vld [vmem:[#allocation2 + $0x17c] ss:$0 sps:$4 sm:$0x11]   ;;  %v2054_v42 = vsel %vm1706_vm6, %v2049_v54, %v2053_v30  ;;  %1053 = vst [vmem:[#allocation2 + $0x18c] sm:$0xf] %v1052_v44  ;;  %v6017_v56 = vcombine.low %v1161_v61, %v6787_v20  ;;  %vm4850_vm2 = vcmask 228352  }
  0xde   :  { %10179 = vst [vmem:[#allocation28_spill] sm:$0xff] %v7729_v34  ;;  %2147 = vrot.lane.b32.xlu0 %v2054_v42, %s6840_s9  ;;  %v2056_v10 = vshrl.u32 %v7729_v34, 16  ;;  %v2058_v24 = vshll.u32 %v7729_v34, 16  ;;  %v2063_v53 = vshll.u32 %v7731_v33, 16  ;;  %v1125_v0 = vld [vmem:[#allocation2 + $0x180] sm:$0xf]  ;;  %v720_v26 = vsel %vm7102_vm5, %v712_v59, %v719_v60 }
  0xdf   :  { %1054 = vst.msk [vmem:[#allocation2 + $0x190] sm:$0xf] %vm18_vm0, %v720_v26  ;;  %v1056_v63 = vsel %vm7111_vm7, %v721_v18, %v1055_v39  ;;  %v7745_v50 = vld [vmem:[#allocation2 + $0x184] sm:$0xf]  ;;  %v1163_v44 = vld [vmem:[#allocation2 + $0x18] sm:$0xe] }
  0xe0   :  { %v2060_v40 = vrot.slane %v2058_v24, 1  ;;  %v2065_v58 = vrot.slane %v2063_v53, 1  ;;  %1057 = vst [vmem:[#allocation2 + $0x194] sm:$0x1] %v1056_v63  ;;  %v7748_v30 = vcombine.low %v1125_v0, %v7745_v50  ;;  %v1162_v53 = vld [vmem:[#allocation2 + $0xc] sm:$0xe] }
  0xe1   :  { %v7750_v16 = vld [vmem:[#allocation2 + $0x188] ss:$0 sps:$4 sm:$0x11]   ;;  %v1165_v61 = vld [vmem:[#allocation2 + $0x30] sm:$0xe]  ;;  %vm5000_vm4 = vcmask 293888  }
  0xe2   :  { %10180 = vst [vmem:[#allocation29_spill] sm:$0xff] %v7748_v30  ;;  %v2061_v29 = vor.u32 %v2060_v40, %v2056_v10  ;;  %v2068_v59 = vshrl.u32 %v7748_v30, 16  ;;  %v2070_v54 = vshll.u32 %v7748_v30, 16  ;;  %v2075_v39 = vshll.u32 %v7750_v16, 16  ;;  %v6790_v34 = vld [vmem:[#allocation2 + $0x10] sm:$0xf] }
  0xe3   :  { %v2252_v10 = vrot.slane %v6017_v56, 1  ;;  %v6788_v26 = vld [vmem:[#allocation2 + $0x8] ss:$0 sps:$4 sm:$0x11]   ;;  %v1305_v1 = vld [vmem:[#allocation2 + $0xe4] sm:$0xe] }
  0xe4   :  { %v2066_v60 = vsel %vm1706_vm6, %v2061_v29, %v2065_v58  ;;  %v1127_v18 = vld [vmem:[#allocation2 + $0x18c] sm:$0xf]  ;;  %v2072_v42 = vrot.slane %v2070_v54, 1  ;;  %v2077_v24 = vrot.slane %v2075_v39, 1  ;;  %v2253_v63 = vrot.slane %v6788_v26, 1 }
  0xe5   :  { %2149 = vrot.lane.b32.xlu1 %v2066_v60, %s6840_s9  ;;  %v6789_v58 = vld [vmem:[#allocation2 + $0x1c] sm:$0xf]  ;;  %v6018_v60 = vcombine.low %v1162_v53, %v6790_v34  ;;  %v1338_v22 = vld [vmem:[#allocation2 + $0x78] sm:$0xf] }
  0xe6   :  { %v7757_v0 = vld [vmem:[#allocation2 + $0x190] sm:$0xf]  ;;  %v2073_v40 = vor.u32 %v2072_v42, %v2068_v59  ;;  %v6019_v29 = vcombine.low %v1163_v44, %v6789_v58  ;;  %v2254_v59 = vsel %vm2251_vm9, %v2252_v10, %v2253_v63  ;;  %v6791_v42 = vld [vmem:[#allocation2 + $0x34] sm:$0xf]  ;;  %v1166_v53 = vld [vmem:[#allocation2 + $0x3c] sm:$0xe] }
  0xe7   :  { %v7760_v20 = vcombine.low %v1127_v18, %v7757_v0  ;;  %v7762_v30 = vld [vmem:[#allocation2 + $0x194] ss:$0 sps:$4 sm:$0x11]   ;;  %v1164_v18 = vld [vmem:[#allocation2 + $0x24] sm:$0xe]  ;;  %v6021_v57 = vcombine.low %v1165_v61, %v6791_v42  ;;  %v2255_v13 = vrot.slane %v6018_v60, 1 }
  0xe8   :  { %v2078_v54 = vsel %vm1706_vm6, %v2073_v40, %v2077_v24  ;;  %v2087_v26 = vshll.u32 %v7762_v30, 16  ;;  %v2258_v44 = vrot.slane %v6019_v29, 1  ;;  %v6792_v58 = vld [vmem:[#allocation2 + $0x20] ss:$0 sps:$4 sm:$0x11]   ;;  %v6020_v6 = vcombine.low %v1164_v18, %v6794_v3 }
  0xe9   :  { %10181 = vst [vmem:[#allocation30_spill] sm:$0xff] %v7760_v20  ;;  %v2080_v39 = vshrl.u32 %v7760_v20, 16  ;;  %v2082_v56 = vshll.u32 %v7760_v20, 16  ;;  %2151 = vrot.lane.b32.xlu0 %v2078_v54, %s6840_s9  ;;  %v2259_v34 = vrot.slane %v6792_v58, 1  ;;  %v1167_v24 = vld [vmem:[#allocation2 + $0x48] sm:$0xe] }
  0xea   :  { %v2089_v5 = vrot.slane %v2087_v26, 1  ;;  %v1168_v40 = vld [vmem:[#allocation2 + $0x54] sm:$0xe]  ;;  %v6793_v20 = vld [vmem:[#allocation2 + $0x14] ss:$0 sps:$4 sm:$0x11]  }
  0xeb   :  { %v2084_v36 = vrot.slane %v2082_v56, 1  ;;  %v2256_v19 = vrot.slane %v6793_v20, 1  ;;  %v1169_v54 = vld [vmem:[#allocation2 + $0x60] sm:$0xe]  ;;  %v2264_v10 = vrot.slane %v6021_v57, 1  ;;  %v2260_v58 = vsel %vm2251_vm9, %v2258_v44, %v2259_v34 }
  0xec   :  { %v6795_v63 = vld [vmem:[#allocation2 + $0x38] ss:$0 sps:$4 sm:$0x11]   ;;  %v6796_v56 = vld [vmem:[#allocation2 + $0x40] sm:$0xf]  ;;  %v2261_v57 = vrot.slane %v6020_v6, 1 }
  0xed   :  { %v2085_v41 = vor.u32 %v2084_v36, %v2080_v39  ;;  %2348 = vrot.lane.b32.xlu0 %v2254_v59, %s6841_s10  ;;  %v2265_v61 = vrot.slane %v6795_v63, 1  ;;  %v6022_v29 = vcombine.low %v1166_v53, %v6796_v56  ;;  %v1170_v26 = vld [vmem:[#allocation2 + $0x6c] sm:$0xe]  ;;  %v6798_v39 = vld [vmem:[#allocation2 + $0x58] sm:$0xf]  ;;  %v2257_v59 = vsel %vm2251_vm9, %v2255_v13, %v2256_v19 }
  0xee   :  { %v6797_v36 = vld [vmem:[#allocation2 + $0x4c] sm:$0xf]  ;;  %v6024_v20 = vcombine.low %v1168_v40, %v6798_v39  ;;  %v6799_v3 = vld [vmem:[#allocation2 + $0x64] sm:$0xf]  ;;  %v2262_v63 = vrot.slane %v6800_v49, 1  ;;  %v6026_v53 = vcombine.low %v1170_v26, %v6801_v25 }
  0xef   :  { %v2090_v42 = vsel %vm1706_vm6, %v2085_v41, %v2089_v5  ;;  %v6023_v60 = vcombine.low %v1167_v24, %v6797_v36  ;;  %v6025_v18 = vcombine.low %v1169_v54, %v6799_v3  ;;  %v2266_v41 = vsel %vm2251_vm9, %v2264_v10, %v2265_v61  ;;  %v6802_v44 = vld [vmem:[#allocation2 + $0x44] ss:$0 sps:$4 sm:$0x11]   ;;  %v1171_v24 = vld [vmem:[#allocation2 + $0x78] sm:$0xe] }
  0xf0   :  { %2153 = vrot.lane.b32.xlu1 %v2090_v42, %s6840_s9  ;;  %v2267_v5 = vrot.slane %v6022_v29, 1  ;;  %v2268_v34 = vrot.slane %v6802_v44, 1  ;;  %v6803_v56 = vld [vmem:[#allocation2 + $0x50] ss:$0 sps:$4 sm:$0x11]   ;;  %v2273_v36 = vrot.slane %v6024_v20, 1  ;;  %v2263_v6 = vsel %vm2251_vm9, %v2261_v57, %v2262_v63 }
  0xf1   :  { %2352 = vrot.lane.b32.xlu0 %v2260_v58, %s6841_s10  ;;  %v2270_v40 = vrot.slane %v6023_v60, 1  ;;  %v2271_v42 = vrot.slane %v6803_v56, 1  ;;  %v6804_v54 = vld [vmem:[#allocation2 + $0x5c] ss:$0 sps:$4 sm:$0x11]   ;;  %v2276_v49 = vrot.slane %v6025_v18, 1 }
  0xf2   :  { %v2274_v39 = vrot.slane %v6804_v54, 1  ;;  %v1172_v19 = vld [vmem:[#allocation2 + $0x84] sm:$0xe]  ;;  %v6805_v13 = vld [vmem:[#allocation2 + $0x68] ss:$0 sps:$4 sm:$0x11]   ;;  %v2269_v54 = vsel %vm2251_vm9, %v2267_v5, %v2268_v34 }
  0xf3   :  { %v2277_v25 = vrot.slane %v6805_v13, 1  ;;  %v2279_v26 = vrot.slane %v6026_v53, 1  ;;  %v6806_v10 = vld [vmem:[#allocation2 + $0x74] ss:$0 sps:$4 sm:$0x11]   ;;  %v2272_v18 = vsel %vm2251_vm9, %v2270_v40, %v2271_v42  ;;  %v2322_v42 = vrot.slane %v7588_v46, 1 }
  0xf4   :  { %2350 = vrot.lane.b32.xlu1 %v2257_v59, %s6841_s10  ;;  %v2280_v61 = vrot.slane %v6806_v10, 1  ;;  %v1184_v29 = vld [vmem:[#allocation2 + $0x12c] sm:$0xe]  ;;  %v6807_v58 = vld [vmem:[#allocation2 + $0x7c] sm:$0xf]  ;;  %v2275_v59 = vsel %vm2251_vm9, %v2273_v36, %v2274_v39 }
  0xf5   :  { %2356 = vrot.lane.b32.xlu0 %v2266_v41, %s6841_s10  ;;  %v6027_v60 = vcombine.low %v1171_v24, %v6807_v58  ;;  %v6808_v3 = vld [vmem:[#allocation2 + $0x88] sm:$0xf]  ;;  %v1173_v44 = vld [vmem:[#allocation2 + $0x90] sm:$0xe]  ;;  %v1185_v56 = vld [vmem:[#allocation2 + $0x138] sm:$0xe]  ;;  %v2278_v57 = vsel %vm2251_vm9, %v2276_v49, %v2277_v25 }
  0xf6   :  { %v6028_v20 = vcombine.low %v1172_v19, %v6808_v3  ;;  %v6809_v63 = vld [vmem:[#allocation2 + $0x80] ss:$0 sps:$4 sm:$0x11]   ;;  %v7785_v13 = vld [vmem:[#allocation2 + $0x8c] ss:$0 sps:$4 sm:$0x11]   ;;  %v6040_v19 = vcombine.low %v1184_v29, %v7582_v52  ;;  %v7792_v5 = vsel %vm2251_vm9, %v2279_v26, %v2280_v61  ;;  %v6041_v36 = vcombine.low %v1185_v56, %v7604_v11 }
  0xf7   :  { %v2283_v53 = vrot.slane %v6809_v63, 1  ;;  %v2286_v41 = vrot.slane %v7785_v13, 1  ;;  %v7788_v24 = vld [vmem:[#allocation2 + $0x9c] sm:$0xe]  ;;  %v1186_v10 = vld [vmem:[#allocation2 + $0x144] sm:$0xe] }
  0xf8   :  { %2354 = vrot.lane.b32.xlu1 %v2263_v6, %s6841_s10  ;;  %v6811_v34 = vld [vmem:[#allocation2 + $0x94] sm:$0xf]  ;;  %v1187_v39 = vld [vmem:[#allocation2 + $0x150] sm:$0xe]  ;;  %v2282_v49 = vrot.slane %v6027_v60, 1  ;;  %v2285_v25 = vrot.slane %v6028_v20, 1 }
  0xf9   :  { %v6029_v40 = vcombine.low %v1173_v44, %v6811_v34  ;;  %2360 = vrot.lane.b32.xlu0 %v2272_v18, %s6841_s10  ;;  %v1175_v6 = vld [vmem:[#allocation2 + $0xa8] sm:$0xe]  ;;  %v2321_v58 = vrot.slane %v6040_v19, 1  ;;  %v2325_v3 = vrot.slane %v7614_v17, 1  ;;  %v6813_v63 = vld [vmem:[#allocation2 + $0xa0] sm:$0xf]  ;;  %v6042_v44 = vcombine.low %v1186_v10, %v7632_v51 }
  0xfa   :  { %v6812_v52 = vld [vmem:[#allocation2 + $0x98] ss:$0 sps:$4 sm:$0x11]   ;;  %v6030_v26 = vcombine.low %v7788_v24, %v6813_v63  ;;  %v2324_v61 = vrot.slane %v6041_v36, 1  ;;  %v1188_v46 = vld [vmem:[#allocation2 + $0x15c] sm:$0xe]  ;;  %v6043_v20 = vcombine.low %v1187_v39, %v7657_v45 }
  0xfb   :  { %v2289_v29 = vrot.slane %v6812_v52, 1  ;;  %v1189_v34 = vld [vmem:[#allocation2 + $0x168] sm:$0xe]  ;;  %v7802_v11 = vsel %vm2251_vm9, %v2321_v58, %v2322_v42  ;;  %v2328_v60 = vrot.slane %v7640_v47, 1  ;;  %v2331_v17 = vrot.slane %v7664_v37, 1 }
  0xfc   :  { %2358 = vrot.lane.b32.xlu1 %v2269_v54, %s6841_s10  ;;  %v2288_v56 = vrot.slane %v6029_v40, 1  ;;  %v6814_v18 = vld [vmem:[#allocation2 + $0xac] sm:$0xf]  ;;  %v7808_v24 = vsel %vm2251_vm9, %v2324_v61, %v2325_v3  ;;  %v2327_v51 = vrot.slane %v6042_v44, 1  ;;  %v1190_v10 = vld [vmem:[#allocation2 + $0x174] sm:$0xe]  ;;  %v6044_v42 = vcombine.low %v1188_v46, %v7682_v48  ;;  %v7829_v44 = vpop.permute.xlu0 %2091 }
  0xfd   :  { %v6031_v19 = vcombine.low %v1175_v6, %v6814_v18  ;;  %2364 = vrot.lane.b32.xlu0 %v2278_v57, %s6841_s10  ;;  %v2330_v54 = vrot.slane %v6043_v20, 1  ;;  %v2334_v36 = vrot.slane %v7687_v4, 1  ;;  %v6045_v47 = vcombine.low %v1189_v34, %v7703_v32  ;;  %v1191_v45 = vld [vmem:[#allocation2 + $0x180] sm:$0xe]  ;;  %v1177_v57 = vld [vmem:[#allocation2 + $0xd8] sm:$0xe] }
  0xfe   :  { %v2284_v37 = vsel %vm2251_vm9, %v2282_v49, %v2283_v53  ;;  %v6815_v40 = vld [vmem:[#allocation2 + $0xb0] ss:$0 sps:$4 sm:$0x11]   ;;  %v7816_v6 = vsel %vm2251_vm9, %v2327_v51, %v2328_v60  ;;  %v2337_v58 = vrot.slane %v7712_v2, 1  ;;  %v2333_v48 = vrot.slane %v6044_v42, 1 }
  0xff   :  { %v2295_v39 = vrot.slane %v6815_v40, 1  ;;  %v7821_v3 = vsel %vm2251_vm9, %v2330_v54, %v2331_v17  ;;  %v2336_v4 = vrot.slane %v6045_v47, 1  ;;  %v6046_v32 = vcombine.low %v1190_v10, %v7726_v28  ;;  %v1192_v52 = vld [vmem:[#allocation2 + $0x18c] sm:$0xe]  ;;  %v1179_v18 = vld [vmem:[#allocation2 + $0xf0] sm:$0xe] }
 0x100   :  { %2362 = vrot.lane.b32.xlu1 %v2275_v59, %s6841_s10  ;;  %v2290_v53 = vsel %vm2251_vm9, %v2288_v56, %v2289_v29  ;;  %v2340_v49 = vrot.slane %v7731_v33, 1  ;;  %v6047_v63 = vcombine.low %v1191_v45, %v7745_v50  ;;  %v2343_v61 = vrot.slane %v7750_v16, 1  ;;  %v1176_v59 = vld [vmem:[#allocation2 + $0xb4] sm:$0xe]  ;;  %v6816_v29 = vld [vmem:[#allocation2 + $0xdc] sm:$0xf]  ;;  %v7858_v40 = vpop.permute.xlu0 %2093 }
 0x101   :  { %2368 = vrot.lane.b32.xlu0 %v2284_v37, %s6841_s10  ;;  %v2294_v2 = vrot.slane %v6031_v19, 1  ;;  %v7832_v46 = vsel %vm2251_vm9, %v2333_v48, %v2334_v36  ;;  %v7835_v28 = vsel %vm2251_vm9, %v2336_v4, %v2337_v58  ;;  %v2339_v34 = vrot.slane %v6046_v32, 1  ;;  %v6817_v17 = vld [vmem:[#allocation2 + $0xa4] ss:$0 sps:$4 sm:$0x11]   ;;  %v7856_v37 = vpop.permute.xlu1 %2095 }
 0x102   :  { %v6033_v60 = vcombine.low %v1177_v57, %v6816_v29  ;;  %v2342_v33 = vrot.slane %v6047_v63, 1  ;;  %v6048_v50 = vcombine.low %v1192_v52, %v7757_v0  ;;  %v2346_v16 = vrot.slane %v7762_v30, 1  ;;  %v6818_v10 = vld [vmem:[#allocation2 + $0xb8] sm:$0xf]  ;;  %v1178_v13 = vld [vmem:[#allocation2 + $0xe4] sm:$0xe] }
 0x103   :  { %v2287_v20 = vsel %vm2251_vm9, %v2285_v25, %v2286_v41  ;;  %v2292_v56 = vrot.slane %v6817_v17, 1  ;;  %v7845_v19 = vsel %vm2251_vm9, %v2339_v34, %v2340_v49  ;;  %v2291_v51 = vrot.slane %v6030_v26, 1  ;;  %v6820_v36 = vld [vmem:[#allocation2 + $0xf4] sm:$0xf]  ;;  %v1181_v26 = vld [vmem:[#allocation2 + $0x108] sm:$0xe] }
 0x104   :  { %2366 = vrot.lane.b32.xlu1 %v7792_v5, %s6841_s10  ;;  %v6032_v54 = vcombine.low %v1176_v59, %v6818_v10  ;;  %v7848_v0 = vsel %vm2251_vm9, %v2342_v33, %v2343_v61  ;;  %v2345_v30 = vrot.slane %v6048_v50, 1  ;;  %v6819_v5 = vld [vmem:[#allocation2 + $0xe0] ss:$0 sps:$4 sm:$0x11]   ;;  %v2296_v41 = vsel %vm2251_vm9, %v2294_v2, %v2295_v39  ;;  %v6822_v32 = vld [vmem:[#allocation2 + $0xe8] sm:$0xf] }
 0x105   :  { %2372 = vrot.lane.b32.xlu0 %v2290_v53, %s6841_s10  ;;  %v2301_v42 = vrot.slane %v6819_v5, 1  ;;  %v2300_v25 = vrot.slane %v6033_v60, 1  ;;  %v6035_v47 = vcombine.low %v1179_v18, %v6820_v36  ;;  %v2293_v58 = vsel %vm2251_vm9, %v2291_v51, %v2292_v56  ;;  %v6821_v48 = vld [vmem:[#allocation2 + $0xbc] ss:$0 sps:$4 sm:$0x11]   ;;  %v7867_v17 = vpop.permute.xlu1 %2097  ;;  %v7869_v56 = vpop.permute.xlu0 %2099 }
 0x106   :  { %v7853_v45 = vsel %vm2251_vm9, %v2345_v30, %v2346_v16  ;;  %v2297_v57 = vrot.slane %v6032_v54, 1  ;;  %v2298_v4 = vrot.slane %v6821_v48, 1  ;;  %v6034_v39 = vcombine.low %v1178_v13, %v6822_v32  ;;  %v1180_v52 = vld [vmem:[#allocation2 + $0xfc] sm:$0xe]  ;;  %v1183_v59 = vld [vmem:[#allocation2 + $0x120] sm:$0xe] }
 0x107   :  { %v2302_v53 = vsel %vm2251_vm9, %v2300_v25, %v2301_v42  ;;  %v2306_v49 = vrot.slane %v6035_v47, 1  ;;  %v6823_v63 = vld [vmem:[#allocation2 + $0xf8] ss:$0 sps:$4 sm:$0x11]   ;;  %v6037_v2 = vcombine.low %v1181_v26, %v7501_v14  ;;  %v6825_v50 = vld [vmem:[#allocation2 + $0x100] sm:$0xf]  ;;  %v6039_v10 = vcombine.low %v1183_v59, %v7544_v27 }
 0x108   :  { %2370 = vrot.lane.b32.xlu1 %v2287_v20, %s6841_s10  ;;  %v2307_v61 = vrot.slane %v6823_v63, 1  ;;  %v2299_v34 = vsel %vm2251_vm9, %v2297_v57, %v2298_v4  ;;  %v2303_v29 = vrot.slane %v6034_v39, 1  ;;  %v6824_v60 = vld [vmem:[#allocation2 + $0xec] ss:$0 sps:$4 sm:$0x11]   ;;  %v6036_v16 = vcombine.low %v1180_v52, %v6825_v50  ;;  %10182 = vst [vmem:[#allocation31_spill] sm:$0xff] %v7867_v17 }
 0x109   :  { %2376 = vrot.lane.b32.xlu0 %v2296_v41, %s6841_s10  ;;  %v2304_v33 = vrot.slane %v6824_v60, 1  ;;  %v1182_v20 = vld [vmem:[#allocation2 + $0x114] sm:$0xe]  ;;  %10183 = vst [vmem:[#allocation32_spill] sm:$0xff] %v7869_v56  ;;  %v2312_v14 = vrot.slane %v6037_v2, 1  ;;  %v2313_v51 = vrot.slane %v7508_v15, 1  ;;  %v7881_v15 = vpop.permute.xlu1 %2101  ;;  %v7883_v27 = vpop.permute.xlu0 %2103 }
 0x10a   :  { %v2308_v18 = vsel %vm2251_vm9, %v2306_v49, %v2307_v61  ;;  %v2309_v30 = vrot.slane %v6036_v16, 1  ;;  %v6826_v5 = vld [vmem:[#allocation2 + $0x104] ss:$0 sps:$4 sm:$0x11]   ;;  %v6038_v13 = vcombine.low %v1182_v20, %v7535_v62  ;;  %v2318_v25 = vrot.slane %v6039_v10, 1  ;;  %10184 = vst [vmem:[#allocation33_spill] sm:$0xff] %v7881_v15 }
 0x10b   :  { %v2305_v54 = vsel %vm2251_vm9, %v2303_v29, %v2304_v33  ;;  %v2310_v42 = vrot.slane %v6826_v5, 1  ;;  %v2314_v41 = vsel %vm2251_vm9, %v2312_v14, %v2313_v51  ;;  %v2319_v36 = vrot.slane %v7557_v43, 1  ;;  %10185 = vst [vmem:[#allocation34_spill] sm:$0xff] %v7883_v27  ;;  %v158_v43 = vld [vmem:[%s10103_s0 + $0x78] sm:$0xf] }
 0x10c   :  { %2374 = vrot.lane.b32.xlu1 %v2293_v58, %s6841_s10  ;;  %v2315_v26 = vrot.slane %v6038_v13, 1  ;;  %v2316_v58 = vrot.slane %v7540_v8, 1  ;;  %v159_v48 = vld [vmem:[%s10103_s0 + $0x7c] sm:$0xf]  ;;  %v451_v32 = vshrl.u32 %v158_v43, 16  ;;  %v454_v39 = vshll.u32 %v158_v43, 16 }
 0x10d   :  { %2380 = vrot.lane.b32.xlu0 %v2302_v53, %s6841_s10  ;;  %v2311_v47 = vsel %vm2251_vm9, %v2309_v30, %v2310_v42  ;;  %v2320_v62 = vsel %vm2251_vm9, %v2318_v25, %v2319_v36  ;;  %v7898_v4 = vpop.permute.xlu1 %2105  ;;  %v7900_v8 = vpop.permute.xlu0 %2107  ;;  %v459_v52 = vshrl.u32 %v159_v48, 16  ;;  %v462_v49 = vshll.u32 %v159_v48, 16  ;;  %v946_v61 = vld [vmem:[#allocation2 + $0xc0] sm:$0xf]  ;;  %v1193_v16 = vld [vmem:[#allocation2 + $0xc] sm:$0xf] }
 0x10e   :  { %v2317_v57 = vsel %vm2251_vm9, %v2315_v26, %v2316_v58  ;;  %10186 = vst [vmem:[#allocation35_spill] sm:$0xff] %v7898_v4  ;;  %10187 = vst [vmem:[#allocation36_spill] sm:$0xff] %v7900_v8  ;;  %v453_v53 = vrot.slane %v451_v32, 7  ;;  %v7929_v20 = vld [vmem:[#allocation2 + $0x10] sm:$0xf] }
 0x10f   :  { %v7905_v63 = vrot.slane %v459_v52, 7  ;;  %v1195_v51 = vld [vmem:[#allocation2 + $0x18] sm:$0xf]  ;;  %v7946_v10 = vld [vmem:[#allocation2 + $0x1c] sm:$0xf] }
 0x110   :  { %2378 = vrot.lane.b32.xlu1 %v2299_v34, %s6841_s10  ;;  %v456_v2 = vor.u32 %v454_v39, %v453_v53  ;;  %v457_v59 = vrot.slane %v453_v53, 4  ;;  %v1199_v30 = vld [vmem:[#allocation2 + $0x30] sm:$0xf]  ;;  %v7960_v5 = vld [vmem:[#allocation2 + $0x34] sm:$0xf] }
 0x111   :  { %2384 = vrot.lane.b32.xlu0 %v2308_v18, %s6841_s10  ;;  %v7909_v34 = vpop.permute.xlu1 %2109  ;;  %v7911_v29 = vpop.permute.xlu0 %2111  ;;  %v464_v60 = vor.u32 %v462_v49, %v7905_v63  ;;  %v7938_v18 = vld [vmem:[#allocation2 + $0x28] sm:$0xf]  ;;  %v1205_v25 = vld [vmem:[#allocation2 + $0x54] sm:$0xf]  ;;  %v1206_v36 = vld [vmem:[#allocation2 + $0x58] sm:$0xf] }
 0x112   :  { %10188 = vst [vmem:[#allocation37_spill] sm:$0xff] %v7909_v34  ;;  %10189 = vst [vmem:[#allocation38_spill] sm:$0xff] %v7911_v29  ;;  %v947_v33 = vsel %vm7117_vm8, %v456_v2, %v946_v61  ;;  %v7976_v26 = vld [vmem:[#allocation2 + $0x4c] sm:$0xf]  ;;  %v7980_v58 = vcombine.low %v1205_v25, %v1206_v36  ;;  %v1210_v43 = vld [vmem:[#allocation2 + $0x70] sm:$0xf] }
 0x113   :  { %948 = vst [vmem:[#allocation2 + $0xc0] sm:$0xf] %v947_v33  ;;  %v1207_v39 = vld [vmem:[#allocation2 + $0x60] sm:$0xf]  ;;  %v1208_v52 = vld [vmem:[#allocation2 + $0x64] sm:$0xf] }
 0x114   :  { %2382 = vrot.lane.b32.xlu1 %v2305_v54, %s6841_s10  ;;  %v7953_v54 = vld [vmem:[#allocation2 + $0x40] sm:$0xf]  ;;  %v1213_v49 = vld [vmem:[#allocation2 + $0x84] sm:$0xf]  ;;  %v1214_v61 = vld [vmem:[#allocation2 + $0x88] sm:$0xf]  ;;  %v7997_v2 = vcombine.low %v1207_v39, %v1208_v52 }
 0x115   :  { %2388 = vrot.lane.b32.xlu0 %v2314_v41, %s6841_s10  ;;  %v7927_v50 = vpop.permute.xlu0 %2115  ;;  %v8001_v33 = vcombine.low %v1213_v49, %v1214_v61  ;;  %v1216_v25 = vld [vmem:[#allocation2 + $0x94] sm:$0xf]  ;;  %v1219_v49 = vld [vmem:[#allocation2 + $0xa8] sm:$0xf]  ;;  %v1220_v61 = vld [vmem:[#allocation2 + $0xac] sm:$0xf] }
 0x116   :  { %10191 = vst [vmem:[#allocation40_spill] sm:$0xff] %v7927_v50  ;;  %v1227_v50 = vld [vmem:[#allocation2 + $0xf0] sm:$0xf]  ;;  %v1229_v34 = vld [vmem:[#allocation2 + $0xfc] sm:$0xf] }
 0x117   :  { %10196 = vst [vmem:[#allocation45_spill] sm:$0xff] %v8001_v33  ;;  %v8046_v8 = vld [vmem:[#allocation2 + $0x100] sm:$0xf]  ;;  %v8056_v27 = vld [vmem:[#allocation2 + $0xec] ss:$0 sps:$4 sm:$0x11]  }
 0x118   :  { %2386 = vrot.lane.b32.xlu1 %v2311_v47, %s6841_s10  ;;  %v1203_v47 = vld [vmem:[#allocation2 + $0x48] sm:$0xf]  ;;  %v8050_v4 = vld [vmem:[#allocation2 + $0x20] ss:$0 sps:$4 sm:$0x11]  }
 0x119   :  { %2392 = vrot.lane.b32.xlu0 %v2320_v62, %s6841_s10  ;;  %v7944_v14 = vpop.permute.xlu0 %2119  ;;  %v1209_v62 = vld [vmem:[#allocation2 + $0x6c] sm:$0xf] }
 0x11a   :  { %10193 = vst [vmem:[#allocation42_spill] sm:$0xff] %v7944_v14  ;;  %v7993_v53 = vcombine.low %v1209_v62, %v1210_v43  ;;  %v1222_v62 = vld [vmem:[#allocation2 + $0xb8] sm:$0xf]  ;;  %v1223_v14 = vld [vmem:[#allocation2 + $0xc0] sm:$0xf] }
 0x11b   :  { %v8071_v56 = vld [vmem:[#allocation2 + $0x10c] sm:$0xf] }
 0x11c   :  { %2390 = vrot.lane.b32.xlu1 %v2317_v57, %s6841_s10  ;;  %v7985_v57 = vcombine.low %v1203_v47, %v7976_v26  ;;  %v1221_v47 = vld [vmem:[#allocation2 + $0xb4] sm:$0xf] }
 0x11d   :  { %2396 = vrot.lane.b32.xlu0 %v7808_v24, %s6841_s10  ;;  %v465_v24 = vsel %vm7102_vm5, %v457_v59, %v464_v60  ;;  %v7969_v41 = vpop.permute.xlu0 %2123  ;;  %v1211_v59 = vld [vmem:[#allocation2 + $0x78] sm:$0xf]  ;;  %v1212_v60 = vld [vmem:[#allocation2 + $0x7c] sm:$0xf] }
 0x11e   :  { %949 = vst.msk [vmem:[#allocation2 + $0xc4] sm:$0xf] %vm18_vm0, %v465_v24 }
 0x120   :  { %2394 = vrot.lane.b32.xlu1 %v7802_v11, %s6841_s10  ;;  %v7925_v11 = vpop.permute.xlu1 %2113 }
 0x121   :  { %2400 = vrot.lane.b32.xlu0 %v7821_v3, %s6841_s10  ;;  %10190 = vst [vmem:[#allocation39_spill] sm:$0xff] %v7925_v11  ;;  %v7936_v3 = vcombine.low %v1193_v16, %v7929_v20  ;;  %v7989_v32 = vpop.permute.xlu0 %2127  ;;  %v8037_v11 = vld [vmem:[#allocation2 + $0xf4] sm:$0xf] }
 0x122   :  { %10195 = vst [vmem:[#allocation44_spill] sm:$0xff] %v7989_v32 }
 0x124   :  { %2398 = vrot.lane.b32.xlu1 %v7816_v6, %s6841_s10  ;;  %v1197_v6 = vld [vmem:[#allocation2 + $0x24] sm:$0xf] }
 0x125   :  { %2404 = vrot.lane.b32.xlu0 %v7835_v28, %s6841_s10  ;;  %v7942_v28 = vpop.permute.xlu1 %2117  ;;  %v8005_v16 = vpop.permute.xlu0 %2131 }
 0x126   :  { %10192 = vst [vmem:[#allocation41_spill] sm:$0xff] %v7942_v28  ;;  %10198 = vst [vmem:[#allocation47_spill] sm:$0xff] %v8005_v16  ;;  %v1224_v28 = vld [vmem:[#allocation2 + $0xc4] sm:$0xf] }
 0x128   :  { %2402 = vrot.lane.b32.xlu1 %v7832_v46, %s6841_s10  ;;  %v7951_v46 = vcombine.low %v1197_v6, %v7938_v18  ;;  %v1217_v6 = vld [vmem:[#allocation2 + $0x9c] sm:$0xf] }
 0x129   :  { %2408 = vrot.lane.b32.xlu0 %v7848_v0, %s6841_s10  ;;  %v1201_v0 = vld [vmem:[#allocation2 + $0x3c] sm:$0xf]  ;;  %v7967_v13 = vpop.permute.xlu1 %2121 }
 0x12a   :  { %v7965_v42 = vcombine.low %v1201_v0, %v7953_v54  ;;  %10194 = vst [vmem:[#allocation43_spill] sm:$0xff] %v7967_v13  ;;  %v8009_v0 = vcombine.low %v1211_v59, %v1212_v60  ;;  %v2735_v59 = vshll.u32 %v7936_v3, 16  ;;  %v8026_v60 = vcombine.low %v1221_v47, %v1222_v62  ;;  %v8030_v13 = vld [vmem:[#allocation2 + $0x14] ss:$0 sps:$4 sm:$0x11]  }
 0x12c   :  { %2406 = vrot.lane.b32.xlu1 %v7845_v19, %s6841_s10  ;;  %v7958_v19 = vcombine.low %v1195_v51, %v7946_v10  ;;  %v1218_v51 = vld [vmem:[#allocation2 + $0xa0] sm:$0xf]  ;;  %v8021_v52 = vpop.permute.xlu0 %2135  ;;  %10203 = vst [vmem:[#allocation52_spill] sm:$0xff] %v8026_v60 }
 0x12d   :  { %2572 = vrot.lane.b32.xlu0 %v7936_v3, %s6842_s14  ;;  %v7987_v48 = vpop.permute.xlu1 %2125  ;;  %v8013_v36 = vcombine.low %v1217_v6, %v1218_v51  ;;  %10202 = vst [vmem:[#allocation51_spill] sm:$0xff] %v8021_v52  ;;  %v1225_v6 = vld [vmem:[#allocation2 + $0xe4] sm:$0xf]  ;;  %v8028_v51 = vld [vmem:[#allocation2 + $0xe8] sm:$0xf]  ;;  %v2740_v52 = vshll.u32 %v8030_v13, 16 }
 0x12e   :  { %v6065_v47 = vcombine.low %v1225_v6, %v8028_v51  ;;  %v2745_v16 = vshrl.u32 %v7958_v19, 16 }
 0x12f   :  { %10199 = vst [vmem:[#allocation48_spill] sm:$0xff] %v8013_v36 }
 0x130   :  { %2410 = vrot.lane.b32.xlu1 %v7853_v45, %s6841_s10  ;;  %v7974_v45 = vcombine.low %v1199_v30, %v7960_v5  ;;  %v1215_v30 = vld [vmem:[#allocation2 + $0x90] sm:$0xf]  ;;  %v2927_v6 = vshll.u32 %v6065_v47, 16 }
 0x131   :  { %2576 = vrot.lane.b32.xlu0 %v7951_v46, %s6842_s14  ;;  %v8003_v24 = vpop.permute.xlu1 %2129  ;;  %v8017_v43 = vcombine.low %v1215_v30, %v1216_v25  ;;  %v2747_v30 = vshll.u32 %v7958_v19, 16  ;;  %v8035_v25 = vcombine.low %v1219_v49, %v1220_v61  ;;  %v2733_v49 = vshrl.u32 %v7936_v3, 16 }
 0x132   :  { %10197 = vst [vmem:[#allocation46_spill] sm:$0xff] %v8003_v24  ;;  %v2737_v61 = vrot.slane %v2735_v59, 1  ;;  %v8061_v3 = vcombine.low %v1229_v34, %v8046_v8  ;;  %v2929_v34 = vrot.slane %v2927_v6, 1 }
 0x133   :  { %10200 = vst [vmem:[#allocation49_spill] sm:$0xff] %v8017_v43  ;;  %10204 = vst [vmem:[#allocation53_spill] sm:$0xff] %v8035_v25  ;;  %v2749_v15 = vrot.slane %v2747_v30, 1 }
 0x134   :  { %2574 = vrot.lane.b32.xlu1 %v7958_v19, %s6842_s14  ;;  %v2738_v59 = vor.u32 %v2737_v61, %v2733_v49  ;;  %v2932_v49 = vshll.u32 %v8056_v27, 16 }
 0x135   :  { %2580 = vrot.lane.b32.xlu0 %v7965_v42, %s6842_s14  ;;  %v8019_v39 = vpop.permute.xlu1 %2133  ;;  %v2750_v61 = vor.u32 %v2749_v15, %v2745_v16  ;;  %v1322_v16 = vld [vmem:[#allocation2 + $0x18] sm:$0xf] }
 0x136   :  { %10201 = vst [vmem:[#allocation50_spill] sm:$0xff] %v8019_v39  ;;  %v2742_v39 = vrot.slane %v2740_v52, 1  ;;  %v8074_v52 = vld [vmem:[#allocation2 + $0xf8] ss:$0 sps:$4 sm:$0x11]  }
 0x137   :  { %v2944_v24 = vshll.u32 %v8074_v52, 16 }
 0x138   :  { %2578 = vrot.lane.b32.xlu1 %v7974_v45, %s6842_s14  ;;  %v8044_v29 = vpop.permute.xlu0 %2139  ;;  %v2743_v30 = vsel %vm1706_vm6, %v2738_v59, %v2742_v39  ;;  %v3277_v59 = vrot.slane %v8030_v13, 1  ;;  %v3280_v13 = vrot.slane %v8050_v4, 1 }
 0x139   :  { %2584 = vrot.lane.b32.xlu0 %v7980_v58, %s6842_s14  ;;  %v8042_v62 = vpop.permute.xlu1 %2137  ;;  %10206 = vst [vmem:[#allocation55_spill] sm:$0xff] %v8044_v29  ;;  %v6066_v29 = vcombine.low %v1227_v50, %v8037_v11  ;;  %v2925_v50 = vshrl.u32 %v6065_v47, 16 }
 0x13a   :  { %10205 = vst [vmem:[#allocation54_spill] sm:$0xff] %v8042_v62  ;;  %v1289_v62 = vld [vmem:[#allocation2 + $0xc] sm:$0xe] }
 0x13b   :  { %v6113_v19 = vcombine.low %v1289_v62, %v7929_v20  ;;  %v2930_v6 = vor.u32 %v2929_v34, %v2925_v50  ;;  %v2946_v34 = vrot.slane %v2944_v24, 1 }
 0x13c   :  { %2582 = vrot.lane.b32.xlu1 %v7985_v57, %s6842_s14 }
 0x13d   :  { %2588 = vrot.lane.b32.xlu0 %v7993_v53, %s6842_s14  ;;  %v3276_v62 = vrot.slane %v6113_v19, 1 }
 0x140   :  { %2586 = vrot.lane.b32.xlu1 %v7997_v2, %s6842_s14 }
 0x141   :  { %2592 = vrot.lane.b32.xlu0 %v8001_v33, %s6842_s14  ;;  %v2937_v33 = vshrl.u32 %v6066_v29, 16 }
 0x144   :  { %2590 = vrot.lane.b32.xlu1 %v8009_v0, %s6842_s14 }
 0x145   :  { %2596 = vrot.lane.b32.xlu0 %v8013_v36, %s6842_s14  ;;  %v1231_v36 = vld [vmem:[#allocation2 + $0x108] sm:$0xf] }
 0x148   :  { %2594 = vrot.lane.b32.xlu1 %v8017_v43, %s6842_s14  ;;  %v2939_v43 = vshll.u32 %v6066_v29, 16 }
 0x149   :  { %2600 = vrot.lane.b32.xlu0 %v8026_v60, %s6842_s14  ;;  %v8054_v60 = vcombine.low %v1223_v14, %v1224_v28  ;;  %v2752_v28 = vshll.u32 %v8050_v4, 16  ;;  %v8067_v14 = vpop.permute.xlu1 %2141 }
 0x14a   :  { %10208 = vst [vmem:[#allocation57_spill] sm:$0xff] %v8067_v14  ;;  %v2941_v55 = vrot.slane %v2939_v43, 1  ;;  %v6129_v43 = vcombine.low %v1305_v1, %v8028_v51 }
 0x14b   :  { %10207 = vst [vmem:[#allocation56_spill] sm:$0xff] %v8054_v60  ;;  %v2754_v14 = vrot.slane %v2752_v28, 1 }
 0x14c   :  { %2598 = vrot.lane.b32.xlu1 %v8035_v25, %s6842_s14  ;;  %v8069_v25 = vpop.permute.xlu0 %2143  ;;  %v2942_v50 = vor.u32 %v2941_v55, %v2937_v33  ;;  %v1354_v55 = vld [vmem:[#allocation2 + $0xf0] sm:$0xf] }
 0x14d   :  { %2604 = vrot.lane.b32.xlu0 %v6065_v47, %s6842_s14  ;;  %10209 = vst [vmem:[#allocation58_spill] sm:$0xff] %v8069_v25  ;;  %v8082_v47 = vcombine.low %v1231_v36, %v8071_v56  ;;  %v2934_v25 = vrot.slane %v2932_v49, 1  ;;  %v8086_v20 = vpop.permute.xlu1 %2145  ;;  %v2755_v36 = vsel %vm1706_vm6, %v2750_v61, %v2754_v14  ;;  %v1306_v49 = vld [vmem:[#allocation2 + $0xf0] sm:$0xe]  ;;  %v3325_v61 = vrot.slane %v8056_v27, 1 }
 0x14e   :  { %10210 = vst [vmem:[#allocation59_spill] sm:$0xff] %v8086_v20  ;;  %v6130_v33 = vcombine.low %v1306_v49, %v8037_v11  ;;  %v2947_v24 = vsel %vm1706_vm6, %v2942_v50, %v2946_v34  ;;  %v8128_v34 = vld [vmem:[#allocation2 + $0x2c] ss:$0 sps:$4 sm:$0x11]  }
 0x14f   :  { %v2935_v28 = vsel %vm1706_vm6, %v2930_v6, %v2934_v25  ;;  %v3324_v25 = vrot.slane %v6129_v43, 1  ;;  %v8113_v6 = vld [vmem:[#allocation2 + $0xf4] sm:$0xf] }
 0x150   :  { %2602 = vrot.lane.b32.xlu1 %v8054_v60, %s6842_s14  ;;  %v1290_v60 = vld [vmem:[#allocation2 + $0x18] sm:$0xe]  ;;  %v8088_v15 = vpop.permute.xlu0 %2147  ;;  %v3327_v43 = vrot.slane %v6130_v33, 1  ;;  %v6161_v50 = vcombine.low %v1354_v55, %v8113_v6 }
 0x151   :  { %2608 = vrot.lane.b32.xlu0 %v8061_v3, %s6842_s14  ;;  %10211 = vst [vmem:[#allocation60_spill] sm:$0xff] %v8088_v15  ;;  %v6114_v39 = vcombine.low %v1290_v60, %v7946_v10  ;;  %v1324_v10 = vld [vmem:[#allocation2 + $0x24] sm:$0xf]  ;;  %v3278_v60 = vsel %vm2251_vm9, %v3276_v62, %v3277_v59  ;;  %v1356_v62 = vld [vmem:[#allocation2 + $0xfc] sm:$0xf]  ;;  %v3326_v27 = vsel %vm2251_vm9, %v3324_v25, %v3325_v61 }
 0x152   :  { %v8123_v59 = vld [vmem:[#allocation2 + $0x100] sm:$0xf]  ;;  %v3951_v33 = vshll.u32 %v6161_v50, 16  ;;  %v8142_v61 = vld [vmem:[#allocation2 + $0xf8] ss:$0 sps:$4 sm:$0x11]  }
 0x153   :  { %v3279_v14 = vrot.slane %v6114_v39, 1  ;;  %v6162_v25 = vcombine.low %v1356_v62, %v8123_v59  ;;  %v3776_v62 = vshll.u32 %v8128_v34, 16  ;;  %v3949_v20 = vshrl.u32 %v6161_v50, 16 }
 0x154   :  { %2606 = vrot.lane.b32.xlu1 %v6066_v29, %s6842_s14  ;;  %v8093_v29 = vld [vmem:[#allocation2 + $0x1c] sm:$0xf]  ;;  %v3953_v32 = vrot.slane %v3951_v33, 1  ;;  %v3956_v7 = vshll.u32 %v8142_v61, 16 }
 0x155   :  { %3116 = vrot.lane.b32.xlu0 %v2743_v30, %s6843_s15  ;;  %v6145_v19 = vcombine.low %v1322_v16, %v8093_v29  ;;  %v8103_v30 = vld [vmem:[#allocation2 + $0x28] sm:$0xf]  ;;  %v8117_v16 = vld [vmem:[#allocation2 + $0x20] ss:$0 sps:$4 sm:$0x11]   ;;  %v3281_v39 = vsel %vm2251_vm9, %v3279_v14, %v3280_v13  ;;  %v3961_v33 = vshrl.u32 %v6162_v25, 16 }
 0x156   :  { %v6146_v4 = vcombine.low %v1324_v10, %v8103_v30  ;;  %v6691_v14 = vld [vmem:[%s10104_s1] sm:$0xff]   ;;  %v3958_v23 = vrot.slane %v3956_v7, 1  ;;  %v4301_v7 = vrot.slane %v8117_v16, 1 }
 0x157   :  { %v8106_v1 = vpop.permute.xlu1 %2149  ;;  %6441 = vmatprep.subr.bf16.mxu0 %v6691_v14  ;;  %6511 = vmatprep.subr.bf16.mxu1 %v6691_v14 }
 0x158   :  { %2610 = vrot.lane.b32.xlu1 %v8082_v47, %s6842_s14  ;;  %10212 = vst [vmem:[#allocation61_spill] sm:$0xff] %v8106_v1  ;;  %v3771_v10 = vshll.u32 %v6146_v4, 16  ;;  %6442 = vmatpush3.bf16.msra.mxu0 %v6691_v14  ;;  %v1418_v1 = vld [vmem:[#allocation2 + $0x18] sm:$0xe] }
 0x159   :  { %3118 = vrot.lane.b32.xlu0 %v2755_v36, %s6843_s15  ;;  %v3759_v36 = vshll.u32 %v6145_v19, 16  ;;  %6514 = vmatpush3.bf16.msra.mxu1 %v6691_v14  ;;  %v1419_v14 = vld [vmem:[#allocation2 + $0x24] sm:$0xe] }
 0x15b   :  { %v8108_v51 = vpop.permute.xlu0 %2151  ;;  %v3761_v13 = vrot.slane %v3759_v36, 1  ;;  %v3769_v36 = vshrl.u32 %v6146_v4, 16 }
 0x15c   :  { %3148 = vrot.lane.b32.xlu1 %v2935_v28, %s6843_s15  ;;  %10213 = vst [vmem:[#allocation62_spill] sm:$0xff] %v8108_v51  ;;  %v3328_v28 = vrot.slane %v8074_v52, 1  ;;  %v8151_v51 = vld [vmem:[#allocation2 + $0x104] ss:$0 sps:$4 sm:$0x11]  }
 0x15d   :  { %3372 = vrot.lane.b32.xlu0 %v3278_v60, %s6844_s16  ;;  %v3757_v60 = vshrl.u32 %v6145_v19, 16 }
 0x15e   :  { %v3329_v55 = vsel %vm2251_vm9, %v3327_v43, %v3328_v28 }
 0x15f   :  { %v8121_v11 = vpop.permute.xlu0 %2348  ;;  %v3762_v43 = vor.u32 %v3761_v13, %v3757_v60  ;;  %v6209_v60 = vcombine.low %v1418_v1, %v8093_v29  ;;  %v2759_v29 = vshll.u32 %v7951_v46, 16  ;;  %v1434_v1 = vld [vmem:[#allocation2 + $0xf0] sm:$0xe] }
 0x160   :  { %3150 = vrot.lane.b32.xlu1 %v2947_v24, %s6843_s15  ;;  %v3764_v24 = vshll.u32 %v8117_v16, 16 }
 0x161   :  { %3374 = vrot.lane.b32.xlu0 %v3281_v39, %s6844_s16  ;;  %v2761_v16 = vrot.slane %v2759_v29, 1  ;;  %v4349_v29 = vrot.slane %v8142_v61, 1  ;;  %v8210_v61 = vld [vmem:[#allocation2 + $0x110] ss:$0 sps:$4 sm:$0x11]  }
 0x162   :  { %v8130_v49 = vpop.permute.xlu1 %2153  ;;  %v3766_v28 = vrot.slane %v3764_v24, 1 }
 0x163   :  { %10214 = vst [vmem:[#allocation63_spill] sm:$0xff] %v8130_v49  ;;  %v8138_v52 = vpop.permute.xlu0 %2352  ;;  %v3773_v49 = vrot.slane %v3771_v10, 1 }
 0x164   :  { %3404 = vrot.lane.b32.xlu1 %v3326_v27, %s6844_s16  ;;  %10215 = vst [vmem:[#allocation64_spill] sm:$0xff] %v8138_v52  ;;  %v6693_v27 = vld [vmem:[%s10104_s1 + $0x8] sm:$0xff]   ;;  %v3767_v13 = vsel %vm1706_vm6, %v3762_v43, %v3766_v28  ;;  %v3954_v52 = vor.u32 %v3953_v32, %v3949_v20  ;;  %v2771_v43 = vshll.u32 %v7974_v45, 16 }
 0x165   :  { %3596 = vrot.lane.b32.xlu0 %v6145_v19, %s6845_s19  ;;  %6443 = vmatprep.subr.bf16.mxu0 %v6693_v27  ;;  %v3963_v19 = vshll.u32 %v6162_v25, 16  ;;  %v3774_v24 = vor.u32 %v3773_v49, %v3769_v36  ;;  %v6210_v49 = vcombine.low %v1419_v14, %v8103_v30  ;;  %v8176_v20 = vld [vmem:[#allocation2 + $0x2c] ss:$0 sps:$4 sm:$0x11]   ;;  %v6225_v30 = vcombine.low %v1434_v1, %v8113_v6 }
 0x166   :  { %v8144_v39 = vpop.permute.xlu1 %2350  ;;  %6444 = vmatpush3.bf16.msra.mxu0 %v6693_v27  ;;  %6512 = vmatprep.subr.bf16.mxu1 %v6693_v27  ;;  %v4304_v6 = vrot.slane %v8128_v34, 1  ;;  %v2764_v1 = vshll.u32 %v8176_v20, 16  ;;  %v1291_v34 = vld [vmem:[#allocation2 + $0x24] sm:$0xe] }
 0x167   :  { %v8154_v15 = vpop.permute.xlu0 %2356  ;;  %6515 = vmatpush3.bf16.msra.mxu1 %v6693_v27  ;;  %v3965_v17 = vrot.slane %v3963_v19, 1  ;;  %v2757_v27 = vshrl.u32 %v7951_v46, 16  ;;  %v3959_v19 = vsel %vm1706_vm6, %v3954_v52, %v3958_v23  ;;  %v8188_v46 = vld [vmem:[#allocation2 + $0x38] ss:$0 sps:$4 sm:$0x11]   ;;  %v2951_v23 = vshll.u32 %v8061_v3, 16 }
 0x168   :  { %3406 = vrot.lane.b32.xlu1 %v3329_v55, %s6844_s16  ;;  %10216 = vst [vmem:[#allocation65_spill] sm:$0xff] %v8154_v15  ;;  %v3778_v55 = vrot.slane %v3776_v62, 1  ;;  %v1435_v62 = vld [vmem:[#allocation2 + $0xfc] sm:$0xe] }
 0x169   :  { %3598 = vrot.lane.b32.xlu0 %v6146_v4, %s6845_s19  ;;  %v6696_v4 = vld [vmem:[%s10104_s1 + $0x10] ss:$0 sps:$4 sm:$0x33]   ;;  %s6847_s1 = smov 32  }
 0x16a   :  { %v8157_v10 = vpop.permute.xlu1 %2354  ;;  %v3779_v32 = vsel %vm1706_vm6, %v3774_v24, %v3778_v55  ;;  %6517 = vmatprep.subr.msk.bf16.mxu0 %vm5065_vm10, %v6696_v4  ;;  %6518 = vmatprep.subr.msk.bf16.mxu1 %vm5065_vm10, %v6696_v4 }
 0x16b   :  { %10217 = vst [vmem:[#allocation66_spill] sm:$0xff] %v8157_v10  ;;  %v8163_v15 = vpop.permute.xlu0 %2360  ;;  %v3968_v10 = vshll.u32 %v8151_v51, 16 }
 0x16c   :  { %3628 = vrot.lane.b32.xlu1 %v6161_v50, %s6845_s19  ;;  %10218 = vst [vmem:[#allocation67_spill] sm:$0xff] %v8163_v15  ;;  %v4300_v50 = vrot.slane %v6209_v60, 1  ;;  %v3966_v60 = vor.u32 %v3965_v17, %v3961_v33  ;;  %v6226_v17 = vcombine.low %v1435_v62, %v8123_v59  ;;  %v4348_v33 = vrot.slane %v6225_v30, 1 }
 0x16d   :  { %4140 = vrot.lane.b32.xlu0 %v3767_v13, %s6846_s24  ;;  %v3970_v14 = vrot.slane %v3968_v10, 1  ;;  %v4303_v13 = vrot.slane %v6210_v49, 1  ;;  %v8198_v10 = vld [vmem:[#allocation2 + $0x104] ss:$0 sps:$4 sm:$0x11]   ;;  %v2769_v49 = vshrl.u32 %v7974_v45, 16  ;;  %v2762_v30 = vor.u32 %v2761_v16, %v2757_v27 }
 0x16e   :  { %v8171_v36 = vpop.permute.xlu1 %2358  ;;  %v4302_v55 = vsel %vm2251_vm9, %v4300_v50, %v4301_v7  ;;  %v2773_v50 = vrot.slane %v2771_v43, 1  ;;  %v2963_v7 = vshll.u32 %v8082_v47, 16  ;;  %v4351_v45 = vrot.slane %v6226_v17, 1 }
 0x16f   :  { %10219 = vst [vmem:[#allocation68_spill] sm:$0xff] %v8171_v36  ;;  %v8181_v28 = vpop.permute.xlu0 %2364  ;;  %v4305_v62 = vsel %vm2251_vm9, %v4303_v13, %v4304_v6  ;;  %v4350_v43 = vsel %vm2251_vm9, %v4348_v33, %v4349_v29  ;;  %v6115_v27 = vcombine.low %v1291_v34, %v7938_v18 }
 0x170   :  { %3630 = vrot.lane.b32.xlu1 %v6162_v25, %s6845_s19  ;;  %10220 = vst [vmem:[#allocation69_spill] sm:$0xff] %v8181_v28  ;;  %v5067_v25 = vsel %vm5065_vm10, %v6696_v4, 0  ;;  %v3971_v4 = vsel %vm1706_vm6, %v3966_v60, %v3970_v14  ;;  %v2776_v60 = vshll.u32 %v8188_v46, 16  ;;  %v2953_v14 = vrot.slane %v2951_v23, 1 }
 0x171   :  { %4142 = vrot.lane.b32.xlu0 %v3779_v32, %s6846_s24  ;;  %6446 = vmatpush3.bf16.msra.mxu0 %v5067_v25  ;;  %v2949_v32 = vshrl.u32 %v8061_v3, 16  ;;  %v2774_v13 = vor.u32 %v2773_v50, %v2769_v49  ;;  %v2961_v23 = vshrl.u32 %v8082_v47, 16  ;;  %v2965_v17 = vrot.slane %v2963_v7, 1 }
 0x172   :  { %v8185_v24 = vpop.permute.xlu1 %2362  ;;  %6516 = vmatpush3.bf16.msra.mxu1 %v5067_v25  ;;  %v4352_v25 = vrot.slane %v8151_v51, 1  ;;  %v2778_v6 = vrot.slane %v2776_v60, 1  ;;  %v3282_v34 = vrot.slane %v6115_v27, 1  ;;  %v3283_v50 = vrot.slane %v8176_v20, 1 }
 0x173   :  { %10221 = vst [vmem:[#allocation70_spill] sm:$0xff] %v8185_v24  ;;  %v8196_v52 = vpop.permute.xlu0 %2368 }
 0x174   :  { %4172 = vrot.lane.b32.xlu1 %v3959_v19, %s6846_s24  ;;  %10222 = vst [vmem:[#allocation71_spill] sm:$0xff] %v8196_v52  ;;  %v2766_v19 = vrot.slane %v2764_v1, 1  ;;  %v1292_v1 = vld [vmem:[#allocation2 + $0x30] sm:$0xe]  ;;  %v4353_v51 = vsel %vm2251_vm9, %v4351_v45, %v4352_v25  ;;  %v2779_v47 = vsel %vm1706_vm6, %v2774_v13, %v2778_v6  ;;  %v3284_v20 = vsel %vm2251_vm9, %v3282_v34, %v3283_v50 }
 0x175   :  { %4396 = vrot.lane.b32.xlu0 %v4302_v55, %s6847_s1  ;;  %v2956_v55 = vshll.u32 %v8198_v10, 16  ;;  %v6116_v49 = vcombine.low %v1292_v1, %v7960_v5 }
 0x176   :  { %v8205_v59 = vpop.permute.xlu1 %2366  ;;  %v2767_v16 = vsel %vm1706_vm6, %v2762_v30, %v2766_v19  ;;  %v8238_v30 = vld [vmem:[#allocation2 + $0x34] sm:$0xf] }
 0x177   :  { %10223 = vst [vmem:[#allocation72_spill] sm:$0xff] %v8205_v59  ;;  %v8213_v3 = vpop.permute.xlu0 %2372  ;;  %v2958_v29 = vrot.slane %v2956_v55, 1  ;;  %v3285_v5 = vrot.slane %v6116_v49, 1  ;;  %v3286_v55 = vrot.slane %v8188_v46, 1  ;;  %v8259_v46 = vld [vmem:[#allocation2 + $0x10c] sm:$0xf] }
 0x178   :  { %4174 = vrot.lane.b32.xlu1 %v3971_v4, %s6846_s24  ;;  %10224 = vst [vmem:[#allocation73_spill] sm:$0xff] %v8213_v3  ;;  %v2954_v4 = vor.u32 %v2953_v14, %v2949_v32  ;;  %v1307_v3 = vld [vmem:[#allocation2 + $0xfc] sm:$0xe]  ;;  %v1326_v32 = vld [vmem:[#allocation2 + $0x30] sm:$0xf]  ;;  %v2966_v14 = vor.u32 %v2965_v17, %v2961_v23  ;;  %v3331_v23 = vrot.slane %v8198_v10, 1 }
 0x179   :  { %4398 = vrot.lane.b32.xlu0 %v4305_v62, %s6847_s1  ;;  %v2968_v62 = vshll.u32 %v8210_v61, 16  ;;  %v6131_v19 = vcombine.low %v1307_v3, %v8046_v8  ;;  %v6147_v27 = vcombine.low %v1326_v32, %v8238_v30  ;;  %v1328_v8 = vld [vmem:[#allocation2 + $0x3c] sm:$0xf]  ;;  %v8251_v3 = vld [vmem:[#allocation2 + $0x40] sm:$0xf] }
 0x17a   :  { %v8218_v52 = vpop.permute.xlu1 %2370  ;;  %v2959_v60 = vsel %vm1706_vm6, %v2954_v4, %v2958_v29  ;;  %v1358_v17 = vld [vmem:[#allocation2 + $0x108] sm:$0xf]  ;;  %v8261_v4 = vld [vmem:[#allocation2 + $0x38] ss:$0 sps:$4 sm:$0x11]   ;;  %v3287_v29 = vsel %vm2251_vm9, %v3285_v5, %v3286_v55 }
 0x17b   :  { %10225 = vst [vmem:[#allocation74_spill] sm:$0xff] %v8218_v52  ;;  %v8225_v33 = vpop.permute.xlu0 %2376  ;;  %v2970_v45 = vrot.slane %v2968_v62, 1  ;;  %v3330_v13 = vrot.slane %v6131_v19, 1  ;;  %v6148_v62 = vcombine.low %v1328_v8, %v8251_v3  ;;  %v3783_v34 = vshll.u32 %v6147_v27, 16  ;;  %v1360_v19 = vld [vmem:[#allocation2 + $0x114] sm:$0xf] }
 0x17c   :  { %4428 = vrot.lane.b32.xlu1 %v4350_v43, %s6847_s1  ;;  %10226 = vst [vmem:[#allocation75_spill] sm:$0xff] %v8225_v33  ;;  %v1308_v43 = vld [vmem:[#allocation2 + $0x108] sm:$0xe]  ;;  %v6163_v50 = vcombine.low %v1358_v17, %v8259_v46  ;;  %v8277_v5 = vld [vmem:[#allocation2 + $0x44] ss:$0 sps:$4 sm:$0x11]  }
 0x17d   :  { %3120 = vrot.lane.b32.xlu0 %v2767_v16, %s6843_s15  ;;  %v6132_v6 = vcombine.low %v1308_v43, %v8071_v56  ;;  %v2971_v1 = vsel %vm1706_vm6, %v2966_v14, %v2970_v45  ;;  %v3332_v10 = vsel %vm2251_vm9, %v3330_v13, %v3331_v23  ;;  %v3788_v14 = vshll.u32 %v8261_v4, 16  ;;  %v8284_v13 = vld [vmem:[#allocation2 + $0x110] ss:$0 sps:$4 sm:$0x11]  }
 0x17e   :  { %v8229_v18 = vpop.permute.xlu1 %2374  ;;  %v3781_v45 = vshrl.u32 %v6147_v27, 16  ;;  %v3785_v43 = vrot.slane %v3783_v34, 1 }
 0x17f   :  { %10227 = vst [vmem:[#allocation76_spill] sm:$0xff] %v8229_v18  ;;  %v8236_v7 = vpop.permute.xlu0 %2380  ;;  %v3333_v49 = vrot.slane %v6132_v6, 1  ;;  %v3975_v6 = vshll.u32 %v6163_v50, 16  ;;  %v3790_v23 = vrot.slane %v3788_v14, 1  ;;  %v3980_v18 = vshll.u32 %v8284_v13, 16 }
 0x180   :  { %4430 = vrot.lane.b32.xlu1 %v4353_v51, %s6847_s1  ;;  %v3786_v17 = vor.u32 %v3785_v43, %v3781_v45 }
 0x181   :  { %3122 = vrot.lane.b32.xlu0 %v2779_v47, %s6843_s15  ;;  %v3334_v47 = vrot.slane %v8210_v61, 1  ;;  %v3977_v33 = vrot.slane %v3975_v6, 1  ;;  %v3982_v28 = vrot.slane %v3980_v18, 1 }
 0x182   :  { %v8242_v25 = vpop.permute.xlu1 %2378 }
 0x183   :  { %10228 = vst [vmem:[#allocation77_spill] sm:$0xff] %v8242_v25  ;;  %v8249_v16 = vpop.permute.xlu0 %2384  ;;  %v3335_v61 = vsel %vm2251_vm9, %v3333_v49, %v3334_v47  ;;  %v3800_v25 = vshll.u32 %v8277_v5, 16  ;;  %v8293_v49 = vld [vmem:[#allocation2 + $0x11c] ss:$0 sps:$4 sm:$0x11]  }
 0x184   :  { %3152 = vrot.lane.b32.xlu1 %v2959_v60, %s6843_s15  ;;  %v8274_v60 = vld [vmem:[#allocation2 + $0x118] sm:$0xf]  ;;  %v1420_v47 = vld [vmem:[#allocation2 + $0x30] sm:$0xe]  ;;  %v3992_v24 = vshll.u32 %v8293_v49, 16 }
 0x185   :  { %3376 = vrot.lane.b32.xlu0 %v3284_v20, %s6844_s16  ;;  %v3795_v20 = vshll.u32 %v6148_v62, 16  ;;  %v6164_v8 = vcombine.low %v1360_v19, %v8274_v60  ;;  %v3973_v19 = vshrl.u32 %v6163_v50, 16  ;;  %v3802_v45 = vrot.slane %v3800_v25, 1 }
 0x186   :  { %v8256_v51 = vpop.permute.xlu1 %2382  ;;  %v6211_v43 = vcombine.low %v1420_v47, %v8238_v30  ;;  %v4307_v30 = vrot.slane %v8261_v4, 1  ;;  %v3994_v18 = vrot.slane %v3992_v24, 1 }
 0x187   :  { %v8266_v56 = vpop.permute.xlu0 %2388  ;;  %v3797_v34 = vrot.slane %v3795_v20, 1  ;;  %v3987_v52 = vshll.u32 %v6164_v8, 16  ;;  %v3978_v6 = vor.u32 %v3977_v33, %v3973_v19  ;;  %v1233_v19 = vld [vmem:[#allocation2 + $0x114] sm:$0xf] }
 0x188   :  { %3154 = vrot.lane.b32.xlu1 %v2971_v1, %s6843_s15  ;;  %10229 = vst [vmem:[#allocation78_spill] sm:$0xff] %v8266_v56  ;;  %v1296_v56 = vld [vmem:[#allocation2 + $0x60] sm:$0xe] }
 0x189   :  { %3378 = vrot.lane.b32.xlu0 %v3287_v29, %s6844_s16  ;;  %v3793_v29 = vshrl.u32 %v6148_v62, 16 }
 0x18a   :  { %v8271_v32 = vpop.permute.xlu1 %2386 }
 0x18b   :  { %10230 = vst [vmem:[#allocation79_spill] sm:$0xff] %v8271_v32  ;;  %v8280_v55 = vpop.permute.xlu0 %2392  ;;  %v3798_v14 = vor.u32 %v3797_v34, %v3793_v29  ;;  %v1437_v34 = vld [vmem:[#allocation2 + $0x114] sm:$0xe] }
 0x18c   :  { %3408 = vrot.lane.b32.xlu1 %v3332_v10, %s6844_s16  ;;  %10231 = vst [vmem:[#allocation80_spill] sm:$0xff] %v8280_v55  ;;  %v3989_v55 = vrot.slane %v3987_v52, 1  ;;  %v3983_v52 = vsel %vm1706_vm6, %v3978_v6, %v3982_v28  ;;  %v8324_v28 = vld [vmem:[#allocation2 + $0x44] ss:$0 sps:$4 sm:$0x11]  }
 0x18d   :  { %3600 = vrot.lane.b32.xlu0 %v6147_v27, %s6845_s19  ;;  %v3791_v27 = vsel %vm1706_vm6, %v3786_v17, %v3790_v23  ;;  %v3803_v25 = vsel %vm1706_vm6, %v3798_v14, %v3802_v45  ;;  %v4306_v23 = vrot.slane %v6211_v43, 1  ;;  %v4355_v45 = vrot.slane %v8284_v13, 1 }
 0x18e   :  { %v8286_v1 = vpop.permute.xlu1 %2390 }
 0x18f   :  { %10232 = vst [vmem:[#allocation81_spill] sm:$0xff] %v8286_v1  ;;  %v8291_v10 = vpop.permute.xlu0 %2396  ;;  %v4308_v4 = vsel %vm2251_vm9, %v4306_v23, %v4307_v30  ;;  %v2795_v23 = vshll.u32 %v7985_v57, 16  ;;  %v2788_v30 = vshll.u32 %v8324_v28, 16 }
 0x190   :  { %3410 = vrot.lane.b32.xlu1 %v3335_v61, %s6844_s16  ;;  %10233 = vst [vmem:[#allocation82_spill] sm:$0xff] %v8291_v10  ;;  %v3985_v61 = vshrl.u32 %v6164_v8, 16  ;;  %v1421_v10 = vld [vmem:[#allocation2 + $0x3c] sm:$0xe] }
 0x191   :  { %3602 = vrot.lane.b32.xlu0 %v6148_v62, %s6845_s19  ;;  %v1436_v62 = vld [vmem:[#allocation2 + $0x108] sm:$0xe] }
 0x192   :  { %v8296_v59 = vpop.permute.xlu1 %2394  ;;  %v3990_v33 = vor.u32 %v3989_v55, %v3985_v61  ;;  %v6227_v29 = vcombine.low %v1436_v62, %v8259_v46  ;;  %v6228_v46 = vcombine.low %v1437_v34, %v8274_v60  ;;  %v2781_v61 = vshrl.u32 %v7965_v42, 16  ;;  %v8337_v62 = vld [vmem:[#allocation2 + $0x124] sm:$0xf] }
 0x193   :  { %10234 = vst [vmem:[#allocation83_spill] sm:$0xff] %v8296_v59  ;;  %v8302_v20 = vpop.permute.xlu0 %2400 }
 0x194   :  { %3632 = vrot.lane.b32.xlu1 %v6163_v50, %s6845_s19  ;;  %10235 = vst [vmem:[#allocation84_spill] sm:$0xff] %v8302_v20  ;;  %v6212_v50 = vcombine.low %v1421_v10, %v8251_v3  ;;  %v2783_v3 = vshll.u32 %v7965_v42, 16  ;;  %v4310_v10 = vrot.slane %v8277_v5, 1  ;;  %v3995_v55 = vsel %vm1706_vm6, %v3990_v33, %v3994_v18  ;;  %v1235_v5 = vld [vmem:[#allocation2 + $0x120] sm:$0xf] }
 0x195   :  { %4144 = vrot.lane.b32.xlu0 %v3791_v27, %s6846_s24  ;;  %v8319_v27 = vld [vmem:[#allocation2 + $0x118] sm:$0xf]  ;;  %v4354_v14 = vrot.slane %v6227_v29, 1  ;;  %v4357_v42 = vrot.slane %v6228_v46, 1  ;;  %v6070_v18 = vcombine.low %v1235_v5, %v8337_v62 }
 0x196   :  { %v8305_v59 = vpop.permute.xlu1 %2398  ;;  %v6069_v43 = vcombine.low %v1233_v19, %v8319_v27  ;;  %v8350_v29 = vld [vmem:[#allocation2 + $0x11c] ss:$0 sps:$4 sm:$0x11]   ;;  %v2793_v19 = vshrl.u32 %v7985_v57, 16 }
 0x197   :  { %10236 = vst [vmem:[#allocation85_spill] sm:$0xff] %v8305_v59  ;;  %v8312_v17 = vpop.permute.xlu0 %2404  ;;  %v4356_v33 = vsel %vm2251_vm9, %v4354_v14, %v4355_v45  ;;  %v8361_v45 = vld [vmem:[#allocation2 + $0x128] ss:$0 sps:$4 sm:$0x11]  }
 0x198   :  { %3634 = vrot.lane.b32.xlu1 %v6164_v8, %s6845_s19  ;;  %10237 = vst [vmem:[#allocation86_spill] sm:$0xff] %v8312_v17  ;;  %v4309_v8 = vrot.slane %v6212_v50, 1  ;;  %v8342_v50 = vld [vmem:[#allocation2 + $0x50] ss:$0 sps:$4 sm:$0x11]   ;;  %v2975_v34 = vshll.u32 %v6069_v43, 16 }
 0x199   :  { %4146 = vrot.lane.b32.xlu0 %v3803_v25, %s6846_s24  ;;  %v2785_v25 = vrot.slane %v2783_v3, 1  ;;  %v2800_v46 = vshll.u32 %v8342_v50, 16  ;;  %v2973_v5 = vshrl.u32 %v6069_v43, 16 }
 0x19a   :  { %v8316_v47 = vpop.permute.xlu1 %2402  ;;  %v4311_v60 = vsel %vm2251_vm9, %v4309_v8, %v4310_v10  ;;  %v2790_v10 = vrot.slane %v2788_v30, 1  ;;  %v2977_v57 = vrot.slane %v2975_v34, 1 }
 0x19b   :  { %10238 = vst [vmem:[#allocation87_spill] sm:$0xff] %v8316_v47  ;;  %v8327_v24 = vpop.permute.xlu0 %2408  ;;  %v2786_v8 = vor.u32 %v2785_v25, %v2781_v61  ;;  %v2802_v30 = vrot.slane %v2800_v46, 1  ;;  %v2992_v47 = vshll.u32 %v8361_v45, 16 }
 0x19c   :  { %4176 = vrot.lane.b32.xlu1 %v3983_v52, %s6846_s24  ;;  %10239 = vst [vmem:[#allocation88_spill] sm:$0xff] %v8327_v24  ;;  %v4358_v52 = vrot.slane %v8293_v49, 1  ;;  %v2987_v24 = vshll.u32 %v6070_v18, 16  ;;  %v2978_v34 = vor.u32 %v2977_v57, %v2973_v5 }
 0x19d   :  { %4400 = vrot.lane.b32.xlu0 %v4308_v4, %s6847_s1  ;;  %v2797_v4 = vrot.slane %v2795_v23, 1  ;;  %v2791_v25 = vsel %vm1706_vm6, %v2786_v8, %v2790_v10  ;;  %v3289_v8 = vrot.slane %v8324_v28, 1 }
 0x19e   :  { %v8334_v6 = vpop.permute.xlu1 %2406  ;;  %v4359_v14 = vsel %vm2251_vm9, %v4357_v42, %v4358_v52  ;;  %v2985_v52 = vshrl.u32 %v6070_v18, 16  ;;  %v2989_v17 = vrot.slane %v2987_v24, 1  ;;  %v8382_v24 = vld [vmem:[#allocation2 + $0x4c] sm:$0xf] }
 0x19f   :  { %10240 = vst [vmem:[#allocation89_spill] sm:$0xff] %v8334_v6  ;;  %v8345_v13 = vpop.permute.xlu0 %2572  ;;  %v2798_v23 = vor.u32 %v2797_v4, %v2793_v19 }
 0x1a0   :  { %4178 = vrot.lane.b32.xlu1 %v3995_v55, %s6846_s24  ;;  %v1293_v55 = vld [vmem:[#allocation2 + $0x3c] sm:$0xe] }
 0x1a1   :  { %4402 = vrot.lane.b32.xlu0 %v4311_v60, %s6847_s1  ;;  %v6117_v61 = vcombine.low %v1293_v55, %v7953_v54  ;;  %v1309_v54 = vld [vmem:[#allocation2 + $0x114] sm:$0xe]  ;;  %v2803_v4 = vsel %vm1706_vm6, %v2798_v23, %v2802_v30  ;;  %v2990_v55 = vor.u32 %v2989_v17, %v2985_v52  ;;  %v3337_v30 = vrot.slane %v8350_v29, 1 }
 0x1a2   :  { %v8353_v3 = vpop.permute.xlu1 %2410  ;;  %v6133_v5 = vcombine.low %v1309_v54, %v8319_v27  ;;  %v1332_v17 = vld [vmem:[#allocation2 + $0x54] sm:$0xf] }
 0x1a3   :  { %10241 = vst [vmem:[#allocation90_spill] sm:$0xff] %v8353_v3  ;;  %v8358_v49 = vpop.permute.xlu0 %2576  ;;  %v2980_v3 = vshll.u32 %v8350_v29, 16 }
 0x1a4   :  { %4432 = vrot.lane.b32.xlu1 %v4356_v33, %s6847_s1  ;;  %v1294_v33 = vld [vmem:[#allocation2 + $0x48] sm:$0xe] }
 0x1a5   :  { %2612 = vrot.lane.b32.xlu0 %v6069_v43, %s6842_s14  ;;  %v2982_v6 = vrot.slane %v2980_v3, 1  ;;  %v3288_v43 = vrot.slane %v6117_v61, 1  ;;  %v6118_v19 = vcombine.low %v1294_v33, %v7976_v26  ;;  %v1330_v3 = vld [vmem:[#allocation2 + $0x48] sm:$0xf]  ;;  %v1310_v26 = vld [vmem:[#allocation2 + $0x120] sm:$0xe] }
 0x1a6   :  { %v8364_v60 = vpop.permute.xlu1 %2574  ;;  %v6134_v33 = vcombine.low %v1310_v26, %v8337_v62  ;;  %v8420_v26 = vld [vmem:[#allocation2 + $0x5c] ss:$0 sps:$4 sm:$0x11]  }
 0x1a7   :  { %v8370_v42 = vpop.permute.xlu0 %2580  ;;  %v2983_v46 = vsel %vm1706_vm6, %v2978_v34, %v2982_v6  ;;  %v3291_v61 = vrot.slane %v6118_v19, 1  ;;  %v3290_v28 = vsel %vm2251_vm9, %v3288_v43, %v3289_v8  ;;  %v3336_v6 = vrot.slane %v6133_v5, 1  ;;  %v8403_v34 = vld [vmem:[#allocation2 + $0x124] sm:$0xf]  ;;  %v8418_v5 = vld [vmem:[#allocation2 + $0x130] sm:$0xf] }
 0x1a8   :  { %4434 = vrot.lane.b32.xlu1 %v4359_v14, %s6847_s1  ;;  %10242 = vst [vmem:[#allocation91_spill] sm:$0xff] %v8370_v42  ;;  %v2994_v14 = vrot.slane %v2992_v47, 1  ;;  %v8395_v47 = vld [vmem:[#allocation2 + $0x58] sm:$0xf]  ;;  %v3339_v29 = vrot.slane %v6134_v33, 1 }
 0x1a9   :  { %3124 = vrot.lane.b32.xlu0 %v2791_v25, %s6843_s15  ;;  %v6149_v25 = vcombine.low %v1330_v3, %v8382_v24  ;;  %v6150_v43 = vcombine.low %v1332_v17, %v8395_v47  ;;  %v8407_v19 = vld [vmem:[#allocation2 + $0x50] ss:$0 sps:$4 sm:$0x11]   ;;  %v3338_v62 = vsel %vm2251_vm9, %v3336_v6, %v3337_v30  ;;  %v3340_v3 = vrot.slane %v8361_v45, 1 }
 0x1aa   :  { %v8373_v20 = vpop.permute.xlu1 %2578  ;;  %v2995_v27 = vsel %vm1706_vm6, %v2990_v55, %v2994_v14  ;;  %v1364_v55 = vld [vmem:[#allocation2 + $0x12c] sm:$0xf]  ;;  %v8426_v45 = vld [vmem:[#allocation2 + $0x128] ss:$0 sps:$4 sm:$0x11]  }
 0x1ab   :  { %v8380_v10 = vpop.permute.xlu0 %2584  ;;  %v3819_v17 = vshll.u32 %v6150_v43, 16  ;;  %v3341_v6 = vsel %vm2251_vm9, %v3339_v29, %v3340_v3  ;;  %v6166_v30 = vcombine.low %v1364_v55, %v8418_v5  ;;  %v1422_v29 = vld [vmem:[#allocation2 + $0x48] sm:$0xe] }
 0x1ac   :  { %2614 = vrot.lane.b32.xlu1 %v6070_v18, %s6842_s14  ;;  %10243 = vst [vmem:[#allocation92_spill] sm:$0xff] %v8380_v10  ;;  %v3292_v18 = vrot.slane %v8342_v50, 1  ;;  %v1362_v50 = vld [vmem:[#allocation2 + $0x120] sm:$0xf] }
 0x1ad   :  { %3126 = vrot.lane.b32.xlu0 %v2803_v4, %s6843_s15  ;;  %v3807_v4 = vshll.u32 %v6149_v25, 16  ;;  %v3821_v59 = vrot.slane %v3819_v17, 1  ;;  %v4009_v10 = vshrl.u32 %v6166_v30, 16 }
 0x1ae   :  { %v8386_v57 = vpop.permute.xlu1 %2582  ;;  %v3293_v54 = vsel %vm2251_vm9, %v3291_v61, %v3292_v18  ;;  %v3805_v61 = vshrl.u32 %v6149_v25, 16  ;;  %v3812_v18 = vshll.u32 %v8407_v19, 16 }
 0x1af   :  { %10244 = vst [vmem:[#allocation93_spill] sm:$0xff] %v8386_v57  ;;  %v8393_v23 = vpop.permute.xlu0 %2588 }
 0x1b0   :  { %3156 = vrot.lane.b32.xlu1 %v2983_v46, %s6843_s15  ;;  %10245 = vst [vmem:[#allocation94_spill] sm:$0xff] %v8393_v23  ;;  %v6165_v46 = vcombine.low %v1362_v50, %v8403_v34  ;;  %v8438_v23 = vld [vmem:[#allocation2 + $0x134] ss:$0 sps:$4 sm:$0x11]  }
 0x1b1   :  { %3380 = vrot.lane.b32.xlu0 %v3290_v28, %s6844_s16  ;;  %v3809_v28 = vrot.slane %v3807_v4, 1  ;;  %v4016_v1 = vshll.u32 %v8438_v23, 16 }
 0x1b2   :  { %v8400_v52 = vpop.permute.xlu1 %2586  ;;  %v3999_v33 = vshll.u32 %v6165_v46, 16  ;;  %v3997_v3 = vshrl.u32 %v6165_v46, 16 }
 0x1b3   :  { %10246 = vst [vmem:[#allocation95_spill] sm:$0xff] %v8400_v52  ;;  %v8410_v8 = vpop.permute.xlu0 %2592  ;;  %v3810_v4 = vor.u32 %v3809_v28, %v3805_v61 }
 0x1b4   :  { %3158 = vrot.lane.b32.xlu1 %v2995_v27, %s6843_s15  ;;  %10247 = vst [vmem:[#allocation96_spill] sm:$0xff] %v8410_v8  ;;  %v3814_v8 = vrot.slane %v3812_v18, 1  ;;  %v4001_v55 = vrot.slane %v3999_v33, 1  ;;  %v6213_v18 = vcombine.low %v1422_v29, %v8382_v24  ;;  %v4313_v24 = vrot.slane %v8407_v19, 1  ;;  %v1439_v29 = vld [vmem:[#allocation2 + $0x12c] sm:$0xe] }
 0x1b5   :  { %3382 = vrot.lane.b32.xlu0 %v3293_v54, %s6844_s16  ;;  %v3817_v54 = vshrl.u32 %v6150_v43, 16 }
 0x1b6   :  { %v8415_v14 = vpop.permute.xlu1 %2590  ;;  %v4002_v33 = vor.u32 %v4001_v55, %v3997_v3  ;;  %v1237_v3 = vld [vmem:[#allocation2 + $0x12c] sm:$0xf]  ;;  %v8463_v55 = vld [vmem:[#allocation2 + $0x130] sm:$0xf] }
 0x1b7   :  { %10248 = vst [vmem:[#allocation97_spill] sm:$0xff] %v8415_v14  ;;  %v8424_v27 = vpop.permute.xlu0 %2596  ;;  %v3824_v14 = vshll.u32 %v8420_v26, 16  ;;  %v3822_v61 = vor.u32 %v3821_v59, %v3817_v54  ;;  %v4018_v54 = vrot.slane %v4016_v1, 1 }
 0x1b8   :  { %3412 = vrot.lane.b32.xlu1 %v3338_v62, %s6844_s16  ;;  %10249 = vst [vmem:[#allocation98_spill] sm:$0xff] %v8424_v27  ;;  %v4004_v27 = vshll.u32 %v8426_v45, 16 }
 0x1b9   :  { %3604 = vrot.lane.b32.xlu0 %v6149_v25, %s6845_s19  ;;  %v3815_v25 = vsel %vm1706_vm6, %v3810_v4, %v3814_v8  ;;  %v3826_v28 = vrot.slane %v3824_v14, 1 }
 0x1ba   :  { %v8430_v50 = vpop.permute.xlu1 %2594 }
 0x1bb   :  { %10250 = vst [vmem:[#allocation99_spill] sm:$0xff] %v8430_v50  ;;  %v8435_v62 = vpop.permute.xlu0 %2600  ;;  %v4011_v50 = vshll.u32 %v6166_v30, 16  ;;  %v3827_v59 = vsel %vm1706_vm6, %v3822_v61, %v3826_v28  ;;  %v6071_v61 = vcombine.low %v1237_v3, %v8463_v55  ;;  %v2805_v28 = vshrl.u32 %v7980_v58, 16 }
 0x1bc   :  { %3414 = vrot.lane.b32.xlu1 %v3341_v6, %s6844_s16  ;;  %10251 = vst [vmem:[#allocation100_spill] sm:$0xff] %v8435_v62  ;;  %v4006_v6 = vrot.slane %v4004_v27, 1  ;;  %v1423_v62 = vld [vmem:[#allocation2 + $0x54] sm:$0xe] }
 0x1bd   :  { %3606 = vrot.lane.b32.xlu0 %v6150_v43, %s6845_s19  ;;  %v4013_v15 = vrot.slane %v4011_v50, 1  ;;  %v4312_v43 = vrot.slane %v6213_v18, 1  ;;  %v6214_v8 = vcombine.low %v1423_v62, %v8395_v47  ;;  %v2807_v47 = vshll.u32 %v7980_v58, 16 }
 0x1be   :  { %v8440_v52 = vpop.permute.xlu1 %2598  ;;  %v4007_v27 = vsel %vm1706_vm6, %v4002_v33, %v4006_v6  ;;  %v4316_v62 = vrot.slane %v8420_v26, 1  ;;  %v1239_v26 = vld [vmem:[#allocation2 + $0x138] sm:$0xf]  ;;  %v8481_v6 = vld [vmem:[#allocation2 + $0x13c] sm:$0xf] }
 0x1bf   :  { %10252 = vst [vmem:[#allocation101_spill] sm:$0xff] %v8440_v52  ;;  %v8446_v17 = vpop.permute.xlu0 %2604  ;;  %v1438_v52 = vld [vmem:[#allocation2 + $0x120] sm:$0xe]  ;;  %v4014_v50 = vor.u32 %v4013_v15, %v4009_v10  ;;  %v4314_v19 = vsel %vm2251_vm9, %v4312_v43, %v4313_v24  ;;  %v4361_v10 = vrot.slane %v8426_v45, 1  ;;  %v2809_v33 = vrot.slane %v2807_v47, 1 }
 0x1c0   :  { %3636 = vrot.lane.b32.xlu1 %v6165_v46, %s6845_s19  ;;  %v6229_v14 = vcombine.low %v1438_v52, %v8403_v34  ;;  %v8468_v52 = vld [vmem:[#allocation2 + $0x5c] ss:$0 sps:$4 sm:$0x11]   ;;  %v8486_v24 = vld [vmem:[#allocation2 + $0x68] ss:$0 sps:$4 sm:$0x11]  }
 0x1c1   :  { %4148 = vrot.lane.b32.xlu0 %v3815_v25, %s6846_s24  ;;  %v4019_v34 = vsel %vm1706_vm6, %v4014_v50, %v4018_v54  ;;  %v6230_v25 = vcombine.low %v1439_v29, %v8418_v5  ;;  %v2812_v43 = vshll.u32 %v8468_v52, 16  ;;  %v8494_v50 = vld [vmem:[#allocation2 + $0x134] ss:$0 sps:$4 sm:$0x11]   ;;  %v2999_v54 = vshll.u32 %v6071_v61, 16 }
 0x1c2   :  { %v8449_v57 = vpop.permute.xlu1 %2602  ;;  %v4360_v1 = vrot.slane %v6229_v14, 1  ;;  %v4364_v14 = vrot.slane %v8438_v23, 1  ;;  %v2817_v29 = vshrl.u32 %v7997_v2, 16 }
 0x1c3   :  { %10253 = vst [vmem:[#allocation102_spill] sm:$0xff] %v8449_v57  ;;  %v8456_v46 = vpop.permute.xlu0 %2608 }
 0x1c4   :  { %3638 = vrot.lane.b32.xlu1 %v6166_v30, %s6845_s19  ;;  %v4315_v30 = vrot.slane %v6214_v8, 1  ;;  %v4362_v58 = vsel %vm2251_vm9, %v4360_v1, %v4361_v10  ;;  %v4363_v8 = vrot.slane %v6230_v25, 1  ;;  %v1295_v1 = vld [vmem:[#allocation2 + $0x54] sm:$0xe]  ;;  %v2997_v10 = vshrl.u32 %v6071_v61, 16 }
 0x1c5   :  { %4150 = vrot.lane.b32.xlu0 %v3827_v59, %s6846_s24  ;;  %v2819_v59 = vshll.u32 %v7997_v2, 16  ;;  %v3001_v25 = vrot.slane %v2999_v54, 1  ;;  %v3004_v2 = vshll.u32 %v8494_v50, 16 }
 0x1c6   :  { %v8460_v4 = vpop.permute.xlu1 %2606  ;;  %v4317_v45 = vsel %vm2251_vm9, %v4315_v30, %v4316_v62  ;;  %v2814_v30 = vrot.slane %v2812_v43, 1  ;;  %v2824_v62 = vshll.u32 %v8486_v24, 16 }
 0x1c7   :  { %v8471_v15 = vpop.permute.xlu0 %3116  ;;  %v2821_v47 = vrot.slane %v2819_v59, 1  ;;  %v3002_v54 = vor.u32 %v3001_v25, %v2997_v10  ;;  %v3006_v36 = vrot.slane %v3004_v2, 1  ;;  %v1334_v10 = vld [vmem:[#allocation2 + $0x60] sm:$0xf] }
 0x1c8   :  { %4180 = vrot.lane.b32.xlu1 %v4007_v27, %s6846_s24  ;;  %v6072_v27 = vcombine.low %v1239_v26, %v8481_v6  ;;  %v8506_v26 = vld [vmem:[#allocation2 + $0x140] ss:$0 sps:$4 sm:$0x11]  }
 0x1c9   :  { %4404 = vrot.lane.b32.xlu0 %v4314_v19, %s6847_s1  ;;  %v2810_v19 = vor.u32 %v2809_v33, %v2805_v28  ;;  %v6827_v28 = vld [vmem:[#allocation2 + $0x58] sm:$0xf]  ;;  %v2822_v43 = vor.u32 %v2821_v47, %v2817_v29 }
 0x1ca   :  { %v8478_v18 = vpop.permute.xlu1 %2610  ;;  %v3011_v57 = vshll.u32 %v6072_v27, 16  ;;  %v6119_v33 = vcombine.low %v1295_v1, %v6827_v28 }
 0x1cb   :  { %10254 = vst [vmem:[#allocation103_spill] sm:$0xff] %v8478_v18  ;;  %v8489_v5 = vpop.permute.xlu0 %3118  ;;  %v2815_v59 = vsel %vm1706_vm6, %v2810_v19, %v2814_v30  ;;  %v3016_v18 = vshll.u32 %v8506_v26, 16  ;;  %v6828_v19 = vld [vmem:[#allocation2 + $0x64] sm:$0xf]  ;;  %v3295_v30 = vrot.slane %v8468_v52, 1 }
 0x1cc   :  { %4182 = vrot.lane.b32.xlu1 %v4019_v34, %s6846_s24  ;;  %v4365_v34 = vsel %vm2251_vm9, %v4363_v8, %v4364_v14  ;;  %v3009_v14 = vshrl.u32 %v6072_v27, 16  ;;  %v3013_v42 = vrot.slane %v3011_v57, 1  ;;  %v3294_v1 = vrot.slane %v6119_v33, 1  ;;  %v8524_v57 = vld [vmem:[#allocation2 + $0x64] sm:$0xf] }
 0x1cd   :  { %4406 = vrot.lane.b32.xlu0 %v4317_v45, %s6847_s1  ;;  %v6120_v29 = vcombine.low %v1296_v56, %v6828_v19  ;;  %v3018_v2 = vrot.slane %v3016_v18, 1  ;;  %v1312_v56 = vld [vmem:[#allocation2 + $0x138] sm:$0xe]  ;;  %v8541_v18 = vld [vmem:[#allocation2 + $0x13c] sm:$0xf]  ;;  %v4464_v19 = vsel %vm4460_vm11, %v7169_v38, %v7858_v40  ;;  %v4494_v38 = vsel %vm4460_vm11, %v7370_v9, %v7969_v41 }
 0x1ce   :  { %v8497_v3 = vpop.permute.xlu1 %3148  ;;  %v3014_v25 = vor.u32 %v3013_v42, %v3009_v14  ;;  %v8569_v40 = vld [vmem:[#allocation2 + $0x140] ss:$0 sps:$4 sm:$0x11]   ;;  %v4529_v41 = vsel %vm4525_vm12, %v4464_v19, %v8144_v39 }
 0x1cf   :  { %v8502_v23 = vpop.permute.xlu0 %3372  ;;  %v3297_v52 = vrot.slane %v6120_v29, 1 }
 0x1d0   :  { %4436 = vrot.lane.b32.xlu1 %v4362_v58, %s6847_s1  ;;  %v2826_v58 = vrot.slane %v2824_v62, 1  ;;  %v3019_v14 = vsel %vm1706_vm6, %v3014_v25, %v3018_v2  ;;  %v3346_v25 = vrot.slane %v8506_v26, 1  ;;  %v1368_v2 = vld [vmem:[#allocation2 + $0x144] sm:$0xf] }
 0x1d1   :  { %2616 = vrot.lane.b32.xlu0 %v6071_v61, %s6842_s14  ;;  %v1311_v61 = vld [vmem:[#allocation2 + $0x12c] sm:$0xe] }
 0x1d2   :  { %v8508_v45 = vpop.permute.xlu1 %3150  ;;  %v2827_v47 = vsel %vm1706_vm6, %v2822_v43, %v2826_v58  ;;  %v6135_v28 = vcombine.low %v1311_v61, %v8463_v55  ;;  %v8534_v43 = vcombine.low %v1334_v10, %v8524_v57  ;;  %v1336_v58 = vld [vmem:[#allocation2 + $0x6c] sm:$0xf]  ;;  %v1366_v55 = vld [vmem:[#allocation2 + $0x138] sm:$0xf]  ;;  %v3343_v61 = vrot.slane %v8494_v50, 1 }
 0x1d3   :  { %v8513_v8 = vpop.permute.xlu0 %3374 }
 0x1d4   :  { %4438 = vrot.lane.b32.xlu1 %v4365_v34, %s6847_s1  ;;  %v3007_v34 = vsel %vm1706_vm6, %v3002_v54, %v3006_v36  ;;  %v8536_v36 = vld [vmem:[#allocation2 + $0x70] sm:$0xf]  ;;  %v3342_v54 = vrot.slane %v6135_v28, 1  ;;  %v8576_v28 = vsel %vm4460_vm11, %v7449_v35, %v7987_v48 }
 0x1d5   :  { %3128 = vrot.lane.b32.xlu0 %v2815_v59, %s6843_s15  ;;  %v3298_v59 = vrot.slane %v8486_v24, 1  ;;  %v6136_v24 = vcombine.low %v1312_v56, %v8481_v6  ;;  %v8560_v6 = vcombine.low %v1366_v55, %v8541_v18  ;;  %v4028_v55 = vshll.u32 %v8569_v40, 16 }
 0x1d6   :  { %v8516_v32 = vpop.permute.xlu1 %3404  ;;  %v3344_v10 = vsel %vm2251_vm9, %v3342_v54, %v3343_v61 }
 0x1d7   :  { %v8522_v62 = vpop.permute.xlu0 %3596  ;;  %v3299_v50 = vsel %vm2251_vm9, %v3297_v52, %v3298_v59  ;;  %v8585_v52 = vld [vmem:[#allocation2 + $0x148] sm:$0xf]  ;;  %v3829_v59 = vshrl.u32 %v8534_v43, 16 }
 0x1d8   :  { %2618 = vrot.lane.b32.xlu1 %v6072_v27, %s6842_s14  ;;  %v3296_v27 = vsel %vm2251_vm9, %v3294_v1, %v3295_v30  ;;  %v4462_v1 = vsel %vm4460_vm11, %v7126_v31, %v7829_v44  ;;  %v8562_v30 = vld [vmem:[#allocation2 + $0x68] ss:$0 sps:$4 sm:$0x11]   ;;  %v3831_v31 = vshll.u32 %v8534_v43, 16  ;;  %v8601_v61 = vcombine.low %v1368_v2, %v8585_v52 }
 0x1d9   :  { %3130 = vrot.lane.b32.xlu0 %v2827_v47, %s6843_s15  ;;  %v8556_v47 = vcombine.low %v1336_v58, %v8536_v36  ;;  %v4527_v9 = vsel %vm4525_vm12, %v4462_v1, %v8121_v11  ;;  %v3836_v48 = vshll.u32 %v8562_v30, 16  ;;  %v4023_v11 = vshll.u32 %v8560_v6, 16  ;;  %v8612_v2 = vld [vmem:[#allocation2 + $0x14c] ss:$0 sps:$4 sm:$0x11]  }
 0x1da   :  { %v8528_v33 = vpop.permute.xlu1 %3406  ;;  %v3833_v35 = vrot.slane %v3831_v31, 1  ;;  %v4592_v39 = vsel %vm4590_vm13, %v4527_v9, %v8345_v13 }
 0x1db   :  { %v8539_v42 = vpop.permute.xlu0 %3598  ;;  %v3843_v26 = vshll.u32 %v8556_v47, 16  ;;  %v3841_v19 = vshrl.u32 %v8556_v47, 16 }
 0x1dc   :  { %3160 = vrot.lane.b32.xlu1 %v3007_v34, %s6843_s15  ;;  %v3345_v34 = vrot.slane %v6136_v24, 1  ;;  %v4021_v24 = vshrl.u32 %v8560_v6, 16 }
 0x1dd   :  { %3384 = vrot.lane.b32.xlu0 %v3296_v27, %s6844_s16  ;;  %v8587_v27 = vld [vmem:[#allocation2 + $0x74] ss:$0 sps:$4 sm:$0x11]  }
 0x1de   :  { %v8552_v29 = vpop.permute.xlu1 %3628  ;;  %v3347_v54 = vsel %vm2251_vm9, %v3345_v34, %v3346_v25  ;;  %v3848_v31 = vshll.u32 %v8587_v27, 16  ;;  %v3838_v34 = vrot.slane %v3836_v48, 1  ;;  %v4025_v25 = vrot.slane %v4023_v11, 1 }
 0x1df   :  { %v4141_v44 = vpop.permute.xlu0 %4140  ;;  %v4035_v48 = vshll.u32 %v8601_v61, 16 }
 0x1e0   :  { %3162 = vrot.lane.b32.xlu1 %v3019_v14, %s6843_s15  ;;  %v4657_v14 = vsel %vm4655_vm14, %v4592_v39, %v8471_v15  ;;  %v4030_v39 = vrot.slane %v4028_v55, 1 }
 0x1e1   :  { %3386 = vrot.lane.b32.xlu0 %v3299_v50, %s6844_s16  ;;  %v4722_v13 = vsel %vm4720_vm15, %v4657_v14, %v8502_v23  ;;  %v3845_v50 = vrot.slane %v3843_v26, 1  ;;  %v4594_v23 = vsel %vm4590_vm13, %v4529_v41, %v8364_v60  ;;  %v4033_v26 = vshrl.u32 %v8601_v61, 16  ;;  %v1424_v14 = vld [vmem:[#allocation2 + $0x60] sm:$0xe] }
 0x1e2   :  { %v8582_v56 = vpop.permute.xlu1 %3630  ;;  %v4787_v15 = vsel %vm4785_vm1, %v4722_v13, %v8522_v62  ;;  %v4559_v62 = vsel %vm4525_vm12, %v4494_v38, %v8236_v7  ;;  %v3850_v38 = vrot.slane %v3848_v31, 1  ;;  %v4026_v13 = vor.u32 %v4025_v25, %v4021_v24 }
 0x1e3   :  { %v4143_v58 = vpop.permute.xlu0 %4142  ;;  %v4852_v9 = vsel %vm4850_vm2, %v4787_v15, %v4141_v44  ;;  %v4624_v60 = vsel %vm4590_vm13, %v4559_v62, %v8446_v17  ;;  %v3846_v7 = vor.u32 %v3845_v50, %v3841_v19  ;;  %v6215_v17 = vcombine.low %v1424_v14, %v8524_v57 }
 0x1e4   :  { %3416 = vrot.lane.b32.xlu1 %v3344_v10, %s6844_s16  ;;  %v3834_v10 = vor.u32 %v3833_v35, %v3829_v59  ;;  %v4659_v59 = vsel %vm4655_vm14, %v4594_v23, %v8489_v5  ;;  %v4689_v5 = vsel %vm4655_vm14, %v4624_v60, %v8497_v3  ;;  %v4040_v19 = vshll.u32 %v8612_v2, 16  ;;  %v1425_v3 = vld [vmem:[#allocation2 + $0x6c] sm:$0xe] }
 0x1e5   :  { %3608 = vrot.lane.b32.xlu0 %v8534_v43, %s6845_s19  ;;  %v4724_v44 = vsel %vm4720_vm15, %v4659_v59, %v8513_v8  ;;  %v4754_v8 = vsel %vm4720_vm15, %v4689_v5, %v8516_v32  ;;  %v4037_v32 = vrot.slane %v4035_v48, 1  ;;  %v3851_v24 = vsel %vm1706_vm6, %v3846_v7, %v3850_v38 }
 0x1e6   :  { %v4173_v1 = vpop.permute.xlu1 %4172  ;;  %v4789_v11 = vsel %vm4785_vm1, %v4724_v44, %v8539_v42  ;;  %v3839_v55 = vsel %vm1706_vm6, %v3834_v10, %v3838_v34  ;;  %v4561_v42 = vsel %vm4525_vm12, %v8576_v28, %v8256_v51  ;;  %v4819_v57 = vsel %vm4785_vm1, %v4754_v8, %v8552_v29  ;;  %v1440_v28 = vld [vmem:[#allocation2 + $0x138] sm:$0xe]  ;;  %v1241_v34 = vld [vmem:[#allocation2 + $0x144] sm:$0xf] }
 0x1e7   :  { %v4397_v43 = vpop.permute.xlu0 %4396  ;;  %v4319_v51 = vrot.slane %v8562_v30, 1  ;;  %v4318_v10 = vrot.slane %v6215_v17, 1  ;;  %v2831_v25 = vshll.u32 %v7993_v53, 16  ;;  %v6231_v14 = vcombine.low %v1440_v28, %v8541_v18  ;;  %v190_v8 = vld [vmem:[%s10103_s0 + $0xf8] sm:$0xf] }
 0x1e8   :  { %3418 = vrot.lane.b32.xlu1 %v3347_v54, %s6844_s16  ;;  %v4917_v35 = vsel %vm4915_vm3, %v4852_v9, %v4397_v43  ;;  %v4854_v54 = vsel %vm4850_vm2, %v4789_v11, %v4143_v58  ;;  %v4626_v58 = vsel %vm4590_vm13, %v4561_v42, %v8460_v4  ;;  %v6216_v4 = vcombine.low %v1425_v3, %v8536_v36  ;;  %v1243_v11 = vld [vmem:[#allocation2 + $0x150] sm:$0xf] }
 0x1e9   :  { %3610 = vrot.lane.b32.xlu0 %v8556_v47, %s6845_s19  ;;  %6447 = vmatprep.mubr.msk.bf16.mxu0 %vm5000_vm4, %v4917_v35  ;;  %v4691_v29 = vsel %vm4655_vm14, %v4626_v58, %v8508_v45  ;;  %v4031_v45 = vsel %vm1706_vm6, %v4026_v13, %v4030_v39  ;;  %v4038_v9 = vor.u32 %v4037_v32, %v4033_v26  ;;  %v4042_v43 = vrot.slane %v4040_v19, 1  ;;  %v8678_v35 = vld [vmem:[#allocation2 + $0x74] ss:$0 sps:$4 sm:$0x11]   ;;  %v191_v58 = vld [vmem:[%s10103_s0 + $0xfc] sm:$0xf] }
 0x1ea   :  { %v4175_v41 = vpop.permute.xlu1 %4174  ;;  %v4756_v23 = vsel %vm4720_vm15, %v4691_v29, %v8528_v33  ;;  %v1441_v33 = vld [vmem:[#allocation2 + $0x144] sm:$0xe]  ;;  %v4320_v39 = vsel %vm2251_vm9, %v4318_v10, %v4319_v51  ;;  %v4321_v60 = vrot.slane %v6216_v4, 1  ;;  %v2829_v26 = vshrl.u32 %v7993_v53, 16  ;;  %v8694_v53 = vld [vmem:[#allocation2 + $0x154] sm:$0xf] }
 0x1eb   :  { %v4399_v47 = vpop.permute.xlu0 %4398  ;;  %v4821_v36 = vsel %vm4785_vm1, %v4756_v23, %v8582_v56  ;;  %v4322_v56 = vrot.slane %v8587_v27, 1  ;;  %v2833_v18 = vrot.slane %v2831_v25, 1  ;;  %v4366_v7 = vrot.slane %v6231_v14, 1  ;;  %v8708_v19 = vld [vmem:[#allocation2 + $0x14c] ss:$0 sps:$4 sm:$0x11]  }
 0x1ec   :  { %3640 = vrot.lane.b32.xlu1 %v8560_v6, %s6845_s19  ;;  %v4919_v50 = vsel %vm4915_vm3, %v4854_v54, %v4399_v47  ;;  %v4884_v6 = vsel %vm4850_vm2, %v4819_v57, %v4173_v1  ;;  %v8661_v1 = vld [vmem:[#allocation2 + $0x148] sm:$0xf]  ;;  %v4886_v62 = vsel %vm4850_vm2, %v4821_v36, %v4175_v41  ;;  %v4043_v41 = vsel %vm1706_vm6, %v4038_v9, %v4042_v43  ;;  %v8702_v47 = vld [vmem:[#allocation2 + $0x80] ss:$0 sps:$4 sm:$0x11]  }
 0x1ed   :  { %4152 = vrot.lane.b32.xlu0 %v3839_v55, %s6846_s24  ;;  %6448 = vmatmul.mubr.msk.bf16.vlgmr.msra.gmra.mrb[0].mxu0 %vm5000_vm4, %v4919_v50  ;;  %v4367_v38 = vrot.slane %v8569_v40, 1  ;;  %v6232_v5 = vcombine.low %v1441_v33, %v8585_v52  ;;  %v2836_v27 = vshll.u32 %v8678_v35, 16  ;;  %v2843_v54 = vshll.u32 %v8009_v0, 16  ;;  %v8727_v25 = vld [vmem:[#allocation2 + $0x158] ss:$0 sps:$4 sm:$0x11]  }
 0x1ee   :  { %v4429_v31 = vpop.permute.xlu1 %4428  ;;  %v4323_v40 = vsel %vm2251_vm9, %v4321_v60, %v4322_v56  ;;  %v2841_v52 = vshrl.u32 %v8009_v0, 16  ;;  %v723_v3 = vshrl.u32 %v190_v8, 16  ;;  %v4370_v50 = vrot.slane %v8612_v2, 1  ;;  %v1297_v0 = vld [vmem:[#allocation2 + $0x6c] sm:$0xe] }
 0x1ef   :  { %v4949_v15 = vsel %vm4915_vm3, %v4884_v6, %v4429_v31  ;;  %v8669_v30 = vpop.permute.xlu0 %3120  ;;  %v4368_v42 = vsel %vm2251_vm9, %v4366_v7, %v4367_v38  ;;  %v4369_v57 = vrot.slane %v6232_v5, 1  ;;  %v8713_v32 = vcombine.low %v1243_v11, %v8694_v53  ;;  %v6829_v36 = vld [vmem:[#allocation2 + $0x70] sm:$0xf]  ;;  %v1298_v7 = vld [vmem:[#allocation2 + $0x78] sm:$0xe] }
 0x1f0   :  { %3642 = vrot.lane.b32.xlu1 %v8601_v61, %s6845_s19  ;;  %6479 = vmatprep.mubr.msk.bf16.mxu1 %vm5000_vm4, %v4949_v15  ;;  %v6073_v61 = vcombine.low %v1241_v34, %v8661_v1  ;;  %v2834_v31 = vor.u32 %v2833_v18, %v2829_v26  ;;  %v2845_v29 = vrot.slane %v2843_v54, 1  ;;  %v466_v15 = vrot.slane %v7905_v63, 4  ;;  %v1058_v63 = vld [vmem:[#allocation2 + $0x198] sm:$0xf] }
 0x1f1   :  { %4154 = vrot.lane.b32.xlu0 %v3851_v24, %s6846_s24  ;;  %v2838_v24 = vrot.slane %v2836_v27, 1  ;;  %v2848_v2 = vshll.u32 %v8702_v47, 16  ;;  %v725_v10 = vrot.slane %v723_v3, 7  ;;  %v3028_v34 = vshll.u32 %v8708_v19, 16 }
 0x1f2   :  { %v4431_v59 = vpop.permute.xlu1 %4430  ;;  %v3023_v17 = vshll.u32 %v6073_v61, 16  ;;  %v3021_v51 = vshrl.u32 %v6073_v61, 16  ;;  %v726_v23 = vshll.u32 %v190_v8, 16  ;;  %v6121_v9 = vcombine.low %v1297_v0, %v6829_v36  ;;  %v6830_v0 = vld [vmem:[#allocation2 + $0x7c] sm:$0xf] }
 0x1f3   :  { %v4951_v48 = vsel %vm4915_vm3, %v4886_v62, %v4431_v59  ;;  %v8686_v44 = vpop.permute.xlu0 %3122  ;;  %v4371_v43 = vsel %vm2251_vm9, %v4369_v57, %v4370_v50  ;;  %v3035_v14 = vshll.u32 %v8713_v32, 16  ;;  %v950_v62 = vld [vmem:[#allocation2 + $0xc8] sm:$0x1]  ;;  %v2839_v33 = vsel %vm1706_vm6, %v2834_v31, %v2838_v24  ;;  %v8747_v50 = vld [vmem:[#allocation2 + $0x7c] sm:$0xf] }
 0x1f4   :  { %4184 = vrot.lane.b32.xlu1 %v4031_v45, %s6846_s24  ;;  %6480 = vmatmul.mubr.msk.bf16.vlgmr.msra.gmra.mrb[0].mxu1 %vm5000_vm4, %v4951_v48  ;;  %v3025_v28 = vrot.slane %v3023_v17, 1  ;;  %v731_v45 = vshrl.u32 %v191_v58, 16  ;;  %v2846_v56 = vor.u32 %v2845_v29, %v2841_v52  ;;  %v2850_v26 = vrot.slane %v2848_v2, 1  ;;  %v1062_v17 = vld [vmem:[#allocation2 + $0x1a0] sm:$0x1] }
 0x1f5   :  { %4408 = vrot.lane.b32.xlu0 %v4320_v39, %s6847_s1  ;;  %v728_v39 = vor.u32 %v726_v23, %v725_v10  ;;  %v729_v18 = vrot.slane %v725_v10, 4  ;;  %v3030_v5 = vrot.slane %v3028_v34, 1  ;;  %v3033_v8 = vshrl.u32 %v8713_v32, 16  ;;  %v1313_v52 = vld [vmem:[#allocation2 + $0x144] sm:$0xe] }
 0x1f6   :  { %v8691_v55 = vpop.permute.xlu1 %3152  ;;  %v3026_v48 = vor.u32 %v3025_v28, %v3021_v51  ;;  %v733_v60 = vrot.slane %v731_v45, 7  ;;  %v3037_v54 = vrot.slane %v3035_v14, 1  ;;  %v6122_v31 = vcombine.low %v1298_v7, %v6830_v0  ;;  %v1314_v28 = vld [vmem:[#allocation2 + $0x150] sm:$0xe]  ;;  %v1340_v36 = vld [vmem:[#allocation2 + $0x84] sm:$0xf] }
 0x1f7   :  { %v8706_v13 = vpop.permute.xlu0 %3376  ;;  %v1059_v11 = vsel %vm7117_vm8, %v728_v39, %v1058_v63  ;;  %v2851_v24 = vsel %vm1706_vm6, %v2846_v56, %v2850_v26  ;;  %v3301_v51 = vrot.slane %v8678_v35, 1  ;;  %v6137_v2 = vcombine.low %v1313_v52, %v8661_v1  ;;  %v10255_v39 = vld [vmem:[#allocation3_spill] sm:$0xff] }
 0x1f8   :  { %4186 = vrot.lane.b32.xlu1 %v4043_v41, %s6846_s24  ;;  %v734_v41 = vshll.u32 %v191_v58, 16  ;;  %v738_v27 = vrot.slane %v733_v60, 4  ;;  %1060 = vst [vmem:[#allocation2 + $0x198] sm:$0xf] %v1059_v11  ;;  %v3031_v21 = vsel %vm1706_vm6, %v3026_v48, %v3030_v5  ;;  %v3038_v10 = vor.u32 %v3037_v54, %v3033_v8  ;;  %v8776_v48 = vld [vmem:[#allocation2 + $0x154] sm:$0xf] }
 0x1f9   :  { %4410 = vrot.lane.b32.xlu0 %v4323_v40, %s6847_s1  ;;  %v3040_v40 = vshll.u32 %v8727_v25, 16  ;;  %v8763_v35 = vcombine.low %v1338_v22, %v8747_v50  ;;  %v6138_v12 = vcombine.low %v1314_v28, %v8694_v53  ;;  %v3304_v1 = vrot.slane %v8702_v47, 1  ;;  %v8792_v5 = vld [vmem:[#allocation2 + $0x80] ss:$0 sps:$4 sm:$0x11]   ;;  %v10257_v11 = vld [vmem:[#allocation31_spill] sm:$0xff] }
 0x1fa   :  { %v8718_v6 = vpop.permute.xlu1 %3154  ;;  %v736_v3 = vor.u32 %v734_v41, %v733_v60  ;;  %v1063_v58 = vsel %vm7111_vm7, %v738_v27, %v1062_v17  ;;  %v3348_v14 = vrot.slane %v6137_v2, 1  ;;  %v4466_v47 = vsel %vm4460_vm11, %v10255_v39, %v7856_v37  ;;  %v10259_v27 = vld [vmem:[#allocation44_spill] sm:$0xff]  ;;  %v10260_v17 = vld [vmem:[#allocation17_spill] sm:$0xff] }
 0x1fb   :  { %v8724_v4 = vpop.permute.xlu0 %3378  ;;  %1064 = vst [vmem:[#allocation2 + $0x1a0] sm:$0x1] %v1063_v58  ;;  %v3042_v34 = vrot.slane %v3040_v40, 1  ;;  %v3855_v53 = vshll.u32 %v8763_v35, 16  ;;  %v3351_v56 = vrot.slane %v6138_v12, 1  ;;  %v3352_v7 = vrot.slane %v8727_v25, 1 }
 0x1fc   :  { %4440 = vrot.lane.b32.xlu1 %v4368_v42, %s6847_s1  ;;  %v3300_v42 = vrot.slane %v6121_v9, 1  ;;  %v737_v29 = vsel %vm7102_vm5, %v729_v18, %v736_v3  ;;  %v8771_v9 = vld [vmem:[#allocation2 + $0x88] sm:$0xf]  ;;  %v10256_v18 = vld [vmem:[#allocation64_spill] sm:$0xff]  ;;  %v4498_v8 = vsel %vm4460_vm11, %v10260_v17, %v10259_v27  ;;  %v8809_v22 = vld [vmem:[#allocation2 + $0x160] sm:$0xf] }
 0x1fd   :  { %2620 = vrot.lane.b32.xlu0 %v6073_v61, %s6842_s14  ;;  %v951_v61 = vsel %vm7111_vm7, %v466_v15, %v950_v62  ;;  %1061 = vst.msk [vmem:[#allocation2 + $0x19c] sm:$0xf] %vm18_vm0, %v737_v29  ;;  %v3043_v63 = vsel %vm1706_vm6, %v3038_v10, %v3042_v34  ;;  %v3349_v62 = vrot.slane %v8708_v19, 1  ;;  %v8786_v26 = vcombine.low %v1340_v36, %v8771_v9  ;;  %v8866_v27 = vld [vmem:[#allocation2 + $0x164] ss:$0 sps:$4 sm:$0x11]  }
 0x1fe   :  { %v8731_v59 = vpop.permute.xlu1 %3408  ;;  %952 = vst [vmem:[#allocation2 + $0xc8] sm:$0x1] %v951_v61  ;;  %v3302_v45 = vsel %vm2251_vm9, %v3300_v42, %v3301_v51  ;;  %v4531_v19 = vsel %vm4525_vm12, %v4466_v47, %v10256_v18  ;;  %v10258_v61 = vld [vmem:[#allocation4_spill] sm:$0xff]  ;;  %v3853_v58 = vshrl.u32 %v8763_v35, 16  ;;  %v3857_v0 = vrot.slane %v3855_v53, 1  ;;  %v10263_v51 = vld [vmem:[#allocation66_spill] sm:$0xff] }
 0x1ff   :  { %v8736_v38 = vpop.permute.xlu0 %3600  ;;  %v4468_v37 = vsel %vm4460_vm11, %v10258_v61, %v10257_v11  ;;  %v4596_v54 = vsel %vm4590_vm13, %v4531_v19, %v8358_v49  ;;  %v3350_v3 = vsel %vm2251_vm9, %v3348_v14, %v3349_v62  ;;  %v1372_v42 = vld [vmem:[#allocation2 + $0x15c] sm:$0xf]  ;;  %v4563_v10 = vsel %vm4525_vm12, %v4498_v8, %v8249_v16  ;;  %v8836_v14 = vld [vmem:[#allocation2 + $0x158] ss:$0 sps:$4 sm:$0x11]   ;;  %v10264_v61 = vld [vmem:[#allocation79_spill] sm:$0xff] }
 0x200   :  { %4442 = vrot.lane.b32.xlu1 %v4371_v43, %s6847_s1  ;;  %v4661_v25 = vsel %vm4655_vm14, %v4596_v54, %v8669_v30  ;;  %v4533_v28 = vsel %vm4525_vm12, %v4468_v37, %v10263_v51  ;;  %v8820_v30 = vld [vmem:[#allocation2 + $0x8c] ss:$0 sps:$4 sm:$0x11]   ;;  %v3353_v12 = vsel %vm2251_vm9, %v3351_v56, %v3352_v7  ;;  %v8834_v36 = vcombine.low %v1372_v42, %v8809_v22  ;;  %v1426_v11 = vld [vmem:[#allocation2 + $0x78] sm:$0xe]  ;;  %v10265_v17 = vld [vmem:[#allocation103_spill] sm:$0xff] }
 0x201   :  { %3132 = vrot.lane.b32.xlu0 %v2839_v33, %s6843_s15  ;;  %v1370_v33 = vld [vmem:[#allocation2 + $0x150] sm:$0xf]  ;;  %v4726_v29 = vsel %vm4720_vm15, %v4661_v25, %v8706_v13  ;;  %v4598_v13 = vsel %vm4590_vm13, %v4533_v28, %v8373_v20  ;;  %v3858_v62 = vor.u32 %v3857_v0, %v3853_v58  ;;  %v3865_v20 = vshrl.u32 %v8786_v26, 16  ;;  %v1427_v51 = vld [vmem:[#allocation2 + $0x84] sm:$0xe] }
 0x202   :  { %v8744_v57 = vpop.permute.xlu1 %3410  ;;  %v8804_v52 = vcombine.low %v1370_v33, %v8776_v48  ;;  %v4791_v34 = vsel %vm4785_vm1, %v4726_v29, %v8736_v38  ;;  %v4663_v38 = vsel %vm4655_vm14, %v4598_v13, %v8686_v44  ;;  %v3872_v44 = vshll.u32 %v8820_v30, 16 }
 0x203   :  { %v8757_v15 = vpop.permute.xlu0 %3602  ;;  %v4728_v33 = vsel %vm4720_vm15, %v4663_v38, %v8724_v4  ;;  %v4052_v7 = vshll.u32 %v8836_v14, 16  ;;  %v6217_v0 = vcombine.low %v1426_v11, %v8747_v50  ;;  %v4057_v28 = vshrl.u32 %v8834_v36, 16  ;;  %v1245_v38 = vld [vmem:[#allocation2 + $0x15c] sm:$0xf] }
 0x204   :  { %2622 = vrot.lane.b32.xlu1 %v8713_v32, %s6842_s14  ;;  %v3303_v32 = vrot.slane %v6122_v31, 1  ;;  %v10261_v31 = vld [vmem:[#allocation46_spill] sm:$0xff]  ;;  %v4047_v16 = vshll.u32 %v8804_v52, 16  ;;  %v4793_v56 = vsel %vm4785_vm1, %v4728_v33, %v8757_v15  ;;  %v4064_v50 = vshll.u32 %v8866_v27, 16 }
 0x205   :  { %3134 = vrot.lane.b32.xlu0 %v2851_v24, %s6843_s15  ;;  %v10262_v24 = vld [vmem:[#allocation18_spill] sm:$0xff]  ;;  %v4328_v33 = vrot.slane %v8820_v30, 1  ;;  %vm5884_vm0 = vcmask 60416  }
 0x206   :  { %v8765_v23 = vpop.permute.xlu1 %3632  ;;  %v3305_v41 = vsel %vm2251_vm9, %v3303_v32, %v3304_v1  ;;  %v4500_v49 = vsel %vm4460_vm11, %v10262_v24, %v10261_v31  ;;  %v3860_v32 = vshll.u32 %v8792_v5, 16  ;;  %v1247_v30 = vld [vmem:[#allocation2 + $0x168] sm:$0xf] }
 0x207   :  { %v4145_v43 = vpop.permute.xlu0 %4144 }
 0x208   :  { %3164 = vrot.lane.b32.xlu1 %v3031_v21, %s6843_s15  ;;  %v3867_v21 = vshll.u32 %v8786_v26, 16  ;;  %v3862_v18 = vrot.slane %v3860_v32, 1 }
 0x209   :  { %3388 = vrot.lane.b32.xlu0 %v3302_v45, %s6844_s16  ;;  %v4856_v45 = vsel %vm4850_vm2, %v4791_v34, %v4145_v43  ;;  %v4628_v43 = vsel %vm4590_vm13, %v4563_v10, %v8456_v46  ;;  %v4045_v46 = vshrl.u32 %v8804_v52, 16  ;;  %v4324_v34 = vrot.slane %v6217_v0, 1 }
 0x20a   :  { %v8782_v60 = vpop.permute.xlu1 %3634  ;;  %v3869_v39 = vrot.slane %v3867_v21, 1  ;;  %v4693_v47 = vsel %vm4655_vm14, %v4628_v43, %v8691_v55  ;;  %v4565_v55 = vsel %vm4525_vm12, %v4500_v49, %v10264_v61  ;;  %v3863_v58 = vsel %vm1706_vm6, %v3858_v62, %v3862_v18  ;;  %v1442_v21 = vld [vmem:[#allocation2 + $0x150] sm:$0xe] }
 0x20b   :  { %v4147_v40 = vpop.permute.xlu0 %4146  ;;  %v4758_v4 = vsel %vm4720_vm15, %v4693_v47, %v8731_v59  ;;  %v4059_v59 = vshll.u32 %v8834_v36, 16  ;;  %v4630_v8 = vsel %vm4590_vm13, %v4565_v55, %v10265_v17  ;;  %v4054_v49 = vrot.slane %v4052_v7, 1  ;;  %v8930_v55 = vld [vmem:[#allocation2 + $0x98] ss:$0 sps:$4 sm:$0x11]  }
 0x20c   :  { %3166 = vrot.lane.b32.xlu1 %v3043_v63, %s6843_s15  ;;  %v4858_v19 = vsel %vm4850_vm2, %v4793_v56, %v4147_v40  ;;  %v4823_v15 = vsel %vm4785_vm1, %v4758_v4, %v8765_v23  ;;  %v3870_v25 = vor.u32 %v3869_v39, %v3865_v20  ;;  %v4695_v23 = vsel %vm4655_vm14, %v4630_v8, %v8718_v6  ;;  %v8938_v8 = vld [vmem:[#allocation2 + $0x164] ss:$0 sps:$4 sm:$0x11]  }
 0x20d   :  { %3390 = vrot.lane.b32.xlu0 %v3305_v41, %s6844_s16  ;;  %v4049_v41 = vrot.slane %v4047_v16, 1  ;;  %v4760_v31 = vsel %vm4720_vm15, %v4695_v23, %v8744_v57  ;;  %v4061_v29 = vrot.slane %v4059_v59, 1  ;;  %v6233_v16 = vcombine.low %v1442_v21, %v8776_v48  ;;  %v1300_v21 = vld [vmem:[#allocation2 + $0x90] sm:$0xe] }
 0x20e   :  { %v4177_v2 = vpop.permute.xlu1 %4176  ;;  %v4825_v6 = vsel %vm4785_vm1, %v4760_v31, %v8782_v60  ;;  %v6218_v60 = vcombine.low %v1427_v51, %v8771_v9  ;;  %v1443_v9 = vld [vmem:[#allocation2 + $0x15c] sm:$0xe]  ;;  %v4373_v56 = vrot.slane %v8836_v14, 1  ;;  %v4376_v59 = vrot.slane %v8866_v27, 1 }
 0x20f   :  { %v4401_v1 = vpop.permute.xlu0 %4400  ;;  %v4888_v54 = vsel %vm4850_vm2, %v4823_v15, %v4177_v2  ;;  %v4050_v24 = vor.u32 %v4049_v41, %v4045_v46  ;;  %v4372_v47 = vrot.slane %v6233_v16, 1  ;;  %v6234_v18 = vcombine.low %v1443_v9, %v8809_v22  ;;  %v10267_v41 = vld [vmem:[#allocation49_spill] sm:$0xff]  ;;  %v8950_v51 = vld [vmem:[#allocation2 + $0x170] ss:$0 sps:$4 sm:$0x11]  }
 0x210   :  { %3420 = vrot.lane.b32.xlu1 %v3350_v3, %s6844_s16  ;;  %v4921_v63 = vsel %vm4915_vm3, %v4856_v45, %v4401_v1  ;;  %v3874_v3 = vrot.slane %v3872_v44, 1  ;;  %v4062_v45 = vor.u32 %v4061_v29, %v4057_v28  ;;  %v4066_v1 = vrot.slane %v4064_v50, 1  ;;  %v6831_v29 = vld [vmem:[#allocation2 + $0x88] sm:$0xf]  ;;  %v8963_v9 = vld [vmem:[#allocation2 + $0x94] sm:$0xf] }
 0x211   :  { %3612 = vrot.lane.b32.xlu0 %v8763_v35, %s6845_s19  ;;  %6451 = vmatprep.mubr.msk.bf16.mxu0 %vm5000_vm4, %v4921_v63  ;;  %v4055_v13 = vsel %vm1706_vm6, %v4050_v24, %v4054_v49  ;;  %v8904_v63 = vld [vmem:[#allocation2 + $0x160] sm:$0xf]  ;;  %v4327_v43 = vrot.slane %v6218_v60, 1  ;;  %v2867_v7 = vshll.u32 %v10267_v41, 16  ;;  %v4374_v15 = vsel %vm2251_vm9, %v4372_v47, %v4373_v56 }
 0x212   :  { %v4179_v53 = vpop.permute.xlu1 %4178  ;;  %v6075_v39 = vcombine.low %v1245_v38, %v8904_v63  ;;  %v4067_v44 = vsel %vm1706_vm6, %v4062_v45, %v4066_v1  ;;  %v3052_v49 = vshll.u32 %v8938_v8, 16  ;;  %v3064_v45 = vshll.u32 %v8950_v51, 16  ;;  %v1315_v1 = vld [vmem:[#allocation2 + $0x15c] sm:$0xe]  ;;  %v1342_v38 = vld [vmem:[#allocation2 + $0x90] sm:$0xf] }
 0x213   :  { %v4403_v35 = vpop.permute.xlu0 %4402  ;;  %v4890_v57 = vsel %vm4850_vm2, %v4825_v6, %v4179_v53  ;;  %v8912_v53 = vld [vmem:[#allocation2 + $0x8c] ss:$0 sps:$4 sm:$0x11]   ;;  %v4329_v11 = vsel %vm2251_vm9, %v4327_v43, %v4328_v33 }
 0x214   :  { %3422 = vrot.lane.b32.xlu1 %v3353_v12, %s6844_s16  ;;  %v4923_v37 = vsel %vm4915_vm3, %v4858_v19, %v4403_v35  ;;  %v4325_v12 = vrot.slane %v8792_v5, 1  ;;  %v10266_v5 = vld [vmem:[#allocation45_spill] sm:$0xff]  ;;  %v8925_v19 = vld [vmem:[#allocation2 + $0x16c] sm:$0xf]  ;;  %v2860_v61 = vshll.u32 %v8912_v53, 16  ;;  %v3047_v14 = vshll.u32 %v6075_v39, 16 }
 0x215   :  { %3614 = vrot.lane.b32.xlu0 %v8786_v26, %s6845_s19  ;;  %6452 = vmatmul.mubr.msk.bf16.gmra.mrb[4].mxu0 %vm5000_vm4, %v4923_v37  ;;  %v2853_v46 = vshrl.u32 %v10266_v5, 16  ;;  %v4375_v37 = vrot.slane %v6234_v18, 1  ;;  %v6076_v17 = vcombine.low %v1247_v30, %v8925_v19  ;;  %v3045_v27 = vshrl.u32 %v6075_v39, 16 }
 0x216   :  { %v4433_v40 = vpop.permute.xlu1 %4432  ;;  %v4326_v20 = vsel %vm2251_vm9, %v4324_v34, %v4325_v12  ;;  %v2862_v23 = vrot.slane %v2860_v61, 1  ;;  %v3049_v31 = vrot.slane %v3047_v14, 1  ;;  %v3054_v12 = vrot.slane %v3052_v49, 1  ;;  %v8980_v61 = vld [vmem:[#allocation2 + $0xa0] sm:$0xf] }
 0x217   :  { %v4953_v42 = vsel %vm4915_vm3, %v4888_v54, %v4433_v40  ;;  %v8885_v26 = vpop.permute.xlu0 %2612  ;;  %v2865_v54 = vshrl.u32 %v10267_v41, 16  ;;  %v4377_v24 = vsel %vm2251_vm9, %v4375_v37, %v4376_v59  ;;  %v3059_v6 = vshll.u32 %v6076_v17, 16 }
 0x218   :  { %3644 = vrot.lane.b32.xlu1 %v8804_v52, %s6845_s19  ;;  %6483 = vmatprep.mubr.msk.bf16.mxu1 %vm5000_vm4, %v4953_v42  ;;  %v3875_v52 = vsel %vm1706_vm6, %v3870_v25, %v3874_v3  ;;  %v2869_v25 = vrot.slane %v2867_v7, 1  ;;  %v2872_v42 = vshll.u32 %v8930_v55, 16  ;;  %v3050_v34 = vor.u32 %v3049_v31, %v3045_v27  ;;  %v10271_v27 = vld [vmem:[#allocation6_spill] sm:$0xff]  ;;  %v10272_v31 = vld [vmem:[#allocation47_spill] sm:$0xff] }
 0x219   :  { %4156 = vrot.lane.b32.xlu0 %v3863_v58, %s6846_s24  ;;  %v1299_v58 = vld [vmem:[#allocation2 + $0x84] sm:$0xe]  ;;  %v3057_v60 = vshrl.u32 %v6076_v17, 16  ;;  %v3307_v33 = vrot.slane %v8912_v53, 1  ;;  %v3066_v18 = vrot.slane %v3064_v45, 1  ;;  %v8973_v30 = vcombine.low %v1342_v38, %v8963_v9 }
 0x21a   :  { %v4435_v2 = vpop.permute.xlu1 %4434  ;;  %v6123_v50 = vcombine.low %v1299_v58, %v6831_v29  ;;  %v3055_v47 = vsel %vm1706_vm6, %v3050_v34, %v3054_v12  ;;  %v3310_v7 = vrot.slane %v8930_v55, 1  ;;  %v3355_v59 = vrot.slane %v8938_v8, 1  ;;  %v10269_v55 = vld [vmem:[#allocation5_spill] sm:$0xff]  ;;  %v9019_v38 = vld [vmem:[#allocation2 + $0x178] sm:$0xf] }
 0x21b   :  { %v4955_v10 = vsel %vm4915_vm3, %v4890_v57, %v4435_v2  ;;  %v8900_v32 = vpop.permute.xlu0 %3124  ;;  %v2870_v2 = vor.u32 %v2869_v25, %v2865_v54  ;;  %v8986_v54 = vld [vmem:[#allocation2 + $0x16c] sm:$0xf]  ;;  %v3879_v25 = vshll.u32 %v8973_v30, 16  ;;  %v3358_v12 = vrot.slane %v8950_v51, 1 }
 0x21c   :  { %3646 = vrot.lane.b32.xlu1 %v8834_v36, %s6845_s19  ;;  %6484 = vmatmul.mubr.msk.bf16.gmra.mrb[4].mxu1 %vm5000_vm4, %v4955_v10  ;;  %v2855_v36 = vshll.u32 %v10266_v5, 16  ;;  %v3306_v5 = vrot.slane %v6123_v50, 1 }
 0x21d   :  { %4158 = vrot.lane.b32.xlu0 %v3875_v52, %s6846_s24  ;;  %v2874_v52 = vrot.slane %v2872_v42, 1 }
 0x21e   :  { %v8906_v62 = vpop.permute.xlu1 %2614  ;;  %v2857_v35 = vrot.slane %v2855_v36, 1  ;;  %v6832_v36 = vld [vmem:[#allocation2 + $0x94] sm:$0xf]  ;;  %v3308_v53 = vsel %vm2251_vm9, %v3306_v5, %v3307_v33  ;;  %v3877_v5 = vshrl.u32 %v8973_v30, 16 }
 0x21f   :  { %v8915_v48 = vpop.permute.xlu0 %3126  ;;  %v2875_v43 = vsel %vm1706_vm6, %v2870_v2, %v2874_v52  ;;  %v10275_v2 = vld [vmem:[#allocation91_spill] sm:$0xff] }
 0x220   :  { %4188 = vrot.lane.b32.xlu1 %v4055_v13, %s6846_s24  ;;  %v2858_v3 = vor.u32 %v2857_v35, %v2853_v46  ;;  %v3061_v13 = vrot.slane %v3059_v6, 1  ;;  %v1316_v46 = vld [vmem:[#allocation2 + $0x168] sm:$0xe]  ;;  %v10274_v6 = vld [vmem:[#allocation65_spill] sm:$0xff] }
 0x221   :  { %4412 = vrot.lane.b32.xlu0 %v4326_v20, %s6847_s1  ;;  %v6124_v20 = vcombine.low %v1300_v21, %v6832_v36  ;;  %v3881_v36 = vrot.slane %v3879_v25, 1 }
 0x222   :  { %v8922_v4 = vpop.permute.xlu1 %3156  ;;  %v2863_v57 = vsel %vm1706_vm6, %v2858_v3, %v2862_v23  ;;  %v3062_v56 = vor.u32 %v3061_v13, %v3057_v60  ;;  %v10268_v3 = vld [vmem:[#allocation32_spill] sm:$0xff] }
 0x223   :  { %v8933_v22 = vpop.permute.xlu0 %3380  ;;  %v3309_v41 = vrot.slane %v6124_v20, 1  ;;  %v4470_v23 = vsel %vm4460_vm11, %v10269_v55, %v10268_v3  ;;  %v10276_v20 = vld [vmem:[#allocation50_spill] sm:$0xff]  ;;  %v3882_v55 = vor.u32 %v3881_v36, %v3877_v5 }
 0x224   :  { %4190 = vrot.lane.b32.xlu1 %v4067_v44, %s6846_s24  ;;  %v6139_v44 = vcombine.low %v1315_v1, %v8904_v63  ;;  %v3067_v37 = vsel %vm1706_vm6, %v3062_v56, %v3066_v18  ;;  %v4535_v29 = vsel %vm4525_vm12, %v4470_v23, %v10274_v6  ;;  %v1376_v1 = vld [vmem:[#allocation2 + $0x174] sm:$0xf] }
 0x225   :  { %4414 = vrot.lane.b32.xlu0 %v4329_v11, %s6847_s1  ;;  %v1344_v11 = vld [vmem:[#allocation2 + $0x9c] sm:$0xf]  ;;  %v3311_v50 = vsel %vm2251_vm9, %v3309_v41, %v3310_v7  ;;  %v4600_v52 = vsel %vm4590_vm13, %v4535_v29, %v10275_v2  ;;  %v1428_v2 = vld [vmem:[#allocation2 + $0x90] sm:$0xe] }
 0x226   :  { %v8941_v40 = vpop.permute.xlu1 %3158  ;;  %v3354_v14 = vrot.slane %v6139_v44, 1  ;;  %v8996_v58 = vcombine.low %v1344_v11, %v8980_v61  ;;  %v4665_v13 = vsel %vm4655_vm14, %v4600_v52, %v8900_v32  ;;  %v10278_v44 = vld [vmem:[#allocation68_spill] sm:$0xff]  ;;  %v9030_v32 = vld [vmem:[#allocation2 + $0xa4] ss:$0 sps:$4 sm:$0x11]  }
 0x227   :  { %v8946_v0 = vpop.permute.xlu0 %3382  ;;  %v10281_v52 = vld [vmem:[#allocation81_spill] sm:$0xff] }
 0x228   :  { %4444 = vrot.lane.b32.xlu1 %v4374_v15, %s6847_s1  ;;  %v6140_v15 = vcombine.low %v1316_v46, %v8925_v19  ;;  %v10270_v19 = vld [vmem:[#allocation33_spill] sm:$0xff]  ;;  %v3356_v45 = vsel %vm2251_vm9, %v3354_v14, %v3355_v59  ;;  %v3891_v18 = vshll.u32 %v8996_v58, 16  ;;  %v10279_v46 = vld [vmem:[#allocation78_spill] sm:$0xff]  ;;  %v9044_v59 = vcombine.low %v1376_v1, %v9019_v38 }
 0x229   :  { %2624 = vrot.lane.b32.xlu0 %v6075_v39, %s6842_s14  ;;  %v4472_v8 = vsel %vm4460_vm11, %v10271_v27, %v10270_v19 }
 0x22a   :  { %v8952_v28 = vpop.permute.xlu1 %3412  ;;  %v3357_v34 = vrot.slane %v6140_v15, 1  ;;  %v4537_v51 = vsel %vm4525_vm12, %v4472_v8, %v10278_v44  ;;  %v3893_v8 = vrot.slane %v3891_v18, 1 }
 0x22b   :  { %v8957_v10 = vpop.permute.xlu0 %3604 }
 0x22c   :  { %4446 = vrot.lane.b32.xlu1 %v4377_v24, %s6847_s1  ;;  %v10273_v24 = vld [vmem:[#allocation19_spill] sm:$0xff] }
 0x22d   :  { %3136 = vrot.lane.b32.xlu0 %v2863_v57, %s6843_s15  ;;  %v4502_v49 = vsel %vm4460_vm11, %v10273_v24, %v10272_v31  ;;  %v9007_v57 = vld [vmem:[#allocation2 + $0x98] ss:$0 sps:$4 sm:$0x11]  }
 0x22e   :  { %v8960_v16 = vpop.permute.xlu1 %3414  ;;  %v4567_v41 = vsel %vm4525_vm12, %v4502_v49, %v10279_v46  ;;  %v3884_v14 = vshll.u32 %v9007_v57, 16  ;;  %v1444_v46 = vld [vmem:[#allocation2 + $0x168] sm:$0xe] }
 0x22f   :  { %v8968_v39 = vpop.permute.xlu0 %3606  ;;  %v4632_v23 = vsel %vm4590_vm13, %v4567_v41, %v8885_v26 }
 0x230   :  { %2626 = vrot.lane.b32.xlu1 %v6076_v17, %s6842_s14  ;;  %v1374_v17 = vld [vmem:[#allocation2 + $0x168] sm:$0xf]  ;;  %v4697_v31 = vsel %vm4655_vm14, %v4632_v23, %v8922_v4  ;;  %v3886_v49 = vrot.slane %v3884_v14, 1  ;;  %v4334_v23 = vrot.slane %v9030_v32, 1 }
 0x231   :  { %3138 = vrot.lane.b32.xlu0 %v2875_v43, %s6843_s15  ;;  %v9014_v60 = vcombine.low %v1374_v17, %v8986_v54  ;;  %v10277_v43 = vld [vmem:[#allocation20_spill] sm:$0xff]  ;;  %v9046_v17 = vld [vmem:[#allocation2 + $0x170] ss:$0 sps:$4 sm:$0x11]  }
 0x232   :  { %v8975_v35 = vpop.permute.xlu1 %3636  ;;  %v4504_v33 = vsel %vm4460_vm11, %v10277_v43, %v10276_v20  ;;  %v3887_v20 = vsel %vm1706_vm6, %v3882_v55, %v3886_v49  ;;  %v6219_v43 = vcombine.low %v1428_v2, %v8963_v9 }
 0x233   :  { %v4149_v63 = vpop.permute.xlu0 %4148  ;;  %v4071_v25 = vshll.u32 %v9014_v60, 16  ;;  %v4069_v26 = vshrl.u32 %v9014_v60, 16  ;;  %v4569_v4 = vsel %vm4525_vm12, %v4504_v33, %v10281_v52  ;;  %v9140_v52 = vld [vmem:[#allocation2 + $0xb0] ss:$0 sps:$4 sm:$0x11]  }
 0x234   :  { %3168 = vrot.lane.b32.xlu1 %v3055_v47, %s6843_s15  ;;  %v4730_v47 = vsel %vm4720_vm15, %v4665_v13, %v8933_v22 }
 0x235   :  { %3392 = vrot.lane.b32.xlu0 %v3308_v53, %s6844_s16  ;;  %v10280_v53 = vld [vmem:[#allocation93_spill] sm:$0xff]  ;;  %v4795_v11 = vsel %vm4785_vm1, %v4730_v47, %v8957_v10  ;;  %v4073_v29 = vrot.slane %v4071_v25, 1  ;;  %v4081_v47 = vshrl.u32 %v9044_v59, 16  ;;  %v1249_v25 = vld [vmem:[#allocation2 + $0x174] sm:$0xf] }
 0x236   :  { %v8992_v42 = vpop.permute.xlu1 %3638  ;;  %v4602_v7 = vsel %vm4590_vm13, %v4537_v51, %v10280_v53  ;;  %v4860_v22 = vsel %vm4850_vm2, %v4795_v11, %v4149_v63  ;;  %v3889_v63 = vshrl.u32 %v8996_v58, 16  ;;  %v1429_v51 = vld [vmem:[#allocation2 + $0x9c] sm:$0xe]  ;;  %v4330_v53 = vrot.slane %v6219_v43, 1 }
 0x237   :  { %v4151_v21 = vpop.permute.xlu0 %4150  ;;  %v4667_v3 = vsel %vm4655_vm14, %v4602_v7, %v8915_v48  ;;  %v3896_v48 = vshll.u32 %v9030_v32, 16  ;;  %v4074_v33 = vor.u32 %v4073_v29, %v4069_v26  ;;  %v4331_v7 = vrot.slane %v9007_v57, 1  ;;  %v10282_v57 = vld [vmem:[#allocation48_spill] sm:$0xff]  ;;  %v1251_v32 = vld [vmem:[#allocation2 + $0x180] sm:$0xf] }
 0x238   :  { %3170 = vrot.lane.b32.xlu1 %v3067_v37, %s6843_s15  ;;  %v3359_v37 = vsel %vm2251_vm9, %v3357_v34, %v3358_v12  ;;  %v4732_v19 = vsel %vm4720_vm15, %v4667_v3, %v8946_v0  ;;  %v4762_v0 = vsel %vm4720_vm15, %v4697_v31, %v8952_v28  ;;  %v9076_v12 = vld [vmem:[#allocation2 + $0x17c] ss:$0 sps:$4 sm:$0x11]   ;;  %v4083_v28 = vshll.u32 %v9044_v59, 16  ;;  %v9114_v3 = vld [vmem:[#allocation2 + $0x178] sm:$0xf] }
 0x239   :  { %3394 = vrot.lane.b32.xlu0 %v3311_v50, %s6844_s16  ;;  %v4797_v24 = vsel %vm4785_vm1, %v4732_v19, %v8968_v39  ;;  %v4076_v50 = vshll.u32 %v9046_v17, 16  ;;  %v4827_v39 = vsel %vm4785_vm1, %v4762_v0, %v8975_v35  ;;  %v3894_v1 = vor.u32 %v3893_v8, %v3889_v63  ;;  %v9122_v19 = vld [vmem:[#allocation2 + $0xa4] ss:$0 sps:$4 sm:$0x11]  }
 0x23a   :  { %v4181_v56 = vpop.permute.xlu1 %4180  ;;  %v4862_v6 = vsel %vm4850_vm2, %v4797_v24, %v4151_v21  ;;  %v4634_v21 = vsel %vm4590_vm13, %v4569_v4, %v8906_v62  ;;  %v3898_v5 = vrot.slane %v3896_v48, 1  ;;  %v4088_v9 = vshll.u32 %v9076_v12, 16  ;;  %v9135_v0 = vld [vmem:[#allocation2 + $0x184] sm:$0xf] }
 0x23b   :  { %v4405_v15 = vpop.permute.xlu0 %4404  ;;  %v4892_v13 = vsel %vm4850_vm2, %v4827_v39, %v4181_v56  ;;  %v4699_v35 = vsel %vm4655_vm14, %v4634_v21, %v8941_v40  ;;  %v4078_v44 = vrot.slane %v4076_v50, 1  ;;  %v4085_v56 = vrot.slane %v4083_v28, 1  ;;  %v9148_v21 = vld [vmem:[#allocation2 + $0x17c] ss:$0 sps:$4 sm:$0x11]  }
 0x23c   :  { %3424 = vrot.lane.b32.xlu1 %v3356_v45, %s6844_s16  ;;  %v4925_v10 = vsel %vm4915_vm3, %v4860_v22, %v4405_v15  ;;  %v4764_v62 = vsel %vm4720_vm15, %v4699_v35, %v8960_v16  ;;  %v4090_v15 = vrot.slane %v4088_v9, 1  ;;  %v4332_v55 = vsel %vm2251_vm9, %v4330_v53, %v4331_v7 }
 0x23d   :  { %3616 = vrot.lane.b32.xlu0 %v8973_v30, %s6845_s19  ;;  %6455 = vmatprep.mubr.msk.bf16.mxu0 %vm5000_vm4, %v4925_v10  ;;  %v4829_v40 = vsel %vm4785_vm1, %v4764_v62, %v8992_v42  ;;  %v6220_v42 = vcombine.low %v1429_v51, %v8980_v61  ;;  %v4079_v14 = vsel %vm1706_vm6, %v4074_v33, %v4078_v44  ;;  %v1445_v61 = vld [vmem:[#allocation2 + $0x174] sm:$0xe]  ;;  %v4379_v31 = vrot.slane %v9046_v17, 1  ;;  %v9160_v51 = vld [vmem:[#allocation2 + $0x188] ss:$0 sps:$4 sm:$0x11]  }
 0x23e   :  { %v4183_v27 = vpop.permute.xlu1 %4182  ;;  %v4086_v22 = vor.u32 %v4085_v56, %v4081_v47  ;;  %v6236_v24 = vcombine.low %v1445_v61, %v9019_v38  ;;  %v2877_v49 = vshrl.u32 %v10282_v57, 16  ;;  %v2884_v2 = vshll.u32 %v9122_v19, 16  ;;  %v6833_v56 = vld [vmem:[#allocation2 + $0xa0] sm:$0xf]  ;;  %v9173_v61 = vld [vmem:[#allocation2 + $0xac] sm:$0xf] }
 0x23f   :  { %v4407_v30 = vpop.permute.xlu0 %4406  ;;  %v4894_v16 = vsel %vm4850_vm2, %v4829_v40, %v4183_v27  ;;  %v4333_v63 = vrot.slane %v6220_v42, 1  ;;  %v6077_v27 = vcombine.low %v1249_v25, %v9114_v3  ;;  %v6078_v28 = vcombine.low %v1251_v32, %v9135_v0  ;;  %v1346_v25 = vld [vmem:[#allocation2 + $0xa8] sm:$0xf] }
 0x240   :  { %3426 = vrot.lane.b32.xlu1 %v3359_v37, %s6844_s16  ;;  %v4927_v34 = vsel %vm4915_vm3, %v4862_v6, %v4407_v30  ;;  %v6235_v37 = vcombine.low %v1444_v46, %v8986_v54  ;;  %v4091_v8 = vsel %vm1706_vm6, %v4086_v22, %v4090_v15  ;;  %v10283_v30 = vld [vmem:[#allocation53_spill] sm:$0xff]  ;;  %v4381_v39 = vrot.slane %v6236_v24, 1  ;;  %v1302_v46 = vld [vmem:[#allocation2 + $0xa8] sm:$0xe]  ;;  %v1317_v15 = vld [vmem:[#allocation2 + $0x174] sm:$0xe] }
 0x241   :  { %3618 = vrot.lane.b32.xlu0 %v8996_v58, %s6845_s19  ;;  %6456 = vmatmul.mubr.msk.bf16.gmra.mrb[8].mxu0 %vm5000_vm4, %v4927_v34  ;;  %v2891_v29 = vshll.u32 %v10283_v30, 16  ;;  %v4335_v50 = vsel %vm2251_vm9, %v4333_v63, %v4334_v23  ;;  %v3071_v17 = vshll.u32 %v6077_v27, 16  ;;  %v4382_v34 = vrot.slane %v9076_v12, 1 }
 0x242   :  { %v4437_v45 = vpop.permute.xlu1 %4436  ;;  %v4378_v48 = vrot.slane %v6235_v37, 1  ;;  %v2886_v35 = vrot.slane %v2884_v2, 1  ;;  %v3069_v12 = vshrl.u32 %v6077_v27, 16  ;;  %v3076_v44 = vshll.u32 %v9148_v21, 16  ;;  %v9190_v2 = vld [vmem:[#allocation2 + $0xb8] sm:$0xf] }
 0x243   :  { %v4957_v36 = vsel %vm4915_vm3, %v4892_v13, %v4437_v45  ;;  %v9095_v58 = vpop.permute.xlu0 %2616  ;;  %v2889_v13 = vshrl.u32 %v10283_v30, 16  ;;  %v3073_v62 = vrot.slane %v3071_v17, 1  ;;  %v4383_v33 = vsel %vm2251_vm9, %v4381_v39, %v4382_v34 }
 0x244   :  { %3648 = vrot.lane.b32.xlu1 %v9014_v60, %s6845_s19  ;;  %6487 = vmatprep.mubr.msk.bf16.mxu1 %vm5000_vm4, %v4957_v36  ;;  %v3899_v60 = vsel %vm1706_vm6, %v3894_v1, %v3898_v5  ;;  %v4380_v4 = vsel %vm2251_vm9, %v4378_v48, %v4379_v31  ;;  %v2893_v1 = vrot.slane %v2891_v29, 1  ;;  %v2896_v36 = vshll.u32 %v9140_v52, 16 }
 0x245   :  { %4160 = vrot.lane.b32.xlu0 %v3887_v20, %s6846_s24  ;;  %v1301_v20 = vld [vmem:[#allocation2 + $0x9c] sm:$0xe]  ;;  %v3083_v40 = vshll.u32 %v6078_v28, 16  ;;  %v3074_v53 = vor.u32 %v3073_v62, %v3069_v12  ;;  %v3078_v7 = vrot.slane %v3076_v44, 1  ;;  %v3081_v42 = vshrl.u32 %v6078_v28, 16  ;;  %v10288_v62 = vld [vmem:[#allocation51_spill] sm:$0xff] }
 0x246   :  { %v4439_v18 = vpop.permute.xlu1 %4438  ;;  %v6125_v9 = vcombine.low %v1301_v20, %v6833_v56  ;;  %v3088_v22 = vshll.u32 %v9160_v51, 16  ;;  %v3313_v23 = vrot.slane %v9122_v19, 1  ;;  %v9183_v32 = vcombine.low %v1346_v25, %v9173_v61  ;;  %v10287_v12 = vld [vmem:[#allocation8_spill] sm:$0xff]  ;;  %v9229_v25 = vld [vmem:[#allocation2 + $0x190] sm:$0xf] }
 0x247   :  { %v4959_v41 = vsel %vm4915_vm3, %v4894_v16, %v4439_v18  ;;  %v9110_v11 = vpop.permute.xlu0 %3128  ;;  %v2894_v18 = vor.u32 %v2893_v1, %v2889_v13  ;;  %v3079_v48 = vsel %vm1706_vm6, %v3074_v53, %v3078_v7  ;;  %v3316_v29 = vrot.slane %v9140_v52, 1  ;;  %v9196_v13 = vld [vmem:[#allocation2 + $0x184] sm:$0xf]  ;;  %v10285_v52 = vld [vmem:[#allocation7_spill] sm:$0xff] }
 0x248   :  { %3650 = vrot.lane.b32.xlu1 %v9044_v59, %s6845_s19  ;;  %6488 = vmatmul.mubr.msk.bf16.gmra.mrb[8].mxu1 %vm5000_vm4, %v4959_v41  ;;  %v2879_v59 = vshll.u32 %v10282_v57, 16  ;;  %v3312_v57 = vrot.slane %v6125_v9, 1  ;;  %v3090_v24 = vrot.slane %v3088_v22, 1  ;;  %v3361_v34 = vrot.slane %v9148_v21, 1 }
 0x249   :  { %4162 = vrot.lane.b32.xlu0 %v3899_v60, %s6846_s24  ;;  %v2898_v60 = vrot.slane %v2896_v36, 1  ;;  %v3903_v1 = vshll.u32 %v9183_v32, 16  ;;  %v3364_v7 = vrot.slane %v9160_v51, 1 }
 0x24a   :  { %v9116_v10 = vpop.permute.xlu1 %2618  ;;  %v2881_v6 = vrot.slane %v2879_v59, 1  ;;  %v6834_v59 = vld [vmem:[#allocation2 + $0xac] sm:$0xf]  ;;  %v3314_v19 = vsel %vm2251_vm9, %v3312_v57, %v3313_v23  ;;  %v3901_v57 = vshrl.u32 %v9183_v32, 16 }
 0x24b   :  { %v9125_v54 = vpop.permute.xlu0 %3130  ;;  %v2899_v63 = vsel %vm1706_vm6, %v2894_v18, %v2898_v60  ;;  %v10291_v18 = vld [vmem:[#allocation92_spill] sm:$0xff] }
 0x24c   :  { %4192 = vrot.lane.b32.xlu1 %v4079_v14, %s6846_s24  ;;  %v2882_v5 = vor.u32 %v2881_v6, %v2877_v49  ;;  %v3085_v14 = vrot.slane %v3083_v40, 1  ;;  %v1318_v49 = vld [vmem:[#allocation2 + $0x180] sm:$0xe]  ;;  %v10290_v40 = vld [vmem:[#allocation67_spill] sm:$0xff] }
 0x24d   :  { %4416 = vrot.lane.b32.xlu0 %v4332_v55, %s6847_s1  ;;  %v6126_v55 = vcombine.low %v1302_v46, %v6834_v59  ;;  %v3905_v59 = vrot.slane %v3903_v1, 1 }
 0x24e   :  { %v9132_v26 = vpop.permute.xlu1 %3160  ;;  %v2887_v16 = vsel %vm1706_vm6, %v2882_v5, %v2886_v35  ;;  %v3086_v31 = vor.u32 %v3085_v14, %v3081_v42  ;;  %v10284_v5 = vld [vmem:[#allocation34_spill] sm:$0xff] }
 0x24f   :  { %v9143_v38 = vpop.permute.xlu0 %3384  ;;  %v3315_v30 = vrot.slane %v6126_v55, 1  ;;  %v4474_v35 = vsel %vm4460_vm11, %v10285_v52, %v10284_v5  ;;  %v10292_v55 = vld [vmem:[#allocation54_spill] sm:$0xff]  ;;  %v3906_v52 = vor.u32 %v3905_v59, %v3901_v57 }
 0x250   :  { %4194 = vrot.lane.b32.xlu1 %v4091_v8, %s6846_s24  ;;  %v6141_v8 = vcombine.low %v1317_v15, %v9114_v3  ;;  %v3091_v39 = vsel %vm1706_vm6, %v3086_v31, %v3090_v24  ;;  %v4539_v56 = vsel %vm4525_vm12, %v4474_v35, %v10290_v40  ;;  %v1380_v15 = vld [vmem:[#allocation2 + $0x18c] sm:$0xf] }
 0x251   :  { %4418 = vrot.lane.b32.xlu0 %v4335_v50, %s6847_s1  ;;  %v1348_v50 = vld [vmem:[#allocation2 + $0xb4] sm:$0xf]  ;;  %v3317_v9 = vsel %vm2251_vm9, %v3315_v30, %v3316_v29  ;;  %v4604_v60 = vsel %vm4590_vm13, %v4539_v56, %v10291_v18  ;;  %v1430_v18 = vld [vmem:[#allocation2 + $0xa8] sm:$0xe] }
 0x252   :  { %v9151_v45 = vpop.permute.xlu1 %3162  ;;  %v3360_v17 = vrot.slane %v6141_v8, 1  ;;  %v9206_v20 = vcombine.low %v1348_v50, %v9190_v2  ;;  %v4669_v14 = vsel %vm4655_vm14, %v4604_v60, %v9110_v11  ;;  %v10294_v8 = vld [vmem:[#allocation70_spill] sm:$0xff]  ;;  %v9240_v11 = vld [vmem:[#allocation2 + $0xbc] ss:$0 sps:$4 sm:$0x11]   ;;  %v10297_v60 = vld [vmem:[#allocation83_spill] sm:$0xff] }
 0x253   :  { %v9156_v43 = vpop.permute.xlu0 %3386 }
 0x254   :  { %4448 = vrot.lane.b32.xlu1 %v4380_v4, %s6847_s1  ;;  %v6142_v4 = vcombine.low %v1318_v49, %v9135_v0  ;;  %v10286_v0 = vld [vmem:[#allocation35_spill] sm:$0xff]  ;;  %v3362_v22 = vsel %vm2251_vm9, %v3360_v17, %v3361_v34  ;;  %v3915_v24 = vshll.u32 %v9206_v20, 16  ;;  %v10295_v49 = vld [vmem:[#allocation80_spill] sm:$0xff]  ;;  %v9254_v34 = vcombine.low %v1380_v15, %v9229_v25 }
 0x255   :  { %2628 = vrot.lane.b32.xlu0 %v6077_v27, %s6842_s14  ;;  %v4476_v21 = vsel %vm4460_vm11, %v10287_v12, %v10286_v0 }
 0x256   :  { %v9162_v47 = vpop.permute.xlu1 %3416  ;;  %v3363_v53 = vrot.slane %v6142_v4, 1  ;;  %v4541_v51 = vsel %vm4525_vm12, %v4476_v21, %v10294_v8  ;;  %v3917_v21 = vrot.slane %v3915_v24, 1 }
 0x257   :  { %v9167_v41 = vpop.permute.xlu0 %3608 }
 0x258   :  { %4450 = vrot.lane.b32.xlu1 %v4383_v33, %s6847_s1  ;;  %v10289_v33 = vld [vmem:[#allocation21_spill] sm:$0xff] }
 0x259   :  { %3140 = vrot.lane.b32.xlu0 %v2887_v16, %s6843_s15  ;;  %v4506_v44 = vsel %vm4460_vm11, %v10289_v33, %v10288_v62  ;;  %v9217_v16 = vld [vmem:[#allocation2 + $0xb0] ss:$0 sps:$4 sm:$0x11]  }
 0x25a   :  { %v9170_v37 = vpop.permute.xlu1 %3418  ;;  %v4571_v30 = vsel %vm4525_vm12, %v4506_v44, %v10295_v49  ;;  %v3908_v17 = vshll.u32 %v9217_v16, 16  ;;  %v1446_v49 = vld [vmem:[#allocation2 + $0x180] sm:$0xe] }
 0x25b   :  { %v9178_v27 = vpop.permute.xlu0 %3610  ;;  %v4636_v35 = vsel %vm4590_vm13, %v4571_v30, %v9095_v58 }
 0x25c   :  { %2630 = vrot.lane.b32.xlu1 %v6078_v28, %s6842_s14  ;;  %v1378_v28 = vld [vmem:[#allocation2 + $0x180] sm:$0xf]  ;;  %v4701_v62 = vsel %vm4655_vm14, %v4636_v35, %v9132_v26  ;;  %v3910_v44 = vrot.slane %v3908_v17, 1  ;;  %v4340_v35 = vrot.slane %v9240_v11, 1 }
 0x25d   :  { %3142 = vrot.lane.b32.xlu0 %v2899_v63, %s6843_s15  ;;  %v9224_v42 = vcombine.low %v1378_v28, %v9196_v13  ;;  %v10293_v63 = vld [vmem:[#allocation22_spill] sm:$0xff] }
 0x25e   :  { %v9185_v6 = vpop.permute.xlu1 %3640  ;;  %v4508_v23 = vsel %vm4460_vm11, %v10293_v63, %v10292_v55  ;;  %v9256_v28 = vld [vmem:[#allocation2 + $0x188] ss:$0 sps:$4 sm:$0x11]   ;;  %v3911_v55 = vsel %vm1706_vm6, %v3906_v52, %v3910_v44  ;;  %v6221_v63 = vcombine.low %v1430_v18, %v9173_v61 }
 0x25f   :  { %v4153_v3 = vpop.permute.xlu0 %4152  ;;  %v4095_v1 = vshll.u32 %v9224_v42, 16  ;;  %v4093_v58 = vshrl.u32 %v9224_v42, 16  ;;  %v4573_v26 = vsel %vm4525_vm12, %v4508_v23, %v10297_v60  ;;  %v9350_v60 = vld [vmem:[#allocation2 + $0xc8] ss:$0 sps:$4 sm:$0x11]  }
 0x260   :  { %3172 = vrot.lane.b32.xlu1 %v3079_v48, %s6843_s15  ;;  %v4734_v48 = vsel %vm4720_vm15, %v4669_v14, %v9143_v38 }
 0x261   :  { %3396 = vrot.lane.b32.xlu0 %v3314_v19, %s6844_s16  ;;  %v10296_v19 = vld [vmem:[#allocation95_spill] sm:$0xff]  ;;  %v4799_v50 = vsel %vm4785_vm1, %v4734_v48, %v9167_v41  ;;  %v4097_v56 = vrot.slane %v4095_v1, 1  ;;  %v4105_v48 = vshrl.u32 %v9254_v34, 16  ;;  %v1253_v1 = vld [vmem:[#allocation2 + $0x18c] sm:$0xf] }
 0x262   :  { %v9202_v36 = vpop.permute.xlu1 %3642  ;;  %v4606_v29 = vsel %vm4590_vm13, %v4541_v51, %v10296_v19  ;;  %v4864_v38 = vsel %vm4850_vm2, %v4799_v50, %v4153_v3  ;;  %v3913_v3 = vshrl.u32 %v9206_v20, 16  ;;  %v1431_v51 = vld [vmem:[#allocation2 + $0xb4] sm:$0xe]  ;;  %v4336_v19 = vrot.slane %v6221_v63, 1 }
 0x263   :  { %v4155_v46 = vpop.permute.xlu0 %4154  ;;  %v4671_v5 = vsel %vm4655_vm14, %v4606_v29, %v9125_v54  ;;  %v3920_v54 = vshll.u32 %v9240_v11, 16  ;;  %v4098_v23 = vor.u32 %v4097_v56, %v4093_v58  ;;  %v4337_v29 = vrot.slane %v9217_v16, 1  ;;  %v10298_v16 = vld [vmem:[#allocation52_spill] sm:$0xff] }
 0x264   :  { %3174 = vrot.lane.b32.xlu1 %v3091_v39, %s6843_s15  ;;  %v3365_v39 = vsel %vm2251_vm9, %v3363_v53, %v3364_v7  ;;  %v4736_v0 = vsel %vm4720_vm15, %v4671_v5, %v9156_v43  ;;  %v4766_v43 = vsel %vm4720_vm15, %v4701_v62, %v9162_v47  ;;  %v9286_v7 = vld [vmem:[#allocation2 + $0x194] ss:$0 sps:$4 sm:$0x11]   ;;  %v4107_v47 = vshll.u32 %v9254_v34, 16  ;;  %v9324_v5 = vld [vmem:[#allocation2 + $0x190] sm:$0xf] }
 0x265   :  { %3398 = vrot.lane.b32.xlu0 %v3317_v9, %s6844_s16  ;;  %v4801_v33 = vsel %vm4785_vm1, %v4736_v0, %v9178_v27  ;;  %v4100_v9 = vshll.u32 %v9256_v28, 16  ;;  %v4831_v27 = vsel %vm4785_vm1, %v4766_v43, %v9185_v6  ;;  %v3918_v15 = vor.u32 %v3917_v21, %v3913_v3  ;;  %v9332_v0 = vld [vmem:[#allocation2 + $0xbc] ss:$0 sps:$4 sm:$0x11]   ;;  %v1255_v11 = vld [vmem:[#allocation2 + $0x198] sm:$0xf] }
 0x266   :  { %v4185_v31 = vpop.permute.xlu1 %4184  ;;  %v4866_v40 = vsel %vm4850_vm2, %v4801_v33, %v4155_v46  ;;  %v4638_v46 = vsel %vm4590_vm13, %v4573_v26, %v9116_v10  ;;  %v3922_v57 = vrot.slane %v3920_v54, 1  ;;  %v4112_v61 = vshll.u32 %v9286_v7, 16  ;;  %v9345_v43 = vld [vmem:[#allocation2 + $0x19c] sm:$0xf] }
 0x267   :  { %v4409_v4 = vpop.permute.xlu0 %4408  ;;  %v4896_v14 = vsel %vm4850_vm2, %v4831_v27, %v4185_v31  ;;  %v4703_v6 = vsel %vm4655_vm14, %v4638_v46, %v9151_v45  ;;  %v4102_v8 = vrot.slane %v4100_v9, 1  ;;  %v4109_v31 = vrot.slane %v4107_v47, 1  ;;  %v9358_v46 = vld [vmem:[#allocation2 + $0x194] ss:$0 sps:$4 sm:$0x11]  }
 0x268   :  { %3428 = vrot.lane.b32.xlu1 %v3362_v22, %s6844_s16  ;;  %v4929_v41 = vsel %vm4915_vm3, %v4864_v38, %v4409_v4  ;;  %v4768_v10 = vsel %vm4720_vm15, %v4703_v6, %v9170_v37  ;;  %v4114_v4 = vrot.slane %v4112_v61, 1  ;;  %v4338_v52 = vsel %vm2251_vm9, %v4336_v19, %v4337_v29 }
 0x269   :  { %3620 = vrot.lane.b32.xlu0 %v9183_v32, %s6845_s19  ;;  %6459 = vmatprep.mubr.msk.bf16.mxu0 %vm5000_vm4, %v4929_v41  ;;  %v4833_v45 = vsel %vm4785_vm1, %v4768_v10, %v9202_v36  ;;  %v6222_v36 = vcombine.low %v1431_v51, %v9190_v2  ;;  %v4103_v17 = vsel %vm1706_vm6, %v4098_v23, %v4102_v8  ;;  %v1447_v2 = vld [vmem:[#allocation2 + $0x18c] sm:$0xe]  ;;  %v4385_v62 = vrot.slane %v9256_v28, 1  ;;  %v9370_v51 = vld [vmem:[#allocation2 + $0x1a0] ss:$0 sps:$4 sm:$0x11]  }
 0x26a   :  { %v4187_v12 = vpop.permute.xlu1 %4186  ;;  %v4110_v38 = vor.u32 %v4109_v31, %v4105_v48  ;;  %v6238_v33 = vcombine.low %v1447_v2, %v9229_v25  ;;  %v2901_v44 = vshrl.u32 %v10298_v16, 16  ;;  %v2908_v18 = vshll.u32 %v9332_v0, 16  ;;  %v6835_v31 = vld [vmem:[#allocation2 + $0xb8] sm:$0xf]  ;;  %v9383_v2 = vld [vmem:[#allocation2 + $0xc4] sm:$0xf] }
 0x26b   :  { %v4411_v32 = vpop.permute.xlu0 %4410  ;;  %v4898_v37 = vsel %vm4850_vm2, %v4833_v45, %v4187_v12  ;;  %v4339_v3 = vrot.slane %v6222_v36, 1  ;;  %v6079_v12 = vcombine.low %v1253_v1, %v9324_v5  ;;  %v6080_v47 = vcombine.low %v1255_v11, %v9345_v43  ;;  %v1350_v1 = vld [vmem:[#allocation2 + $0xc0] sm:$0xf] }
 0x26c   :  { %3430 = vrot.lane.b32.xlu1 %v3365_v39, %s6844_s16  ;;  %v4931_v53 = vsel %vm4915_vm3, %v4866_v40, %v4411_v32  ;;  %v6237_v39 = vcombine.low %v1446_v49, %v9196_v13  ;;  %v4115_v21 = vsel %vm1706_vm6, %v4110_v38, %v4114_v4  ;;  %v10299_v32 = vld [vmem:[#allocation56_spill] sm:$0xff]  ;;  %v4387_v27 = vrot.slane %v6238_v33, 1  ;;  %v1304_v49 = vld [vmem:[#allocation2 + $0xc0] sm:$0xe]  ;;  %v1319_v4 = vld [vmem:[#allocation2 + $0x18c] sm:$0xe] }
 0x26d   :  { %3622 = vrot.lane.b32.xlu0 %v9206_v20, %s6845_s19  ;;  %6460 = vmatmul.mubr.msk.bf16.gmra.mrb[12].mxu0 %vm5000_vm4, %v4931_v53  ;;  %v2915_v56 = vshll.u32 %v10299_v32, 16  ;;  %v4341_v9 = vsel %vm2251_vm9, %v4339_v3, %v4340_v35  ;;  %v3095_v28 = vshll.u32 %v6079_v12, 16  ;;  %v4388_v53 = vrot.slane %v9286_v7, 1 }
 0x26e   :  { %v4441_v22 = vpop.permute.xlu1 %4440  ;;  %v4384_v54 = vrot.slane %v6237_v39, 1  ;;  %v2910_v6 = vrot.slane %v2908_v18, 1  ;;  %v3093_v7 = vshrl.u32 %v6079_v12, 16  ;;  %v3100_v8 = vshll.u32 %v9358_v46, 16  ;;  %v9400_v18 = vld [vmem:[#allocation2 + $0xd0] sm:$0xf] }
 0x26f   :  { %v4961_v59 = vsel %vm4915_vm3, %v4896_v14, %v4441_v22  ;;  %v9305_v20 = vpop.permute.xlu0 %2620  ;;  %v2913_v14 = vshrl.u32 %v10299_v32, 16  ;;  %v3097_v10 = vrot.slane %v3095_v28, 1  ;;  %v4389_v23 = vsel %vm2251_vm9, %v4387_v27, %v4388_v53 }
 0x270   :  { %3652 = vrot.lane.b32.xlu1 %v9224_v42, %s6845_s19  ;;  %6491 = vmatprep.mubr.msk.bf16.mxu1 %vm5000_vm4, %v4961_v59  ;;  %v3923_v42 = vsel %vm1706_vm6, %v3918_v15, %v3922_v57  ;;  %v4386_v26 = vsel %vm2251_vm9, %v4384_v54, %v4385_v62  ;;  %v2917_v15 = vrot.slane %v2915_v56, 1  ;;  %v2920_v59 = vshll.u32 %v9350_v60, 16 }
 0x271   :  { %4164 = vrot.lane.b32.xlu0 %v3911_v55, %s6846_s24  ;;  %v1303_v55 = vld [vmem:[#allocation2 + $0xb4] sm:$0xe]  ;;  %v3107_v45 = vshll.u32 %v6080_v47, 16  ;;  %v3098_v19 = vor.u32 %v3097_v10, %v3093_v7  ;;  %v3102_v29 = vrot.slane %v3100_v8, 1  ;;  %v3105_v36 = vshrl.u32 %v6080_v47, 16  ;;  %v10303_v7 = vld [vmem:[#allocation10_spill] sm:$0xff] }
 0x272   :  { %v4443_v24 = vpop.permute.xlu1 %4442  ;;  %v6127_v61 = vcombine.low %v1303_v55, %v6835_v31  ;;  %v3112_v38 = vshll.u32 %v9370_v51, 16  ;;  %v3319_v35 = vrot.slane %v9332_v0, 1  ;;  %v9393_v11 = vcombine.low %v1350_v1, %v9383_v2  ;;  %v10304_v10 = vld [vmem:[#allocation55_spill] sm:$0xff]  ;;  %v9439_v1 = vld [vmem:[#allocation2 + $0x1a8] sm:$0xf] }
 0x273   :  { %v4963_v30 = vsel %vm4915_vm3, %v4898_v37, %v4443_v24  ;;  %v9320_v50 = vpop.permute.xlu0 %3132  ;;  %v2918_v24 = vor.u32 %v2917_v15, %v2913_v14  ;;  %v3103_v54 = vsel %vm1706_vm6, %v3098_v19, %v3102_v29  ;;  %v3322_v56 = vrot.slane %v9350_v60, 1  ;;  %v9406_v14 = vld [vmem:[#allocation2 + $0x19c] sm:$0xf]  ;;  %v10301_v60 = vld [vmem:[#allocation9_spill] sm:$0xff] }
 0x274   :  { %3654 = vrot.lane.b32.xlu1 %v9254_v34, %s6845_s19  ;;  %6492 = vmatmul.mubr.msk.bf16.gmra.mrb[12].mxu1 %vm5000_vm4, %v4963_v30  ;;  %v2903_v34 = vshll.u32 %v10298_v16, 16  ;;  %v3318_v16 = vrot.slane %v6127_v61, 1  ;;  %v3114_v33 = vrot.slane %v3112_v38, 1  ;;  %v3367_v53 = vrot.slane %v9358_v46, 1 }
 0x275   :  { %4166 = vrot.lane.b32.xlu0 %v3923_v42, %s6846_s24  ;;  %v2922_v42 = vrot.slane %v2920_v59, 1  ;;  %v3927_v15 = vshll.u32 %v9393_v11, 16  ;;  %v3370_v29 = vrot.slane %v9370_v51, 1 }
 0x276   :  { %v9326_v41 = vpop.permute.xlu1 %2622  ;;  %v2905_v40 = vrot.slane %v2903_v34, 1  ;;  %v6836_v34 = vld [vmem:[#allocation2 + $0xc4] sm:$0xf]  ;;  %v3320_v0 = vsel %vm2251_vm9, %v3318_v16, %v3319_v35  ;;  %v3925_v16 = vshrl.u32 %v9393_v11, 16 }
 0x277   :  { %v9335_v13 = vpop.permute.xlu0 %3134  ;;  %v2923_v3 = vsel %vm1706_vm6, %v2918_v24, %v2922_v42  ;;  %v10307_v24 = vld [vmem:[#allocation94_spill] sm:$0xff] }
 0x278   :  { %4196 = vrot.lane.b32.xlu1 %v4103_v17, %s6846_s24  ;;  %v2906_v57 = vor.u32 %v2905_v40, %v2901_v44  ;;  %v3109_v17 = vrot.slane %v3107_v45, 1  ;;  %v1320_v44 = vld [vmem:[#allocation2 + $0x198] sm:$0xe]  ;;  %v10306_v45 = vld [vmem:[#allocation69_spill] sm:$0xff] }
 0x279   :  { %4420 = vrot.lane.b32.xlu0 %v4338_v52, %s6847_s1  ;;  %v6128_v52 = vcombine.low %v1304_v49, %v6836_v34  ;;  %v3929_v34 = vrot.slane %v3927_v15, 1 }
 0x27a   :  { %v9342_v58 = vpop.permute.xlu1 %3164  ;;  %v2911_v37 = vsel %vm1706_vm6, %v2906_v57, %v2910_v6  ;;  %v3110_v62 = vor.u32 %v3109_v17, %v3105_v36  ;;  %v10300_v57 = vld [vmem:[#allocation36_spill] sm:$0xff] }
 0x27b   :  { %v9353_v25 = vpop.permute.xlu0 %3388  ;;  %v3321_v32 = vrot.slane %v6128_v52, 1  ;;  %v4478_v6 = vsel %vm4460_vm11, %v10301_v60, %v10300_v57  ;;  %v10308_v52 = vld [vmem:[#allocation57_spill] sm:$0xff]  ;;  %v3930_v60 = vor.u32 %v3929_v34, %v3925_v16 }
 0x27c   :  { %4198 = vrot.lane.b32.xlu1 %v4115_v21, %s6846_s24  ;;  %v6143_v21 = vcombine.low %v1319_v4, %v9324_v5  ;;  %v3115_v27 = vsel %vm1706_vm6, %v3110_v62, %v3114_v33  ;;  %v4543_v31 = vsel %vm4525_vm12, %v4478_v6, %v10306_v45  ;;  %v1384_v4 = vld [vmem:[#allocation2 + $0x1a4] sm:$0xf] }
 0x27d   :  { %4422 = vrot.lane.b32.xlu0 %v4341_v9, %s6847_s1  ;;  %v1352_v9 = vld [vmem:[#allocation2 + $0xcc] sm:$0xf]  ;;  %v3323_v61 = vsel %vm2251_vm9, %v3321_v32, %v3322_v56  ;;  %v4608_v42 = vsel %vm4590_vm13, %v4543_v31, %v10307_v24  ;;  %v1432_v24 = vld [vmem:[#allocation2 + $0xc0] sm:$0xe] }
 0x27e   :  { %v9361_v22 = vpop.permute.xlu1 %3166  ;;  %v3366_v28 = vrot.slane %v6143_v21, 1  ;;  %v9416_v55 = vcombine.low %v1352_v9, %v9400_v18  ;;  %v4673_v17 = vsel %vm4655_vm14, %v4608_v42, %v9320_v50  ;;  %v10310_v21 = vld [vmem:[#allocation72_spill] sm:$0xff]  ;;  %v9450_v50 = vld [vmem:[#allocation2 + $0xd4] ss:$0 sps:$4 sm:$0x11]   ;;  %v10313_v42 = vld [vmem:[#allocation85_spill] sm:$0xff] }
 0x27f   :  { %v9366_v63 = vpop.permute.xlu0 %3390 }
 0x280   :  { %4452 = vrot.lane.b32.xlu1 %v4386_v26, %s6847_s1  ;;  %v6144_v26 = vcombine.low %v1320_v44, %v9345_v43  ;;  %v10302_v43 = vld [vmem:[#allocation37_spill] sm:$0xff]  ;;  %v3368_v38 = vsel %vm2251_vm9, %v3366_v28, %v3367_v53  ;;  %v3939_v33 = vshll.u32 %v9416_v55, 16  ;;  %v10311_v44 = vld [vmem:[#allocation82_spill] sm:$0xff]  ;;  %v9464_v53 = vcombine.low %v1384_v4, %v9439_v1 }
 0x281   :  { %2632 = vrot.lane.b32.xlu0 %v6079_v12, %s6842_s14  ;;  %v4480_v46 = vsel %vm4460_vm11, %v10303_v7, %v10302_v43 }
 0x282   :  { %v9372_v48 = vpop.permute.xlu1 %3420  ;;  %v3369_v19 = vrot.slane %v6144_v26, 1  ;;  %v4545_v51 = vsel %vm4525_vm12, %v4480_v46, %v10310_v21  ;;  %v3941_v46 = vrot.slane %v3939_v33, 1 }
 0x283   :  { %v9377_v30 = vpop.permute.xlu0 %3612 }
 0x284   :  { %4454 = vrot.lane.b32.xlu1 %v4389_v23, %s6847_s1  ;;  %v10305_v23 = vld [vmem:[#allocation23_spill] sm:$0xff] }
 0x285   :  { %3144 = vrot.lane.b32.xlu0 %v2911_v37, %s6843_s15  ;;  %v4510_v8 = vsel %vm4460_vm11, %v10305_v23, %v10304_v10  ;;  %v9427_v37 = vld [vmem:[#allocation2 + $0xc8] ss:$0 sps:$4 sm:$0x11]  }
 0x286   :  { %v9380_v39 = vpop.permute.xlu1 %3422  ;;  %v4575_v32 = vsel %vm4525_vm12, %v4510_v8, %v10311_v44  ;;  %v3932_v28 = vshll.u32 %v9427_v37, 16  ;;  %v1448_v44 = vld [vmem:[#allocation2 + $0x198] sm:$0xe] }
 0x287   :  { %v9388_v12 = vpop.permute.xlu0 %3614  ;;  %v4640_v6 = vsel %vm4590_vm13, %v4575_v32, %v9305_v20 }
 0x288   :  { %2634 = vrot.lane.b32.xlu1 %v6080_v47, %s6842_s14  ;;  %v1382_v47 = vld [vmem:[#allocation2 + $0x198] sm:$0xf]  ;;  %v4705_v10 = vsel %vm4655_vm14, %v4640_v6, %v9342_v58  ;;  %v3934_v8 = vrot.slane %v3932_v28, 1 }
 0x289   :  { %3146 = vrot.lane.b32.xlu0 %v2923_v3, %s6843_s15  ;;  %v9434_v36 = vcombine.low %v1382_v47, %v9406_v14  ;;  %v10309_v3 = vld [vmem:[#allocation24_spill] sm:$0xff]  ;;  %v9466_v47 = vld [vmem:[#allocation2 + $0x1a0] ss:$0 sps:$4 sm:$0x11]  }
 0x28a   :  { %v9395_v40 = vpop.permute.xlu1 %3644  ;;  %v4512_v35 = vsel %vm4460_vm11, %v10309_v3, %v10308_v52  ;;  %v3935_v52 = vsel %vm1706_vm6, %v3930_v60, %v3934_v8  ;;  %v6223_v3 = vcombine.low %v1432_v24, %v9383_v2  ;;  %v4391_v6 = vrot.slane %v9466_v47, 1  ;;  %v10315_v24 = vld [vmem:[#allocation11_spill] sm:$0xff] }
 0x28b   :  { %v4157_v5 = vpop.permute.xlu0 %4156  ;;  %v4119_v15 = vshll.u32 %v9434_v36, 16  ;;  %v4117_v20 = vshrl.u32 %v9434_v36, 16  ;;  %v4577_v58 = vsel %vm4525_vm12, %v4512_v35, %v10313_v42 }
 0x28c   :  { %3176 = vrot.lane.b32.xlu1 %v3103_v54, %s6843_s15  ;;  %v4738_v54 = vsel %vm4720_vm15, %v4673_v17, %v9353_v25 }
 0x28d   :  { %3400 = vrot.lane.b32.xlu0 %v3320_v0, %s6844_s16  ;;  %v10312_v0 = vld [vmem:[#allocation97_spill] sm:$0xff]  ;;  %v4803_v9 = vsel %vm4785_vm1, %v4738_v54, %v9377_v30  ;;  %v4121_v31 = vrot.slane %v4119_v15, 1  ;;  %v4129_v54 = vshrl.u32 %v9464_v53, 16 }
 0x28e   :  { %v9412_v59 = vpop.permute.xlu1 %3646  ;;  %v4610_v56 = vsel %vm4590_vm13, %v4545_v51, %v10312_v0  ;;  %v4868_v25 = vsel %vm4850_vm2, %v4803_v9, %v4157_v5  ;;  %v3937_v5 = vshrl.u32 %v9416_v55, 16  ;;  %v1433_v51 = vld [vmem:[#allocation2 + $0xcc] sm:$0xe]  ;;  %v4342_v0 = vrot.slane %v6223_v3, 1 }
 0x28f   :  { %v4159_v49 = vpop.permute.xlu0 %4158  ;;  %v4675_v57 = vsel %vm4655_vm14, %v4610_v56, %v9335_v13  ;;  %v3944_v13 = vshll.u32 %v9450_v50, 16  ;;  %v4122_v35 = vor.u32 %v4121_v31, %v4117_v20  ;;  %v4343_v56 = vrot.slane %v9427_v37, 1 }
 0x290   :  { %3178 = vrot.lane.b32.xlu1 %v3115_v27, %s6843_s15  ;;  %v3371_v27 = vsel %vm2251_vm9, %v3369_v19, %v3370_v29  ;;  %v4740_v43 = vsel %vm4720_vm15, %v4675_v57, %v9366_v63  ;;  %v4770_v63 = vsel %vm4720_vm15, %v4705_v10, %v9372_v48  ;;  %v9496_v29 = vld [vmem:[#allocation2 + $0x1ac] ss:$0 sps:$4 sm:$0x11]   ;;  %v4131_v48 = vshll.u32 %v9464_v53, 16  ;;  %v1449_v57 = vld [vmem:[#allocation2 + $0x1a4] sm:$0xe] }
 0x291   :  { %3402 = vrot.lane.b32.xlu0 %v3323_v61, %s6844_s16  ;;  %v4805_v23 = vsel %vm4785_vm1, %v4740_v43, %v9388_v12  ;;  %v4124_v61 = vshll.u32 %v9466_v47, 16  ;;  %v4835_v12 = vsel %vm4785_vm1, %v4770_v63, %v9395_v40  ;;  %v3942_v4 = vor.u32 %v3941_v46, %v3937_v5 }
 0x292   :  { %v4189_v62 = vpop.permute.xlu1 %4188  ;;  %v4870_v45 = vsel %vm4850_vm2, %v4805_v23, %v4159_v49  ;;  %v4642_v49 = vsel %vm4590_vm13, %v4577_v58, %v9326_v41  ;;  %v3946_v16 = vrot.slane %v3944_v13, 1  ;;  %v4136_v2 = vshll.u32 %v9496_v29, 16 }
 0x293   :  { %v4413_v26 = vpop.permute.xlu0 %4412  ;;  %v4900_v17 = vsel %vm4850_vm2, %v4835_v12, %v4189_v62  ;;  %v4707_v40 = vsel %vm4655_vm14, %v4642_v49, %v9361_v22  ;;  %v4126_v21 = vrot.slane %v4124_v61, 1  ;;  %v4133_v62 = vrot.slane %v4131_v48, 1  ;;  %v10314_v61 = vld [vmem:[#allocation38_spill] sm:$0xff]  ;;  %v10316_v12 = vld [vmem:[#allocation71_spill] sm:$0xff] }
 0x294   :  { %3432 = vrot.lane.b32.xlu1 %v3368_v38, %s6844_s16  ;;  %v4933_v30 = vsel %vm4915_vm3, %v4868_v25, %v4413_v26  ;;  %v4772_v41 = vsel %vm4720_vm15, %v4707_v40, %v9380_v39  ;;  %v4138_v26 = vrot.slane %v4136_v2, 1  ;;  %v4344_v37 = vsel %vm2251_vm9, %v4342_v0, %v4343_v56  ;;  %v10327_v56 = vld [vmem:[#allocation87_spill] sm:$0xff] }
 0x295   :  { %3624 = vrot.lane.b32.xlu0 %v9393_v11, %s6845_s19  ;;  %6463 = vmatprep.mubr.msk.bf16.mxu0 %vm5000_vm4, %v4933_v30  ;;  %v4837_v22 = vsel %vm4785_vm1, %v4772_v41, %v9412_v59  ;;  %v6224_v59 = vcombine.low %v1433_v51, %v9400_v18  ;;  %v4127_v28 = vsel %vm1706_vm6, %v4122_v35, %v4126_v21  ;;  %v4346_v30 = vrot.slane %v9450_v50, 1  ;;  %v9568_v35 = vld [vmem:[%s10105_s2] ss:$0 sm:$0xff]  ;;  %v10321_v21 = vld [vmem:[#allocation58_spill] sm:$0xff] }
 0x296   :  { %v4191_v7 = vpop.permute.xlu1 %4190  ;;  %v4134_v25 = vor.u32 %v4133_v62, %v4129_v54  ;;  %v4394_v10 = vrot.slane %v9496_v29, 1  ;;  %v4482_v42 = vsel %vm4460_vm11, %v10315_v24, %v10314_v61  ;;  %v10317_v29 = vld [vmem:[#allocation96_spill] sm:$0xff]  ;;  %v10322_v51 = vld [vmem:[#allocation25_spill] sm:$0xff]  ;;  %v10323_v54 = vld [vmem:[#allocation59_spill] sm:$0xff] }
 0x297   :  { %v4415_v11 = vpop.permute.xlu0 %4414  ;;  %v4902_v39 = vsel %vm4850_vm2, %v4837_v22, %v4191_v7  ;;  %v4345_v18 = vrot.slane %v6224_v59, 1  ;;  %v4514_v22 = vsel %vm4460_vm11, %v10322_v51, %v10321_v21  ;;  %v10324_v62 = vld [vmem:[#allocation26_spill] sm:$0xff] }
 0x298   :  { %3434 = vrot.lane.b32.xlu1 %v3371_v27, %s6844_s16  ;;  %v4935_v19 = vsel %vm4915_vm3, %v4870_v45, %v4415_v11  ;;  %v6239_v27 = vcombine.low %v1448_v44, %v9406_v14  ;;  %v4139_v60 = vsel %vm1706_vm6, %v4134_v25, %v4138_v26  ;;  %v6240_v14 = vcombine.low %v1449_v57, %v9439_v1  ;;  %v9588_v26 = vld [vmem:[%s10106_s3] ss:$0 sm:$0xff] }
 0x299   :  { %3626 = vrot.lane.b32.xlu0 %v9416_v55, %s6845_s19  ;;  %6464 = vmatmul.mubr.msk.bf16.gmra.mrb[16].mxu0 %vm5000_vm4, %v4935_v19  ;;  %v4347_v7 = vsel %vm2251_vm9, %v4345_v18, %v4346_v30  ;;  %v4547_v19 = vsel %vm4525_vm12, %v4482_v42, %v10316_v12  ;;  %v4516_v2 = vsel %vm4460_vm11, %v10324_v62, %v10323_v54 }
 0x29a   :  { %v4445_v38 = vpop.permute.xlu1 %4444  ;;  %v4390_v5 = vrot.slane %v6239_v27, 1  ;;  %v4393_v13 = vrot.slane %v6240_v14, 1  ;;  %v4612_v48 = vsel %vm4590_vm13, %v4547_v19, %v10317_v29  ;;  %v4581_v59 = vsel %vm4525_vm12, %v4516_v2, %v10327_v56 }
 0x29b   :  { %v4965_v34 = vsel %vm4915_vm3, %v4900_v17, %v4445_v38  ;;  %v9515_v55 = vpop.permute.xlu0 %2624  ;;  %v10318_v38 = vld [vmem:[#allocation39_spill] sm:$0xff] }
 0x29c   :  { %3656 = vrot.lane.b32.xlu1 %v9434_v36, %s6845_s19  ;;  %6495 = vmatprep.mubr.msk.bf16.mxu1 %vm5000_vm4, %v4965_v34  ;;  %v3947_v36 = vsel %vm1706_vm6, %v3942_v4, %v3946_v16  ;;  %v4392_v50 = vsel %vm2251_vm9, %v4390_v5, %v4391_v6  ;;  %v4395_v1 = vsel %vm2251_vm9, %v4393_v13, %v4394_v10  ;;  %v10319_v4 = vld [vmem:[#allocation12_spill] sm:$0xff] }
 0x29d   :  { %4168 = vrot.lane.b32.xlu0 %v3935_v52, %s6846_s24  ;;  %v4484_v16 = vsel %vm4460_vm11, %v10319_v4, %v10318_v38  ;;  %v10320_v52 = vld [vmem:[#allocation74_spill] sm:$0xff] }
 0x29e   :  { %v4447_v33 = vpop.permute.xlu1 %4446  ;;  %v4549_v3 = vsel %vm4525_vm12, %v4484_v16, %v10320_v52 }
 0x29f   :  { %v4967_v32 = vsel %vm4915_vm3, %v4902_v39, %v4447_v33  ;;  %v3137_v9 = vpop.permute.xlu0 %3136  ;;  %v10325_v39 = vld [vmem:[#allocation99_spill] sm:$0xff] }
 0x2a0   :  { %3658 = vrot.lane.b32.xlu1 %v9464_v53, %s6845_s19  ;;  %6496 = vmatmul.mubr.msk.bf16.gmra.mrb[16].mxu1 %vm5000_vm4, %v4967_v32  ;;  %v4677_v17 = vsel %vm4655_vm14, %v4612_v48, %v3137_v9  ;;  %v4614_v33 = vsel %vm4590_vm13, %v4549_v3, %v10325_v39  ;;  %v10326_v32 = vld [vmem:[#allocation84_spill] sm:$0xff] }
 0x2a1   :  { %4170 = vrot.lane.b32.xlu0 %v3947_v36, %s6846_s24  ;;  %v4579_v0 = vsel %vm4525_vm12, %v4514_v22, %v10326_v32 }
 0x2a2   :  { %v9532_v15 = vpop.permute.xlu1 %2626  ;;  %v4644_v27 = vsel %vm4590_vm13, %v4579_v0, %v9515_v55 }
 0x2a3   :  { %v3139_v53 = vpop.permute.xlu0 %3138 }
 0x2a4   :  { %4200 = vrot.lane.b32.xlu1 %v4127_v28, %s6846_s24  ;;  %v4679_v9 = vsel %vm4655_vm14, %v4614_v33, %v3139_v53  ;;  %v4646_v53 = vsel %vm4590_vm13, %v4581_v59, %v9532_v15 }
 0x2a5   :  { %4424 = vrot.lane.b32.xlu0 %v4344_v37, %s6847_s1 }
 0x2a6   :  { %v3169_v43 = vpop.permute.xlu1 %3168 }
 0x2a7   :  { %v3393_v46 = vpop.permute.xlu0 %3392 }
 0x2a8   :  { %4202 = vrot.lane.b32.xlu1 %v4139_v60, %s6846_s24  ;;  %v4742_v40 = vsel %vm4720_vm15, %v4677_v17, %v3393_v46  ;;  %v4709_v60 = vsel %vm4655_vm14, %v4644_v27, %v3169_v43 }
 0x2a9   :  { %4426 = vrot.lane.b32.xlu0 %v4347_v7, %s6847_s1 }
 0x2aa   :  { %v3171_v23 = vpop.permute.xlu1 %3170 }
 0x2ab   :  { %v3395_v47 = vpop.permute.xlu0 %3394 }
 0x2ac   :  { %4456 = vrot.lane.b32.xlu1 %v4392_v50, %s6847_s1  ;;  %v4744_v57 = vsel %vm4720_vm15, %v4679_v9, %v3395_v47 }
 0x2ae   :  { %v3425_v8 = vpop.permute.xlu1 %3424 }
 0x2af   :  { %v3617_v20 = vpop.permute.xlu0 %3616  ;;  %v4774_v55 = vsel %vm4720_vm15, %v4709_v60, %v3425_v8 }
 0x2b0   :  { %4458 = vrot.lane.b32.xlu1 %v4395_v1, %s6847_s1  ;;  %v4807_v41 = vsel %vm4785_vm1, %v4742_v40, %v3617_v20  ;;  %v4711_v20 = vsel %vm4655_vm14, %v4646_v53, %v3171_v23 }
 0x2b2   :  { %v3427_v63 = vpop.permute.xlu1 %3426 }
 0x2b3   :  { %v3619_v45 = vpop.permute.xlu0 %3618  ;;  %v4776_v24 = vsel %vm4720_vm15, %v4711_v20, %v3427_v63  ;;  %v10329_v20 = vld [vmem:[#allocation13_spill] sm:$0xff] }
 0x2b4   :  { %v4809_v5 = vsel %vm4785_vm1, %v4744_v57, %v3619_v45 }
 0x2b6   :  { %v3649_v11 = vpop.permute.xlu1 %3648 }
 0x2b7   :  { %v4161_v31 = vpop.permute.xlu0 %4160  ;;  %v4839_v47 = vsel %vm4785_vm1, %v4774_v55, %v3649_v11 }
 0x2b8   :  { %v4872_v36 = vsel %vm4850_vm2, %v4807_v41, %v4161_v31 }
 0x2ba   :  { %v3651_v58 = vpop.permute.xlu1 %3650 }
 0x2bb   :  { %v4163_v49 = vpop.permute.xlu0 %4162  ;;  %v4841_v29 = vsel %vm4785_vm1, %v4776_v24, %v3651_v58 }
 0x2bc   :  { %v4874_v7 = vsel %vm4850_vm2, %v4809_v5, %v4163_v49 }
 0x2be   :  { %v4193_v34 = vpop.permute.xlu1 %4192 }
 0x2bf   :  { %v4417_v44 = vpop.permute.xlu0 %4416  ;;  %v4904_v8 = vsel %vm4850_vm2, %v4839_v47, %v4193_v34 }
 0x2c0   :  { %v4937_v28 = vsel %vm4915_vm3, %v4872_v36, %v4417_v44  ;;  %v6449_v25 = vpop.f32.mrb[0].mxu0 }
 0x2c1   :  { %v5367_v18 = vmul.f32 %v6449_v25, %v9568_v35  ;;  %v5103_v30 = vpop.f32.mrb[1].mxu0  ;;  %6467 = vmatprep.mubr.msk.bf16.mxu0 %vm5000_vm4, %v4937_v28 }
 0x2c2   :  { %v4195_v37 = vpop.permute.xlu1 %4194  ;;  %v5365_v6 = vmul.f32 %v9568_v35, %v5103_v30  ;;  %v6450_v14 = vpop.f32.mrb[2].mxu0 }
 0x2c3   :  { %v5438_v46 = vadd.f32 %v9588_v26, %v5367_v18  ;;  %v5368_v50 = vmul.f32 %v6450_v14, %v9568_v35  ;;  %v5106_v13 = vpop.f32.mrb[3].mxu0  ;;  %v4419_v10 = vpop.permute.xlu0 %4418  ;;  %v4906_v4 = vsel %vm4850_vm2, %v4841_v29, %v4195_v37 }
 0x2c4   :  { %v5436_v15 = vadd.f32 %v9588_v26, %v5365_v6  ;;  %v5366_v43 = vmul.f32 %v9568_v35, %v5106_v13  ;;  %v4939_v1 = vsel %vm4915_vm3, %v4874_v7, %v4419_v10 }
 0x2c5   :  { %v5502_v45 = vmul.f32 0.1, %v5438_v46  ;;  %v5439_v31 = vadd.f32 %v9588_v26, %v5368_v50  ;;  %6468 = vmatmul.mubr.msk.bf16.gmra.mrb[20].mxu0 %vm5000_vm4, %v4939_v1  ;;  %v10328_v1 = vld [vmem:[#allocation40_spill] sm:$0xff] }
 0x2c6   :  { %v4449_v61 = vpop.permute.xlu1 %4448  ;;  %v5500_v42 = vmul.f32 0.1, %v5436_v15  ;;  %v5437_v12 = vadd.f32 %v9588_v26, %v5366_v43 }
 0x2c7   :  { %v4969_v11 = vsel %vm4915_vm3, %v4904_v8, %v4449_v61  ;;  %v6481_v19 = vpop.f32.mrb[0].mxu1  ;;  %v5566_v48 = vmax.f32 %v5438_v46, %v5502_v45  ;;  %v5503_v23 = vmul.f32 0.1, %v5439_v31  ;;  %v9618_v38 = vpop.permute.xlu0 %2628  ;;  %v4486_v8 = vsel %vm4460_vm11, %v10329_v20, %v10328_v1  ;;  %v10331_v61 = vld [vmem:[#allocation14_spill] sm:$0xff] }
 0x2c8   :  { %v5399_v49 = vmul.f32 %v6481_v19, %v9568_v35  ;;  %v5231_v17 = vpop.f32.mrb[1].mxu1  ;;  %6499 = vmatprep.mubr.msk.bf16.mxu1 %vm5000_vm4, %v4969_v11  ;;  %v5564_v63 = vmax.f32 %v5436_v15, %v5500_v42  ;;  %v5501_v16 = vmul.f32 0.1, %v5437_v12  ;;  %v10332_v42 = vld [vmem:[#allocation60_spill] sm:$0xff]  ;;  %v10333_v11 = vld [vmem:[#allocation27_spill] sm:$0xff]  ;;  %v10334_v19 = vld [vmem:[#allocation73_spill] sm:$0xff] }
 0x2c9   :  { %v5397_v40 = vmul.f32 %v9568_v35, %v5231_v17  ;;  %v6482_v34 = vpop.f32.mrb[2].mxu1  ;;  %v6344_v52 = vpack.c.bf16 %v5566_v48, %v5566_v48  ;;  %v5567_v3 = vmax.f32 %v5439_v31, %v5503_v23  ;;  %v10330_v31 = vld [vmem:[#allocation41_spill] sm:$0xff]  ;;  %v4551_v29 = vsel %vm4525_vm12, %v4486_v8, %v10334_v19  ;;  %v10336_v23 = vld [vmem:[#allocation28_spill] sm:$0xff] }
 0x2ca   :  { %v5470_v58 = vadd.f32 %v9588_v26, %v5399_v49  ;;  %v5400_v41 = vmul.f32 %v6482_v34, %v9568_v35  ;;  %v4451_v21 = vpop.permute.xlu1 %4450  ;;  %v5234_v51 = vpop.f32.mrb[3].mxu1  ;;  %v6342_v22 = vpack.c.bf16 %v5564_v63, %v5564_v63  ;;  %v5565_v54 = vmax.f32 %v5437_v12, %v5501_v16  ;;  %v10335_v48 = vld [vmem:[#allocation61_spill] sm:$0xff]  ;;  %v10337_v17 = vld [vmem:[#allocation76_spill] sm:$0xff]  ;;  %v10338_v63 = vld [vmem:[#allocation86_spill] sm:$0xff] }
 0x2cb   :  { %v5468_v62 = vadd.f32 %v9588_v26, %v5397_v40  ;;  %v4971_v2 = vsel %vm4915_vm3, %v4906_v4, %v4451_v21  ;;  %5887 = vst.msk [vmem:[%s10107_s4 + $0x8] sm:$0xf] %vm5884_vm0, %v6344_v52  ;;  %v6345_v39 = vpack.c.bf16 %v5567_v3, %v5567_v3  ;;  %v5398_v44 = vmul.f32 %v9568_v35, %v5234_v51  ;;  %v3141_v32 = vpop.permute.xlu0 %3140  ;;  %v10339_v40 = vld [vmem:[#allocation98_spill] sm:$0xff]  ;;  %v10340_v3 = vld [vmem:[#allocation89_spill] sm:$0xff] }
 0x2cc   :  { %v5534_v33 = vmul.f32 0.1, %v5470_v58  ;;  %v5471_v36 = vadd.f32 %v9588_v26, %v5400_v41  ;;  %6500 = vmatmul.mubr.msk.bf16.gmra.mrb[20].mxu1 %vm5000_vm4, %v4971_v2  ;;  %5885 = vst.msk [vmem:[%s10107_s4] sm:$0xf] %vm5884_vm0, %v6342_v22  ;;  %v6343_v0 = vpack.c.bf16 %v5565_v54, %v5565_v54  ;;  %v4488_v24 = vsel %vm4460_vm11, %v10331_v61, %v10330_v31  ;;  %v10341_v41 = vld [vmem:[#allocation101_spill] sm:$0xff] }
 0x2cd   :  { %v5532_v56 = vmul.f32 0.1, %v5468_v62  ;;  %5888 = vst.msk [vmem:[%s10107_s4 + $0xc] sm:$0xf] %vm5884_vm0, %v6345_v39  ;;  %v5469_v28 = vadd.f32 %v9588_v26, %v5398_v44  ;;  %v4518_v12 = vsel %vm4460_vm11, %v10333_v11, %v10332_v42  ;;  %v4520_v49 = vsel %vm4460_vm11, %v10336_v23, %v10335_v48 }
 0x2ce   :  { %v5598_v59 = vmax.f32 %v5470_v58, %v5534_v33  ;;  %v5535_v9 = vmul.f32 0.1, %v5471_v36  ;;  %v2631_v25 = vpop.permute.xlu1 %2630  ;;  %5886 = vst.msk [vmem:[%s10107_s4 + $0x4] sm:$0xf] %vm5884_vm0, %v6343_v0  ;;  %v4553_v4 = vsel %vm4525_vm12, %v4488_v24, %v10337_v17  ;;  %v4583_v16 = vsel %vm4525_vm12, %v4518_v12, %v10338_v63 }
 0x2cf   :  { %v5596_v27 = vmax.f32 %v5468_v62, %v5532_v56  ;;  %v5533_v18 = vmul.f32 0.1, %v5469_v28  ;;  %v3143_v30 = vpop.permute.xlu0 %3142  ;;  %v4616_v34 = vsel %vm4590_vm13, %v4551_v29, %v10339_v40  ;;  %v4585_v58 = vsel %vm4525_vm12, %v4520_v49, %v10340_v3 }
 0x2d0   :  { %v6376_v57 = vpack.c.bf16 %v5598_v59, %v5598_v59  ;;  %v5599_v37 = vmax.f32 %v5471_v36, %v5535_v9  ;;  %v4618_v21 = vsel %vm4590_vm13, %v4553_v4, %v10341_v41  ;;  %v4648_v51 = vsel %vm4590_vm13, %v4583_v16, %v9618_v38 }
 0x2d1   :  { %v6374_v53 = vpack.c.bf16 %v5596_v27, %v5596_v27  ;;  %v5597_v5 = vmax.f32 %v5469_v28, %v5533_v18  ;;  %v4681_v22 = vsel %vm4655_vm14, %v4616_v34, %v3141_v32  ;;  %v4650_v62 = vsel %vm4590_vm13, %v4585_v58, %v2631_v25 }
 0x2d2   :  { %5919 = vst.msk [vmem:[%s10107_s4 + $0x88] sm:$0xf] %vm5884_vm0, %v6376_v57  ;;  %v6377_v60 = vpack.c.bf16 %v5599_v37, %v5599_v37  ;;  %v3173_v6 = vpop.permute.xlu1 %3172  ;;  %v4683_v2 = vsel %vm4655_vm14, %v4618_v21, %v3143_v30 }
 0x2d3   :  { %5917 = vst.msk [vmem:[%s10107_s4 + $0x80] sm:$0xf] %vm5884_vm0, %v6374_v53  ;;  %v6375_v14 = vpack.c.bf16 %v5597_v5, %v5597_v5  ;;  %v3397_v55 = vpop.permute.xlu0 %3396  ;;  %v4713_v0 = vsel %vm4655_vm14, %v4648_v51, %v3173_v6 }
 0x2d4   :  { %5920 = vst.msk [vmem:[%s10107_s4 + $0x8c] sm:$0xf] %vm5884_vm0, %v6377_v60  ;;  %v4746_v39 = vsel %vm4720_vm15, %v4681_v22, %v3397_v55 }
 0x2d5   :  { %5918 = vst.msk [vmem:[%s10107_s4 + $0x84] sm:$0xf] %vm5884_vm0, %v6375_v14 }
 0x2d6   :  { %v3175_v7 = vpop.permute.xlu1 %3174 }
 0x2d7   :  { %v3399_v46 = vpop.permute.xlu0 %3398  ;;  %v4715_v56 = vsel %vm4655_vm14, %v4650_v62, %v3175_v7 }
 0x2d8   :  { %v4748_v9 = vsel %vm4720_vm15, %v4683_v2, %v3399_v46 }
 0x2da   :  { %v3429_v50 = vpop.permute.xlu1 %3428 }
 0x2db   :  { %v3621_v13 = vpop.permute.xlu0 %3620  ;;  %v4778_v18 = vsel %vm4720_vm15, %v4713_v0, %v3429_v50 }
 0x2dc   :  { %v4811_v59 = vsel %vm4785_vm1, %v4746_v39, %v3621_v13 }
 0x2de   :  { %v3431_v10 = vpop.permute.xlu1 %3430 }
 0x2df   :  { %v3623_v47 = vpop.permute.xlu0 %3622  ;;  %v4780_v5 = vsel %vm4720_vm15, %v4715_v56, %v3431_v10 }
 0x2e0   :  { %v4813_v6 = vsel %vm4785_vm1, %v4748_v9, %v3623_v47 }
 0x2e2   :  { %v3653_v15 = vpop.permute.xlu1 %3652 }
 0x2e3   :  { %v4165_v43 = vpop.permute.xlu0 %4164  ;;  %v4843_v46 = vsel %vm4785_vm1, %v4778_v18, %v3653_v15 }
 0x2e4   :  { %v4876_v28 = vsel %vm4850_vm2, %v4811_v59, %v4165_v43 }
 0x2e6   :  { %v9665_v45 = vpop.permute.xlu1 %3654 }
 0x2e7   :  { %v4167_v52 = vpop.permute.xlu0 %4166  ;;  %v4845_v21 = vsel %vm4785_vm1, %v4780_v5, %v9665_v45 }
 0x2e8   :  { %v6453_v54 = vpop.f32.mrb[4].mxu0  ;;  %v4878_v50 = vsel %vm4850_vm2, %v4813_v6, %v4167_v52 }
 0x2e9   :  { %v5371_v36 = vmul.f32 %v6453_v54, %v9568_v35  ;;  %v5119_v44 = vpop.f32.mrb[5].mxu0 }
 0x2ea   :  { %v4197_v33 = vpop.permute.xlu1 %4196  ;;  %v5369_v38 = vmul.f32 %v9568_v35, %v5119_v44  ;;  %v6454_v32 = vpop.f32.mrb[6].mxu0 }
 0x2eb   :  { %v5442_v25 = vadd.f32 %v9588_v26, %v5371_v36  ;;  %v5372_v27 = vmul.f32 %v6454_v32, %v9568_v35  ;;  %v5122_v57 = vpop.f32.mrb[7].mxu0  ;;  %v4421_v37 = vpop.permute.xlu0 %4420  ;;  %v4908_v20 = vsel %vm4850_vm2, %v4843_v46, %v4197_v33  ;;  %v10343_v46 = vld [vmem:[#allocation15_spill] sm:$0xff] }
 0x2ec   :  { %v5440_v30 = vadd.f32 %v9588_v26, %v5369_v38  ;;  %v5370_v53 = vmul.f32 %v9568_v35, %v5122_v57  ;;  %v4941_v60 = vsel %vm4915_vm3, %v4876_v28, %v4421_v37 }
 0x2ed   :  { %v5506_v14 = vmul.f32 0.1, %v5442_v25  ;;  %v5443_v55 = vadd.f32 %v9588_v26, %v5372_v27  ;;  %6471 = vmatprep.mubr.msk.bf16.mxu0 %vm5000_vm4, %v4941_v60 }
 0x2ee   :  { %v4199_v7 = vpop.permute.xlu1 %4198  ;;  %v5504_v13 = vmul.f32 0.1, %v5440_v30  ;;  %v5441_v43 = vadd.f32 %v9588_v26, %v5370_v53 }
 0x2ef   :  { %v6485_v1 = vpop.f32.mrb[4].mxu1  ;;  %v5570_v8 = vmax.f32 %v5442_v25, %v5506_v14  ;;  %v5507_v10 = vmul.f32 0.1, %v5443_v55  ;;  %v4423_v61 = vpop.permute.xlu0 %4422  ;;  %v4910_v54 = vsel %vm4850_vm2, %v4845_v21, %v4199_v7  ;;  %v10342_v7 = vld [vmem:[#allocation42_spill] sm:$0xff] }
 0x2f0   :  { %v5403_v47 = vmul.f32 %v6485_v1, %v9568_v35  ;;  %v5247_v31 = vpop.f32.mrb[5].mxu1  ;;  %v5568_v24 = vmax.f32 %v5440_v30, %v5504_v13  ;;  %v5505_v42 = vmul.f32 0.1, %v5441_v43  ;;  %v4943_v15 = vsel %vm4915_vm3, %v4878_v50, %v4423_v61  ;;  %v10345_v1 = vld [vmem:[#allocation16_spill] sm:$0xff] }
 0x2f1   :  { %v5401_v11 = vmul.f32 %v9568_v35, %v5247_v31  ;;  %v6486_v12 = vpop.f32.mrb[6].mxu1  ;;  %v6348_v19 = vpack.c.bf16 %v5570_v8, %v5570_v8  ;;  %v5571_v29 = vmax.f32 %v5443_v55, %v5507_v10  ;;  %6472 = vmatmul.mubr.msk.bf16.gmra.mrb[24].mxu0 %vm5000_vm4, %v4943_v15  ;;  %v4490_v50 = vsel %vm4460_vm11, %v10343_v46, %v10342_v7  ;;  %v10346_v8 = vld [vmem:[#allocation62_spill] sm:$0xff]  ;;  %v10347_v10 = vld [vmem:[#allocation29_spill] sm:$0xff]  ;;  %v10348_v31 = vld [vmem:[#allocation75_spill] sm:$0xff] }
 0x2f2   :  { %v5474_v48 = vadd.f32 %v9588_v26, %v5403_v47  ;;  %v5404_v23 = vmul.f32 %v6486_v12, %v9568_v35  ;;  %v4453_v49 = vpop.permute.xlu1 %4452  ;;  %v5250_v17 = vpop.f32.mrb[7].mxu1  ;;  %v6346_v4 = vpack.c.bf16 %v5568_v24, %v5568_v24  ;;  %v5569_v63 = vmax.f32 %v5441_v43, %v5505_v42  ;;  %v10344_v43 = vld [vmem:[#allocation43_spill] sm:$0xff]  ;;  %v10350_v42 = vld [vmem:[#allocation30_spill] sm:$0xff]  ;;  %v10351_v12 = vld [vmem:[#allocation77_spill] sm:$0xff] }
 0x2f3   :  { %v5472_v16 = vadd.f32 %v9588_v26, %v5401_v11  ;;  %v4973_v40 = vsel %vm4915_vm3, %v4908_v20, %v4453_v49  ;;  %5891 = vst.msk [vmem:[%s10107_s4 + $0x18] sm:$0xf] %vm5884_vm0, %v6348_v19  ;;  %v6349_v34 = vpack.c.bf16 %v5571_v29, %v5571_v29  ;;  %v5402_v58 = vmul.f32 %v9568_v35, %v5250_v17  ;;  %v2633_v41 = vpop.permute.xlu0 %2632  ;;  %v10349_v24 = vld [vmem:[#allocation63_spill] sm:$0xff]  ;;  %v10352_v19 = vld [vmem:[#allocation88_spill] sm:$0xff]  ;;  %v10354_v17 = vld [vmem:[#allocation90_spill] sm:$0xff] }
 0x2f4   :  { %v5538_v52 = vmul.f32 0.1, %v5474_v48  ;;  %v5475_v3 = vadd.f32 %v9588_v26, %v5404_v23  ;;  %6503 = vmatprep.mubr.msk.bf16.mxu1 %vm5000_vm4, %v4973_v40  ;;  %5889 = vst.msk [vmem:[%s10107_s4 + $0x10] sm:$0xf] %vm5884_vm0, %v6346_v4  ;;  %v6347_v51 = vpack.c.bf16 %v5569_v63, %v5569_v63  ;;  %v4492_v20 = vsel %vm4460_vm11, %v10345_v1, %v10344_v43  ;;  %v10355_v63 = vld [vmem:[#allocation102_spill] sm:$0xff] }
 0x2f5   :  { %v5536_v22 = vmul.f32 0.1, %v5472_v16  ;;  %5892 = vst.msk [vmem:[%s10107_s4 + $0x1c] sm:$0xf] %vm5884_vm0, %v6349_v34  ;;  %v5473_v39 = vadd.f32 %v9588_v26, %v5402_v58  ;;  %v4522_v47 = vsel %vm4460_vm11, %v10347_v10, %v10346_v8  ;;  %v4555_v61 = vsel %vm4525_vm12, %v4490_v50, %v10348_v31 }
 0x2f6   :  { %v5602_v62 = vmax.f32 %v5474_v48, %v5538_v52  ;;  %v5539_v2 = vmul.f32 0.1, %v5475_v3  ;;  %v4455_v33 = vpop.permute.xlu1 %4454  ;;  %5890 = vst.msk [vmem:[%s10107_s4 + $0x14] sm:$0xf] %vm5884_vm0, %v6347_v51  ;;  %v4524_v11 = vsel %vm4460_vm11, %v10350_v42, %v10349_v24  ;;  %v4557_v15 = vsel %vm4525_vm12, %v4492_v20, %v10351_v12  ;;  %v10353_v48 = vld [vmem:[#allocation100_spill] sm:$0xff] }
 0x2f7   :  { %v5600_v45 = vmax.f32 %v5472_v16, %v5536_v22  ;;  %v4975_v36 = vsel %vm4915_vm3, %v4910_v54, %v4455_v33  ;;  %v5537_v56 = vmul.f32 0.1, %v5473_v39  ;;  %v3145_v59 = vpop.permute.xlu0 %3144  ;;  %v4587_v29 = vsel %vm4525_vm12, %v4522_v47, %v10352_v19 }
 0x2f8   :  { %v6380_v44 = vpack.c.bf16 %v5602_v62, %v5602_v62  ;;  %v5603_v0 = vmax.f32 %v5475_v3, %v5539_v2  ;;  %6504 = vmatmul.mubr.msk.bf16.gmra.mrb[24].mxu1 %vm5000_vm4, %v4975_v36  ;;  %v4620_v23 = vsel %vm4590_vm13, %v4555_v61, %v10353_v48  ;;  %v4589_v4 = vsel %vm4525_vm12, %v4524_v11, %v10354_v17 }
 0x2f9   :  { %v6378_v38 = vpack.c.bf16 %v5600_v45, %v5600_v45  ;;  %v5601_v9 = vmax.f32 %v5473_v39, %v5537_v56  ;;  %v4622_v16 = vsel %vm4590_vm13, %v4557_v15, %v10355_v63  ;;  %v4652_v40 = vsel %vm4590_vm13, %v4587_v29, %v2633_v41 }
 0x2fa   :  { %5923 = vst.msk [vmem:[%s10107_s4 + $0x98] sm:$0xf] %vm5884_vm0, %v6380_v44  ;;  %v6381_v32 = vpack.c.bf16 %v5603_v0, %v5603_v0  ;;  %v2635_v28 = vpop.permute.xlu1 %2634  ;;  %v4685_v34 = vsel %vm4655_vm14, %v4620_v23, %v3145_v59 }
 0x2fb   :  { %5921 = vst.msk [vmem:[%s10107_s4 + $0x90] sm:$0xf] %vm5884_vm0, %v6378_v38  ;;  %v6379_v25 = vpack.c.bf16 %v5601_v9, %v5601_v9  ;;  %v3147_v27 = vpop.permute.xlu0 %3146  ;;  %v4654_v3 = vsel %vm4590_vm13, %v4589_v4, %v2635_v28 }
 0x2fc   :  { %5924 = vst.msk [vmem:[%s10107_s4 + $0x9c] sm:$0xf] %vm5884_vm0, %v6381_v32  ;;  %v4687_v58 = vsel %vm4655_vm14, %v4622_v16, %v3147_v27 }
 0x2fd   :  { %5922 = vst.msk [vmem:[%s10107_s4 + $0x94] sm:$0xf] %vm5884_vm0, %v6379_v25 }
 0x2fe   :  { %v3177_v57 = vpop.permute.xlu1 %3176 }
 0x2ff   :  { %v3401_v37 = vpop.permute.xlu0 %3400  ;;  %v4717_v62 = vsel %vm4655_vm14, %v4652_v40, %v3177_v57 }
 0x300   :  { %v4750_v21 = vsel %vm4720_vm15, %v4685_v34, %v3401_v37 }
 0x302   :  { %v3179_v18 = vpop.permute.xlu1 %3178 }
 0x303   :  { %v3403_v30 = vpop.permute.xlu0 %3402  ;;  %v4719_v2 = vsel %vm4655_vm14, %v4654_v3, %v3179_v18 }
 0x304   :  { %v4752_v45 = vsel %vm4720_vm15, %v4687_v58, %v3403_v30 }
 0x306   :  { %v3433_v53 = vpop.permute.xlu1 %3432 }
 0x307   :  { %v3625_v60 = vpop.permute.xlu0 %3624  ;;  %v4782_v38 = vsel %vm4720_vm15, %v4717_v62, %v3433_v53 }
 0x308   :  { %v4815_v39 = vsel %vm4785_vm1, %v4750_v21, %v3625_v60 }
 0x30a   :  { %v3435_v5 = vpop.permute.xlu1 %3434 }
 0x30b   :  { %v3627_v6 = vpop.permute.xlu0 %3626  ;;  %v4784_v25 = vsel %vm4720_vm15, %v4719_v2, %v3435_v5 }
 0x30c   :  { %v4817_v27 = vsel %vm4785_vm1, %v4752_v45, %v3627_v6 }
 0x30e   :  { %v3657_v14 = vpop.permute.xlu1 %3656 }
 0x30f   :  { %v4169_v55 = vpop.permute.xlu0 %4168  ;;  %v4847_v30 = vsel %vm4785_vm1, %v4782_v38, %v3657_v14 }
 0x310   :  { %v4880_v36 = vsel %vm4850_vm2, %v4815_v39, %v4169_v55 }
 0x312   :  { %v9767_v13 = vpop.permute.xlu1 %3658 }
 0x313   :  { %v4171_v49 = vpop.permute.xlu0 %4170  ;;  %v4849_v63 = vsel %vm4785_vm1, %v4784_v25, %v9767_v13 }
 0x314   :  { %v6457_v52 = vpop.f32.mrb[8].mxu0  ;;  %v4882_v53 = vsel %vm4850_vm2, %v4817_v27, %v4171_v49 }
 0x315   :  { %v5375_v22 = vmul.f32 %v6457_v52, %v9568_v35  ;;  %v5135_v54 = vpop.f32.mrb[9].mxu0 }
 0x316   :  { %v4201_v51 = vpop.permute.xlu1 %4200  ;;  %v5373_v41 = vmul.f32 %v9568_v35, %v5135_v54  ;;  %v6458_v33 = vpop.f32.mrb[10].mxu0 }
 0x317   :  { %v5446_v44 = vadd.f32 %v9588_v26, %v5375_v22  ;;  %v5376_v0 = vmul.f32 %v6458_v33, %v9568_v35  ;;  %v5138_v56 = vpop.f32.mrb[11].mxu0  ;;  %v4425_v59 = vpop.permute.xlu0 %4424  ;;  %v4912_v46 = vsel %vm4850_vm2, %v4847_v30, %v4201_v51 }
 0x318   :  { %v5444_v32 = vadd.f32 %v9588_v26, %v5373_v41  ;;  %v5374_v9 = vmul.f32 %v9568_v35, %v5138_v56  ;;  %v4945_v28 = vsel %vm4915_vm3, %v4880_v36, %v4425_v59 }
 0x319   :  { %v5510_v57 = vmul.f32 0.1, %v5446_v44  ;;  %v5447_v37 = vadd.f32 %v9588_v26, %v5376_v0  ;;  %6475 = vmatprep.mubr.msk.bf16.mxu0 %vm5000_vm4, %v4945_v28 }
 0x31a   :  { %v4203_v18 = vpop.permute.xlu1 %4202  ;;  %v5508_v60 = vmul.f32 0.1, %v5444_v32  ;;  %v5445_v55 = vadd.f32 %v9588_v26, %v5374_v9 }
 0x31b   :  { %v6489_v7 = vpop.f32.mrb[8].mxu1  ;;  %v5574_v50 = vmax.f32 %v5446_v44, %v5510_v57  ;;  %v5511_v5 = vmul.f32 0.1, %v5447_v37  ;;  %v4427_v1 = vpop.permute.xlu0 %4426  ;;  %v4914_v34 = vsel %vm4850_vm2, %v4849_v63, %v4203_v18 }
 0x31c   :  { %v5407_v6 = vmul.f32 %v6489_v7, %v9568_v35  ;;  %v5263_v43 = vpop.f32.mrb[9].mxu1  ;;  %v5572_v20 = vmax.f32 %v5444_v32, %v5508_v60  ;;  %v5509_v8 = vmul.f32 0.1, %v5445_v55  ;;  %v4947_v14 = vsel %vm4915_vm3, %v4882_v53, %v4427_v1 }
 0x31d   :  { %v5405_v10 = vmul.f32 %v9568_v35, %v5263_v43  ;;  %v6490_v47 = vpop.f32.mrb[10].mxu1  ;;  %v6352_v31 = vpack.c.bf16 %v5574_v50, %v5574_v50  ;;  %v5575_v61 = vmax.f32 %v5447_v37, %v5511_v5  ;;  %6476 = vmatmul.mubr.msk.bf16.gmra.mrb[28].mxu0 %vm5000_vm4, %v4947_v14 }
 0x31e   :  { %v5478_v24 = vadd.f32 %v9588_v26, %v5407_v6  ;;  %v5408_v42 = vmul.f32 %v6490_v47, %v9568_v35  ;;  %v4457_v11 = vpop.permute.xlu1 %4456  ;;  %v5266_v12 = vpop.f32.mrb[11].mxu1  ;;  %v6350_v15 = vpack.c.bf16 %v5572_v20, %v5572_v20  ;;  %v5573_v19 = vmax.f32 %v5445_v55, %v5509_v8 }
 0x31f   :  { %v5476_v29 = vadd.f32 %v9588_v26, %v5405_v10  ;;  %v4977_v48 = vsel %vm4915_vm3, %v4912_v46, %v4457_v11  ;;  %5895 = vst.msk [vmem:[%s10107_s4 + $0x28] sm:$0xf] %vm5884_vm0, %v6352_v31  ;;  %v6353_v23 = vpack.c.bf16 %v5575_v61, %v5575_v61  ;;  %v5406_v4 = vmul.f32 %v9568_v35, %v5266_v12 }
 0x320   :  { %v5542_v49 = vmul.f32 0.1, %v5478_v24  ;;  %v5479_v17 = vadd.f32 %v9588_v26, %v5408_v42  ;;  %6507 = vmatprep.mubr.msk.bf16.mxu1 %vm5000_vm4, %v4977_v48  ;;  %5893 = vst.msk [vmem:[%s10107_s4 + $0x20] sm:$0xf] %vm5884_vm0, %v6350_v15  ;;  %v6351_v16 = vpack.c.bf16 %v5573_v19, %v5573_v19 }
 0x321   :  { %v5540_v40 = vmul.f32 0.1, %v5476_v29  ;;  %5896 = vst.msk [vmem:[%s10107_s4 + $0x2c] sm:$0xf] %vm5884_vm0, %v6353_v23  ;;  %v5477_v58 = vadd.f32 %v9588_v26, %v5406_v4 }
 0x322   :  { %v5606_v52 = vmax.f32 %v5478_v24, %v5542_v49  ;;  %v5543_v3 = vmul.f32 0.1, %v5479_v17  ;;  %v4459_v21 = vpop.permute.xlu1 %4458  ;;  %5894 = vst.msk [vmem:[%s10107_s4 + $0x24] sm:$0xf] %vm5884_vm0, %v6351_v16 }
 0x323   :  { %v5604_v13 = vmax.f32 %v5476_v29, %v5540_v40  ;;  %v4979_v51 = vsel %vm4915_vm3, %v4914_v34, %v4459_v21  ;;  %v5541_v62 = vmul.f32 0.1, %v5477_v58 }
 0x324   :  { %v6384_v22 = vpack.c.bf16 %v5606_v52, %v5606_v52  ;;  %v5607_v54 = vmax.f32 %v5479_v17, %v5543_v3  ;;  %6508 = vmatmul.mubr.msk.bf16.gmra.mrb[28].mxu1 %vm5000_vm4, %v4979_v51 }
 0x325   :  { %v6382_v2 = vpack.c.bf16 %v5604_v13, %v5604_v13  ;;  %v5605_v41 = vmax.f32 %v5477_v58, %v5541_v62 }
 0x326   :  { %5927 = vst.msk [vmem:[%s10107_s4 + $0xa8] sm:$0xf] %vm5884_vm0, %v6384_v22  ;;  %v6385_v39 = vpack.c.bf16 %v5607_v54, %v5607_v54 }
 0x327   :  { %5925 = vst.msk [vmem:[%s10107_s4 + $0xa0] sm:$0xf] %vm5884_vm0, %v6382_v2  ;;  %v6383_v33 = vpack.c.bf16 %v5605_v41, %v5605_v41 }
 0x328   :  { %5928 = vst.msk [vmem:[%s10107_s4 + $0xac] sm:$0xf] %vm5884_vm0, %v6385_v39 }
 0x329   :  { %5926 = vst.msk [vmem:[%s10107_s4 + $0xa4] sm:$0xf] %vm5884_vm0, %v6383_v33 }
 0x340   :  { %v6461_v45 = vpop.f32.mrb[12].mxu0 }
 0x341   :  { %v5379_v36 = vmul.f32 %v6461_v45, %v9568_v35  ;;  %v5151_v44 = vpop.f32.mrb[13].mxu0 }
 0x342   :  { %v5377_v0 = vmul.f32 %v9568_v35, %v5151_v44  ;;  %v6462_v56 = vpop.f32.mrb[14].mxu0 }
 0x343   :  { %v5450_v59 = vadd.f32 %v9588_v26, %v5379_v36  ;;  %v5380_v38 = vmul.f32 %v6462_v56, %v9568_v35  ;;  %v5154_v32 = vpop.f32.mrb[15].mxu0 }
 0x344   :  { %v5448_v9 = vadd.f32 %v9588_v26, %v5377_v0  ;;  %v5378_v28 = vmul.f32 %v9568_v35, %v5154_v32 }
 0x345   :  { %v5514_v25 = vmul.f32 0.1, %v5450_v59  ;;  %v5451_v27 = vadd.f32 %v9588_v26, %v5380_v38 }
 0x346   :  { %v5512_v57 = vmul.f32 0.1, %v5448_v9  ;;  %v5449_v37 = vadd.f32 %v9588_v26, %v5378_v28 }
 0x347   :  { %v6493_v18 = vpop.f32.mrb[12].mxu1  ;;  %v5578_v30 = vmax.f32 %v5450_v59, %v5514_v25  ;;  %v5515_v53 = vmul.f32 0.1, %v5451_v27 }
 0x348   :  { %v5411_v60 = vmul.f32 %v6493_v18, %v9568_v35  ;;  %v5279_v55 = vpop.f32.mrb[13].mxu1  ;;  %v5576_v7 = vmax.f32 %v5448_v9, %v5512_v57  ;;  %v5513_v46 = vmul.f32 0.1, %v5449_v37 }
 0x349   :  { %v5409_v50 = vmul.f32 %v9568_v35, %v5279_v55  ;;  %v6494_v5 = vpop.f32.mrb[14].mxu1  ;;  %v6356_v6 = vpack.c.bf16 %v5578_v30, %v5578_v30  ;;  %v5579_v43 = vmax.f32 %v5451_v27, %v5515_v53 }
 0x34a   :  { %v5482_v1 = vadd.f32 %v9588_v26, %v5411_v60  ;;  %v5412_v20 = vmul.f32 %v6494_v5, %v9568_v35  ;;  %v5282_v8 = vpop.f32.mrb[15].mxu1  ;;  %v6354_v10 = vpack.c.bf16 %v5576_v7, %v5576_v7  ;;  %v5577_v47 = vmax.f32 %v5449_v37, %v5513_v46 }
 0x34b   :  { %v5480_v14 = vadd.f32 %v9588_v26, %v5409_v50  ;;  %v5410_v31 = vmul.f32 %v9568_v35, %v5282_v8  ;;  %5899 = vst.msk [vmem:[%s10107_s4 + $0x38] sm:$0xf] %vm5884_vm0, %v6356_v6  ;;  %v6357_v61 = vpack.c.bf16 %v5579_v43, %v5579_v43 }
 0x34c   :  { %v5546_v24 = vmul.f32 0.1, %v5482_v1  ;;  %v5483_v42 = vadd.f32 %v9588_v26, %v5412_v20  ;;  %5897 = vst.msk [vmem:[%s10107_s4 + $0x30] sm:$0xf] %vm5884_vm0, %v6354_v10  ;;  %v6355_v11 = vpack.c.bf16 %v5577_v47, %v5577_v47 }
 0x34d   :  { %v5544_v12 = vmul.f32 0.1, %v5480_v14  ;;  %v5481_v15 = vadd.f32 %v9588_v26, %v5410_v31  ;;  %5900 = vst.msk [vmem:[%s10107_s4 + $0x3c] sm:$0xf] %vm5884_vm0, %v6357_v61 }
 0x34e   :  { %v5610_v19 = vmax.f32 %v5482_v1, %v5546_v24  ;;  %v5547_v29 = vmul.f32 0.1, %v5483_v42  ;;  %5898 = vst.msk [vmem:[%s10107_s4 + $0x34] sm:$0xf] %vm5884_vm0, %v6355_v11 }
 0x34f   :  { %v5608_v48 = vmax.f32 %v5480_v14, %v5544_v12  ;;  %v5545_v23 = vmul.f32 0.1, %v5481_v15 }
 0x350   :  { %v6388_v49 = vpack.c.bf16 %v5610_v19, %v5610_v19  ;;  %v5611_v17 = vmax.f32 %v5483_v42, %v5547_v29 }
 0x351   :  { %v6386_v4 = vpack.c.bf16 %v5608_v48, %v5608_v48  ;;  %v5609_v63 = vmax.f32 %v5481_v15, %v5545_v23 }
 0x352   :  { %5931 = vst.msk [vmem:[%s10107_s4 + $0xb8] sm:$0xf] %vm5884_vm0, %v6388_v49  ;;  %v6389_v16 = vpack.c.bf16 %v5611_v17, %v5611_v17 }
 0x353   :  { %5929 = vst.msk [vmem:[%s10107_s4 + $0xb0] sm:$0xf] %vm5884_vm0, %v6386_v4  ;;  %v6387_v40 = vpack.c.bf16 %v5609_v63, %v5609_v63 }
 0x354   :  { %5932 = vst.msk [vmem:[%s10107_s4 + $0xbc] sm:$0xf] %vm5884_vm0, %v6389_v16 }
 0x355   :  { %5930 = vst.msk [vmem:[%s10107_s4 + $0xb4] sm:$0xf] %vm5884_vm0, %v6387_v40 }
 0x36c   :  { %v6465_v34 = vpop.f32.mrb[16].mxu0 }
 0x36d   :  { %v5383_v52 = vmul.f32 %v6465_v34, %v9568_v35  ;;  %v5167_v3 = vpop.f32.mrb[17].mxu0 }
 0x36e   :  { %v5381_v58 = vmul.f32 %v9568_v35, %v5167_v3  ;;  %v6466_v21 = vpop.f32.mrb[18].mxu0 }
 0x36f   :  { %v5454_v13 = vadd.f32 %v9588_v26, %v5383_v52  ;;  %v5384_v51 = vmul.f32 %v6466_v21, %v9568_v35  ;;  %v5170_v22 = vpop.f32.mrb[19].mxu0 }
 0x370   :  { %v5452_v54 = vadd.f32 %v9588_v26, %v5381_v58  ;;  %v5382_v62 = vmul.f32 %v9568_v35, %v5170_v22 }
 0x371   :  { %v5518_v2 = vmul.f32 0.1, %v5454_v13  ;;  %v5455_v39 = vadd.f32 %v9588_v26, %v5384_v51 }
 0x372   :  { %v5516_v41 = vmul.f32 0.1, %v5452_v54  ;;  %v5453_v33 = vadd.f32 %v9588_v26, %v5382_v62 }
 0x373   :  { %v6497_v45 = vpop.f32.mrb[16].mxu1  ;;  %v5582_v36 = vmax.f32 %v5454_v13, %v5518_v2  ;;  %v5519_v44 = vmul.f32 0.1, %v5455_v39 }
 0x374   :  { %v5415_v0 = vmul.f32 %v6497_v45, %v9568_v35  ;;  %v5295_v56 = vpop.f32.mrb[17].mxu1  ;;  %v5580_v59 = vmax.f32 %v5452_v54, %v5516_v41  ;;  %v5517_v38 = vmul.f32 0.1, %v5453_v33 }
 0x375   :  { %v5413_v32 = vmul.f32 %v9568_v35, %v5295_v56  ;;  %v6498_v9 = vpop.f32.mrb[18].mxu1  ;;  %v6360_v28 = vpack.c.bf16 %v5582_v36, %v5582_v36  ;;  %v5583_v25 = vmax.f32 %v5455_v39, %v5519_v44 }
 0x376   :  { %v5486_v27 = vadd.f32 %v9588_v26, %v5415_v0  ;;  %v5416_v57 = vmul.f32 %v6498_v9, %v9568_v35  ;;  %v5298_v37 = vpop.f32.mrb[19].mxu1  ;;  %v6358_v18 = vpack.c.bf16 %v5580_v59, %v5580_v59  ;;  %v5581_v30 = vmax.f32 %v5453_v33, %v5517_v38 }
 0x377   :  { %v5484_v53 = vadd.f32 %v9588_v26, %v5413_v32  ;;  %v5414_v60 = vmul.f32 %v9568_v35, %v5298_v37  ;;  %5903 = vst.msk [vmem:[%s10107_s4 + $0x48] sm:$0xf] %vm5884_vm0, %v6360_v28  ;;  %v6361_v55 = vpack.c.bf16 %v5583_v25, %v5583_v25 }
 0x378   :  { %v5550_v7 = vmul.f32 0.1, %v5486_v27  ;;  %v5487_v46 = vadd.f32 %v9588_v26, %v5416_v57  ;;  %5901 = vst.msk [vmem:[%s10107_s4 + $0x40] sm:$0xf] %vm5884_vm0, %v6358_v18  ;;  %v6359_v50 = vpack.c.bf16 %v5581_v30, %v5581_v30 }
 0x379   :  { %v5548_v5 = vmul.f32 0.1, %v5484_v53  ;;  %v5485_v6 = vadd.f32 %v9588_v26, %v5414_v60  ;;  %5904 = vst.msk [vmem:[%s10107_s4 + $0x4c] sm:$0xf] %vm5884_vm0, %v6361_v55 }
 0x37a   :  { %v5614_v43 = vmax.f32 %v5486_v27, %v5550_v7  ;;  %v5551_v1 = vmul.f32 0.1, %v5487_v46  ;;  %5902 = vst.msk [vmem:[%s10107_s4 + $0x44] sm:$0xf] %vm5884_vm0, %v6359_v50 }
 0x37b   :  { %v5612_v20 = vmax.f32 %v5484_v53, %v5548_v5  ;;  %v5549_v8 = vmul.f32 0.1, %v5485_v6 }
 0x37c   :  { %v6392_v10 = vpack.c.bf16 %v5614_v43, %v5614_v43  ;;  %v5615_v47 = vmax.f32 %v5487_v46, %v5551_v1 }
 0x37d   :  { %v6390_v14 = vpack.c.bf16 %v5612_v20, %v5612_v20  ;;  %v5613_v31 = vmax.f32 %v5485_v6, %v5549_v8 }
 0x37e   :  { %5935 = vst.msk [vmem:[%s10107_s4 + $0xc8] sm:$0xf] %vm5884_vm0, %v6392_v10  ;;  %v6393_v61 = vpack.c.bf16 %v5615_v47, %v5615_v47 }
 0x37f   :  { %5933 = vst.msk [vmem:[%s10107_s4 + $0xc0] sm:$0xf] %vm5884_vm0, %v6390_v14  ;;  %v6391_v24 = vpack.c.bf16 %v5613_v31, %v5613_v31 }
 0x380   :  { %5936 = vst.msk [vmem:[%s10107_s4 + $0xcc] sm:$0xf] %vm5884_vm0, %v6393_v61 }
 0x381   :  { %5934 = vst.msk [vmem:[%s10107_s4 + $0xc4] sm:$0xf] %vm5884_vm0, %v6391_v24 }
 0x398   :  { %v6469_v42 = vpop.f32.mrb[20].mxu0 }
 0x399   :  { %v5387_v11 = vmul.f32 %v6469_v42, %v9568_v35  ;;  %v5183_v12 = vpop.f32.mrb[21].mxu0 }
 0x39a   :  { %v5385_v15 = vmul.f32 %v9568_v35, %v5183_v12  ;;  %v6470_v19 = vpop.f32.mrb[22].mxu0 }
 0x39b   :  { %v5458_v29 = vadd.f32 %v9588_v26, %v5387_v11  ;;  %v5388_v48 = vmul.f32 %v6470_v19, %v9568_v35  ;;  %v5186_v23 = vpop.f32.mrb[23].mxu0 }
 0x39c   :  { %v5456_v49 = vadd.f32 %v9588_v26, %v5385_v15  ;;  %v5386_v17 = vmul.f32 %v9568_v35, %v5186_v23 }
 0x39d   :  { %v5522_v4 = vmul.f32 0.1, %v5458_v29  ;;  %v5459_v63 = vadd.f32 %v9588_v26, %v5388_v48 }
 0x39e   :  { %v5520_v16 = vmul.f32 0.1, %v5456_v49  ;;  %v5457_v40 = vadd.f32 %v9588_v26, %v5386_v17 }
 0x39f   :  { %v6501_v34 = vpop.f32.mrb[20].mxu1  ;;  %v5586_v52 = vmax.f32 %v5458_v29, %v5522_v4  ;;  %v5523_v3 = vmul.f32 0.1, %v5459_v63 }
 0x3a0   :  { %v5419_v58 = vmul.f32 %v6501_v34, %v9568_v35  ;;  %v5311_v21 = vpop.f32.mrb[21].mxu1  ;;  %v5584_v13 = vmax.f32 %v5456_v49, %v5520_v16  ;;  %v5521_v51 = vmul.f32 0.1, %v5457_v40  ;;  %v10023_v16 = vld [vmem:[%s10105_s2] ss:$0 sm:$0xff] }
 0x3a1   :  { %v5417_v22 = vmul.f32 %v9568_v35, %v5311_v21  ;;  %v6502_v54 = vpop.f32.mrb[22].mxu1  ;;  %v6364_v62 = vpack.c.bf16 %v5586_v52, %v5586_v52  ;;  %v5587_v2 = vmax.f32 %v5459_v63, %v5523_v3 }
 0x3a2   :  { %v5490_v39 = vadd.f32 %v9588_v26, %v5419_v58  ;;  %v5420_v41 = vmul.f32 %v6502_v54, %v9568_v35  ;;  %v5314_v33 = vpop.f32.mrb[23].mxu1  ;;  %v6362_v45 = vpack.c.bf16 %v5584_v13, %v5584_v13  ;;  %v5585_v36 = vmax.f32 %v5457_v40, %v5521_v51  ;;  %v6838_v51 = vld [vmem:[%s10106_s3] ss:$0 sm:$0xff] }
 0x3a3   :  { %v5488_v44 = vadd.f32 %v9588_v26, %v5417_v22  ;;  %v5418_v0 = vmul.f32 %v9568_v35, %v5314_v33  ;;  %5907 = vst.msk [vmem:[%s10107_s4 + $0x58] sm:$0xf] %vm5884_vm0, %v6364_v62  ;;  %v6365_v56 = vpack.c.bf16 %v5587_v2, %v5587_v2 }
 0x3a4   :  { %v5554_v59 = vmul.f32 0.1, %v5490_v39  ;;  %v5491_v38 = vadd.f32 %v9588_v26, %v5420_v41  ;;  %5905 = vst.msk [vmem:[%s10107_s4 + $0x50] sm:$0xf] %vm5884_vm0, %v6362_v45  ;;  %v6363_v32 = vpack.c.bf16 %v5585_v36, %v5585_v36 }
 0x3a5   :  { %v5552_v9 = vmul.f32 0.1, %v5488_v44  ;;  %v5489_v28 = vadd.f32 %v9588_v26, %v5418_v0  ;;  %5908 = vst.msk [vmem:[%s10107_s4 + $0x5c] sm:$0xf] %vm5884_vm0, %v6365_v56 }
 0x3a6   :  { %v5618_v25 = vmax.f32 %v5490_v39, %v5554_v59  ;;  %v5555_v27 = vmul.f32 0.1, %v5491_v38  ;;  %5906 = vst.msk [vmem:[%s10107_s4 + $0x54] sm:$0xf] %vm5884_vm0, %v6363_v32 }
 0x3a7   :  { %v5616_v57 = vmax.f32 %v5488_v44, %v5552_v9  ;;  %v5553_v37 = vmul.f32 0.1, %v5489_v28 }
 0x3a8   :  { %v6396_v18 = vpack.c.bf16 %v5618_v25, %v5618_v25  ;;  %v5619_v30 = vmax.f32 %v5491_v38, %v5555_v27 }
 0x3a9   :  { %v6394_v53 = vpack.c.bf16 %v5616_v57, %v5616_v57  ;;  %v5617_v60 = vmax.f32 %v5489_v28, %v5553_v37 }
 0x3aa   :  { %5939 = vst.msk [vmem:[%s10107_s4 + $0xd8] sm:$0xf] %vm5884_vm0, %v6396_v18  ;;  %v6397_v55 = vpack.c.bf16 %v5619_v30, %v5619_v30 }
 0x3ab   :  { %5937 = vst.msk [vmem:[%s10107_s4 + $0xd0] sm:$0xf] %vm5884_vm0, %v6394_v53  ;;  %v6395_v7 = vpack.c.bf16 %v5617_v60, %v5617_v60 }
 0x3ac   :  { %5940 = vst.msk [vmem:[%s10107_s4 + $0xdc] sm:$0xf] %vm5884_vm0, %v6397_v55 }
 0x3ad   :  { %5938 = vst.msk [vmem:[%s10107_s4 + $0xd4] sm:$0xf] %vm5884_vm0, %v6395_v7 }
 0x3c4   :  { %v6473_v46 = vpop.f32.mrb[24].mxu0 }
 0x3c5   :  { %v5391_v50 = vmul.f32 %v6473_v46, %v9568_v35  ;;  %v5199_v5 = vpop.f32.mrb[25].mxu0 }
 0x3c6   :  { %v5389_v6 = vmul.f32 %v9568_v35, %v5199_v5  ;;  %v6474_v43 = vpop.f32.mrb[26].mxu0 }
 0x3c7   :  { %v5462_v1 = vadd.f32 %v9588_v26, %v5391_v50  ;;  %v5392_v20 = vmul.f32 %v6474_v43, %v9568_v35  ;;  %v5202_v8 = vpop.f32.mrb[27].mxu0 }
 0x3c8   :  { %v5460_v10 = vadd.f32 %v9588_v26, %v5389_v6  ;;  %v5390_v47 = vmul.f32 %v9568_v35, %v5202_v8 }
 0x3c9   :  { %v5526_v14 = vmul.f32 0.1, %v5462_v1  ;;  %v5463_v31 = vadd.f32 %v9588_v26, %v5392_v20 }
 0x3ca   :  { %v5524_v61 = vmul.f32 0.1, %v5460_v10  ;;  %v5461_v24 = vadd.f32 %v9588_v26, %v5390_v47 }
 0x3cb   :  { %v6505_v42 = vpop.f32.mrb[24].mxu1  ;;  %v5590_v11 = vmax.f32 %v5462_v1, %v5526_v14  ;;  %v5527_v12 = vmul.f32 0.1, %v5463_v31 }
 0x3cc   :  { %v5423_v15 = vmul.f32 %v6505_v42, %v9568_v35  ;;  %v5327_v19 = vpop.f32.mrb[25].mxu1  ;;  %v5588_v29 = vmax.f32 %v5460_v10, %v5524_v61  ;;  %v5525_v48 = vmul.f32 0.1, %v5461_v24 }
 0x3cd   :  { %v5421_v23 = vmul.f32 %v9568_v35, %v5327_v19  ;;  %v6506_v49 = vpop.f32.mrb[26].mxu1  ;;  %v6368_v17 = vpack.c.bf16 %v5590_v11, %v5590_v11  ;;  %v5591_v4 = vmax.f32 %v5463_v31, %v5527_v12 }
 0x3ce   :  { %v5494_v63 = vadd.f32 %v9588_v26, %v5423_v15  ;;  %v5424_v40 = vmul.f32 %v10023_v16, %v6506_v49  ;;  %v5330_v34 = vpop.f32.mrb[27].mxu1  ;;  %v6366_v52 = vpack.c.bf16 %v5588_v29, %v5588_v29  ;;  %v5589_v3 = vmax.f32 %v5461_v24, %v5525_v48 }
 0x3cf   :  { %v5492_v58 = vadd.f32 %v9588_v26, %v5421_v23  ;;  %v5422_v21 = vmul.f32 %v10023_v16, %v5330_v34  ;;  %5911 = vst.msk [vmem:[%s10107_s4 + $0x68] sm:$0xf] %vm5884_vm0, %v6368_v17  ;;  %v6369_v35 = vpack.c.bf16 %v5591_v4, %v5591_v4 }
 0x3d0   :  { %v5558_v13 = vmul.f32 0.1, %v5494_v63  ;;  %v5495_v22 = vadd.f32 %v6838_v51, %v5424_v40  ;;  %5909 = vst.msk [vmem:[%s10107_s4 + $0x60] sm:$0xf] %vm5884_vm0, %v6366_v52  ;;  %v6367_v26 = vpack.c.bf16 %v5589_v3, %v5589_v3 }
 0x3d1   :  { %v5556_v54 = vmul.f32 0.1, %v5492_v58  ;;  %v5493_v62 = vadd.f32 %v6838_v51, %v5422_v21  ;;  %5912 = vst.msk [vmem:[%s10107_s4 + $0x6c] sm:$0xf] %vm5884_vm0, %v6369_v35 }
 0x3d2   :  { %v5622_v2 = vmax.f32 %v5494_v63, %v5558_v13  ;;  %v5559_v39 = vmul.f32 0.1, %v5495_v22  ;;  %5910 = vst.msk [vmem:[%s10107_s4 + $0x64] sm:$0xf] %vm5884_vm0, %v6367_v26 }
 0x3d3   :  { %v5620_v41 = vmax.f32 %v5492_v58, %v5556_v54  ;;  %v5557_v33 = vmul.f32 0.1, %v5493_v62 }
 0x3d4   :  { %v6400_v45 = vpack.c.bf16 %v5622_v2, %v5622_v2  ;;  %v5623_v36 = vmax.f32 %v5495_v22, %v5559_v39 }
 0x3d5   :  { %v6398_v44 = vpack.c.bf16 %v5620_v41, %v5620_v41  ;;  %v5621_v0 = vmax.f32 %v5493_v62, %v5557_v33 }
 0x3d6   :  { %5943 = vst.msk [vmem:[%s10107_s4 + $0xe8] sm:$0xf] %vm5884_vm0, %v6400_v45  ;;  %v6401_v56 = vpack.c.bf16 %v5623_v36, %v5623_v36 }
 0x3d7   :  { %5941 = vst.msk [vmem:[%s10107_s4 + $0xe0] sm:$0xf] %vm5884_vm0, %v6398_v44  ;;  %v6399_v59 = vpack.c.bf16 %v5621_v0, %v5621_v0 }
 0x3d8   :  { %5944 = vst.msk [vmem:[%s10107_s4 + $0xec] sm:$0xf] %vm5884_vm0, %v6401_v56 }
 0x3d9   :  { %5942 = vst.msk [vmem:[%s10107_s4 + $0xe4] sm:$0xf] %vm5884_vm0, %v6399_v59 }
 0x3f0   :  { %v6477_v38 = vpop.f32.mrb[28].mxu0 }
 0x3f1   :  { %v5395_v32 = vmul.f32 %v10023_v16, %v6477_v38  ;;  %v5215_v9 = vpop.f32.mrb[29].mxu0 }
 0x3f2   :  { %v5393_v28 = vmul.f32 %v10023_v16, %v5215_v9  ;;  %v6478_v25 = vpop.f32.mrb[30].mxu0 }
 0x3f3   :  { %v5466_v27 = vadd.f32 %v6838_v51, %v5395_v32  ;;  %v5396_v57 = vmul.f32 %v10023_v16, %v6478_v25  ;;  %v5218_v37 = vpop.f32.mrb[31].mxu0 }
 0x3f4   :  { %v5464_v18 = vadd.f32 %v6838_v51, %v5393_v28  ;;  %v5394_v30 = vmul.f32 %v10023_v16, %v5218_v37 }
 0x3f5   :  { %v5530_v53 = vmul.f32 0.1, %v5466_v27  ;;  %v5467_v60 = vadd.f32 %v6838_v51, %v5396_v57 }
 0x3f6   :  { %v5528_v55 = vmul.f32 0.1, %v5464_v18  ;;  %v5465_v7 = vadd.f32 %v6838_v51, %v5394_v30 }
 0x3f7   :  { %v6509_v46 = vpop.f32.mrb[28].mxu1  ;;  %v5594_v50 = vmax.f32 %v5466_v27, %v5530_v53  ;;  %v5531_v5 = vmul.f32 0.1, %v5467_v60 }
 0x3f8   :  { %v5427_v6 = vmul.f32 %v10023_v16, %v6509_v46  ;;  %v5343_v43 = vpop.f32.mrb[29].mxu1  ;;  %v5592_v1 = vmax.f32 %v5464_v18, %v5528_v55  ;;  %v5529_v20 = vmul.f32 0.1, %v5465_v7 }
 0x3f9   :  { %v5425_v8 = vmul.f32 %v10023_v16, %v5343_v43  ;;  %v6510_v10 = vpop.f32.mrb[30].mxu1  ;;  %v6372_v47 = vpack.c.bf16 %v5594_v50, %v5594_v50  ;;  %v5595_v14 = vmax.f32 %v5467_v60, %v5531_v5 }
 0x3fa   :  { %v5498_v31 = vadd.f32 %v6838_v51, %v5427_v6  ;;  %v5428_v61 = vmul.f32 %v10023_v16, %v6510_v10  ;;  %v5346_v24 = vpop.f32.mrb[31].mxu1  ;;  %v6370_v42 = vpack.c.bf16 %v5592_v1, %v5592_v1  ;;  %v5593_v11 = vmax.f32 %v5465_v7, %v5529_v20 }
 0x3fb   :  { %v5496_v12 = vadd.f32 %v6838_v51, %v5425_v8  ;;  %v5426_v15 = vmul.f32 %v10023_v16, %v5346_v24  ;;  %5915 = vst.msk [vmem:[%s10107_s4 + $0x78] sm:$0xf] %vm5884_vm0, %v6372_v47  ;;  %v6373_v19 = vpack.c.bf16 %v5595_v14, %v5595_v14 }
 0x3fc   :  { %v5562_v29 = vmul.f32 0.1, %v5498_v31  ;;  %v5499_v48 = vadd.f32 %v6838_v51, %v5428_v61  ;;  %5913 = vst.msk [vmem:[%s10107_s4 + $0x70] sm:$0xf] %vm5884_vm0, %v6370_v42  ;;  %v6371_v23 = vpack.c.bf16 %v5593_v11, %v5593_v11 }
 0x3fd   :  { %v5560_v49 = vmul.f32 0.1, %v5496_v12  ;;  %v5497_v17 = vadd.f32 %v6838_v51, %v5426_v15  ;;  %5916 = vst.msk [vmem:[%s10107_s4 + $0x7c] sm:$0xf] %vm5884_vm0, %v6373_v19 }
 0x3fe   :  { %v5626_v4 = vmax.f32 %v5498_v31, %v5562_v29  ;;  %v5563_v63 = vmul.f32 0.1, %v5499_v48  ;;  %5914 = vst.msk [vmem:[%s10107_s4 + $0x74] sm:$0xf] %vm5884_vm0, %v6371_v23 }
 0x3ff   :  { %v5624_v16 = vmax.f32 %v5496_v12, %v5560_v49  ;;  %v5561_v40 = vmul.f32 0.1, %v5497_v17 }
 0x400   :  { %v6404_v34 = vpack.c.bf16 %v5626_v4, %v5626_v4  ;;  %v5627_v52 = vmax.f32 %v5499_v48, %v5563_v63 }
 0x401   :  { %v6402_v3 = vpack.c.bf16 %v5624_v16, %v5624_v16  ;;  %v5625_v58 = vmax.f32 %v5497_v17, %v5561_v40 }
 0x402   :  { %5947 = vst.msk [vmem:[%s10107_s4 + $0xf8] sm:$0xf] %vm5884_vm0, %v6404_v34  ;;  %v6405_v21 = vpack.c.bf16 %v5627_v52, %v5627_v52 }
 0x403   :  { %5945 = vst.msk [vmem:[%s10107_s4 + $0xf0] sm:$0xf] %vm5884_vm0, %v6402_v3  ;;  %v6403_v35 = vpack.c.bf16 %v5625_v58, %v5625_v58 }
 0x404   :  { %5948 = vst.msk [vmem:[%s10107_s4 + $0xfc] sm:$0xf] %vm5884_vm0, %v6405_v21 }
 0x405   :  { %5946 = vst.msk [vmem:[%s10107_s4 + $0xf4] sm:$0xf] %vm5884_vm0, %v6403_v35 }

</bundles_post_ra>
